<compile_context>
chip_gen: v6e
topology: v6e:2x2x1
jax: 0.10.0
libtpu: 0.0.40
codegen_flags: <defaults>
</compile_context>

<pallas_src>
import functools

import jax
import jax.numpy as jnp
from jax.experimental import pallas as pl
from jax.experimental.pallas import tpu as pltpu

BASE_WIDTH = 8          # real ResNet-50: 64
IN_STRIDE = 2           # matches gaze_network(in_stride=2)


def _round_up(x, m):
    return (x + m - 1) // m * m


def _choose_tile(p, candidates):
    for c in candidates:
        if p % c == 0:
            return c
    return p


# ----------------------------------------------------------------------------
# Pallas kernels
# ----------------------------------------------------------------------------
def _gemm_bias_act_kernel(a_ref, b_ref, shift_ref, *rest, relu, has_res):
    """Grouped, M/N/K-tiled GEMM.

    Accumulates directly into the resident f32 output block; at the last K
    step applies bias (BN shift), optional fused residual and optional ReLU.
    """
    if has_res:
        res_ref, o_ref = rest
    else:
        (o_ref,) = rest
    k = pl.program_id(3)

    @pl.when(k == 0)
    def _():
        o_ref[...] = jnp.zeros_like(o_ref)

    o_ref[...] += jnp.dot(a_ref[...], b_ref[...],
                          preferred_element_type=jnp.float32)

    @pl.when(k == pl.num_programs(3) - 1)
    def _():
        y = o_ref[...] + shift_ref[...]
        if has_res:
            y = y + res_ref[...]
        if relu:
            y = jnp.maximum(y, 0.0)
        o_ref[...] = y


def _max_taps_kernel(*refs):
    """Running max over N tap inputs (last ref is the output)."""
    o_ref = refs[-1]
    m = refs[0][...]
    for r in refs[1:-1]:
        m = jnp.maximum(m, r[...])
    o_ref[...] = m


def _avgpool_kernel(x_ref, o_ref, *, inv_count):
    t = pl.program_id(0)

    @pl.when(t == 0)
    def _():
        o_ref[...] = jnp.zeros_like(o_ref)

    o_ref[...] += jnp.sum(x_ref[...], axis=1)

    @pl.when(t == pl.num_programs(0) - 1)
    def _():
        o_ref[...] = o_ref[...] * inv_count


# ----------------------------------------------------------------------------
# GEMM wrapper (A padded/cast per call; B + shift pre-padded at prep time)
# ----------------------------------------------------------------------------
def grouped_gemm(a, prep, relu, residual=None):
    """out[g, m, n] = act( a[g] @ b[g] + shift[g] (+ residual[g]) ).

    a: (G, M, K) float; prep["b"]: (G, Kp, Np) bf16; prep["shift"]: (G, 1, Np).
    Returns (G, M, cout) f32.
    """
    G, M, K = a.shape
    Kp, Np = prep["kp"], prep["np"]
    TK, TN = prep["tk"], prep["tn"]
    N = prep["cout"]

    Mp8 = _round_up(M, 8)
    TM = min(256, Mp8)
    Mp = _round_up(Mp8, TM)

    a_p = jnp.zeros((G, Mp, Kp), jnp.bfloat16).at[:, :M, :K].set(
        a.astype(jnp.bfloat16))

    inputs = [a_p, prep["b"], prep["shift"]]
    in_specs = [
        pl.BlockSpec((None, TM, TK), lambda g, i, j, k: (g, i, k)),
        pl.BlockSpec((None, TK, TN), lambda g, i, j, k: (g, k, j)),
        pl.BlockSpec((None, 1, TN), lambda g, i, j, k: (g, 0, j)),
    ]
    has_res = residual is not None
    if has_res:
        r_p = jnp.zeros((G, Mp, Np), jnp.float32).at[:, :M, :N].set(
            residual.astype(jnp.float32))
        inputs.append(r_p)
        in_specs.append(pl.BlockSpec((None, TM, TN), lambda g, i, j, k: (g, i, j)))

    grid = (G, Mp // TM, Np // TN, Kp // TK)

    out = pl.pallas_call(
        functools.partial(_gemm_bias_act_kernel, relu=relu, has_res=has_res),
        out_shape=jax.ShapeDtypeStruct((G, Mp, Np), jnp.float32),
        grid_spec=pltpu.PrefetchScalarGridSpec(
            num_scalar_prefetch=0,
            grid=grid,
            in_specs=in_specs,
            out_specs=pl.BlockSpec((None, TM, TN), lambda g, i, j, k: (g, i, j)),
        ),
        compiler_params=pltpu.CompilerParams(
            dimension_semantics=("parallel", "parallel", "parallel", "arbitrary")),
    )(*inputs)
    return out[:, :M, :N]


# ----------------------------------------------------------------------------
# Conv / pool wrappers (im2col glue in plain JAX, compute in Pallas)
# ----------------------------------------------------------------------------
def _extract_taps(xp, kh, kw, stride, oh, ow):
    taps = []
    for i in range(kh):
        for j in range(kw):
            taps.append(
                xp[:, i:i + stride * (oh - 1) + 1:stride,
                      j:j + stride * (ow - 1) + 1:stride, :]
            )
    return taps


def conv_bn_group(x, prep, stride, padding, relu, residual=None):
    """x: (G, B, H, W, Cin) -> (G, B, OH, OW, Cout). BN folded into prep."""
    G, B, H, W, Cin = x.shape
    KH, KW, Cout = prep["kh"], prep["kw"], prep["cout"]

    if KH == 1 and KW == 1 and padding == 0:
        xs = x[:, :, ::stride, ::stride, :] if stride > 1 else x
        OH, OW = xs.shape[2], xs.shape[3]
        a = xs.reshape(G, B * OH * OW, Cin)
    else:
        xm = x.reshape(G * B, H, W, Cin)
        xp = jnp.pad(xm, ((0, 0), (padding, padding), (padding, padding), (0, 0)))
        OH = (H + 2 * padding - KH) // stride + 1
        OW = (W + 2 * padding - KW) // stride + 1
        taps = _extract_taps(xp, KH, KW, stride, OH, OW)
        patches = jnp.concatenate(taps, axis=-1)     # (G*B, OH, OW, KH*KW*Cin)
        a = patches.reshape(G, B * OH * OW, KH * KW * Cin)

    res = residual.reshape(G, -1, Cout) if residual is not None else None
    out = grouped_gemm(a, prep, relu=relu, residual=res)
    return out.reshape(G, B, OH, OW, Cout)


def maxpool_3x3_s2_p1(x):
    """x: (B, H, W, C) f32 -> (B, OH, OW, C). 9 taps as lane-dense inputs."""
    B, H, W, C = x.shape
    kk, stride, pad = 3, 2, 1
    xp = jnp.pad(x, ((0, 0), (pad, pad), (pad, pad), (0, 0)),
                 constant_values=-jnp.inf)
    OH = (H + 2 * pad - kk) // stride + 1
    OW = (W + 2 * pad - kk) // stride + 1
    taps = _extract_taps(xp, kk, kk, stride, OH, OW)       # 9 x (B, OH, OW, C)

    M = B * OH * OW
    Cp = _round_up(C, 128)
    Mp8 = _round_up(M, 8)
    TM = min(512, Mp8)
    Mp = _round_up(Mp8, TM)

    taps_p = [jnp.zeros((Mp, Cp), jnp.float32).at[:M, :C].set(
        t.reshape(M, C).astype(jnp.float32)) for t in taps]

    out = pl.pallas_call(
        _max_taps_kernel,
        out_shape=jax.ShapeDtypeStruct((Mp, Cp), jnp.float32),
        grid_spec=pltpu.PrefetchScalarGridSpec(
            num_scalar_prefetch=0,
            grid=(Mp // TM,),
            in_specs=[pl.BlockSpec((TM, Cp), lambda i: (i, 0))
                      for _ in range(len(taps_p))],
            out_specs=pl.BlockSpec((TM, Cp), lambda i: (i, 0)),
        ),
        compiler_params=pltpu.CompilerParams(dimension_semantics=("parallel",)),
    )(*taps_p)
    return out[:M, :C].reshape(B, OH, OW, C)


def global_avgpool(x):
    """x: (B, H, W, C) f32 -> (B, C) mean over H*W (tiled reduction)."""
    B, H, W, C = x.shape
    HW = H * W
    Cp = _round_up(C, 128)
    HWp8 = _round_up(HW, 8)
    THW = min(512, HWp8)
    HWp = _round_up(HWp8, THW)

    xr = jnp.zeros((B, HWp, Cp), jnp.float32).at[:, :HW, :C].set(
        x.reshape(B, HW, C).astype(jnp.float32))

    out = pl.pallas_call(
        functools.partial(_avgpool_kernel, inv_count=1.0 / HW),
        out_shape=jax.ShapeDtypeStruct((B, Cp), jnp.float32),
        grid_spec=pltpu.PrefetchScalarGridSpec(
            num_scalar_prefetch=0,
            grid=(HWp // THW,),
            in_specs=[pl.BlockSpec((B, THW, Cp), lambda t: (0, t, 0))],
            out_specs=pl.BlockSpec((B, Cp), lambda t: (0, 0)),
        ),
        compiler_params=pltpu.CompilerParams(dimension_semantics=("arbitrary",)),
    )(xr)
    return out[:, :C]


# ----------------------------------------------------------------------------
# Parameters (deterministic synthetic init; structure mirrors ResNet-50)
# ----------------------------------------------------------------------------
class ParamInit:
    def __init__(self, seed):
        self.key = jax.random.PRNGKey(seed)

    def _next(self):
        self.key, k = jax.random.split(self.key)
        return k

    def conv(self, kh, kw, cin, cout):
        fan_in = kh * kw * cin
        return jax.random.normal(self._next(), (kh, kw, cin, cout),
                                 jnp.float32) / jnp.sqrt(float(fan_in))

    def bn(self, c):
        return {
            "gamma": 1.0 + 0.1 * jax.random.normal(self._next(), (c,), jnp.float32),
            "beta": 0.1 * jax.random.normal(self._next(), (c,), jnp.float32),
            "mean": 0.1 * jax.random.normal(self._next(), (c,), jnp.float32),
            "var": 1.0 + 0.1 * jax.random.uniform(self._next(), (c,), jnp.float32),
        }

    def linear(self, cin, cout):
        bound = 1.0 / jnp.sqrt(float(cin))
        w = jax.random.uniform(self._next(), (cin, cout), jnp.float32, -bound, bound)
        b = jax.random.uniform(self._next(), (cout,), jnp.float32, -bound, bound)
        return {"w": w, "b": b}


def make_bottleneck_params(init, inplanes, planes, stride):
    p = {
        "conv1": {"w": init.conv(1, 1, inplanes, planes), "bn": init.bn(planes)},
        "conv2": {"w": init.conv(3, 3, planes, planes), "bn": init.bn(planes)},
        "conv3": {"w": init.conv(1, 1, planes, planes * 4), "bn": init.bn(planes * 4)},
    }
    if stride != 1 or inplanes != planes * 4:
        p["downsample"] = {"w": init.conv(1, 1, inplanes, planes * 4),
                           "bn": init.bn(planes * 4)}
    return p


def make_resnet50_params(init, base):
    params = {"stem": {"w": init.conv(7, 7, 3, base), "bn": init.bn(base)}}
    layers = []
    inplanes = base
    cfg = [(base, 3, 1), (base * 2, 4, 2), (base * 4, 6, 2), (base * 8, 3, 2)]
    for planes, nblocks, stride in cfg:
        blocks = []
        for i in range(nblocks):
            s = stride if i == 0 else 1
            blocks.append(make_bottleneck_params(init, inplanes, planes, s))
            inplanes = planes * 4
        layers.append(blocks)
    params["layers"] = layers
    return params


def make_gaze_network_params(seed=0, base=BASE_WIDTH):
    init = ParamInit(seed)
    feat_dim = base * 8 * 4  # 2048 when base == 64
    return {
        "face": make_resnet50_params(init, base),
        "left": make_resnet50_params(init, base),
        "right": make_resnet50_params(init, base),
        "fc": init.linear(feat_dim * 3, 2),
    }


# ----------------------------------------------------------------------------
# Parameter preparation: fold BN into weights, pad/cast to bf16 once,
# and stack the three towers along a leading group axis.
# ----------------------------------------------------------------------------
def _pad_matrix_bf16(w, kp, npad):
    K, N = w.shape
    return jnp.zeros((kp, npad), jnp.bfloat16).at[:K, :N].set(w.astype(jnp.bfloat16))


def prep_conv_group(conv_list, eps=1e-5):
    KH, KW, Cin, Cout = conv_list[0]["w"].shape
    K = KH * KW * Cin
    Kp = _round_up(K, 128)
    TK = _choose_tile(Kp, (512, 256, 128))
    Np = _round_up(Cout, 128)
    TN = _choose_tile(Np, (256, 128))
    bs, shifts = [], []
    for p in conv_list:
        bn = p["bn"]
        scale = bn["gamma"] / jnp.sqrt(bn["var"] + eps)
        shift = bn["beta"] - bn["mean"] * scale
        wmat = p["w"].reshape(K, Cout).astype(jnp.float32) * scale[None, :]
        bs.append(_pad_matrix_bf16(wmat, Kp, Np))
        shifts.append(jnp.zeros((1, Np), jnp.float32).at[0, :Cout].set(shift))
    return {"b": jnp.stack(bs), "shift": jnp.stack(shifts),
            "kh": KH, "kw": KW, "cin": Cin, "cout": Cout,
            "kp": Kp, "np": Np, "tk": TK, "tn": TN}


def prep_linear_group(lin):
    Cin, Cout = lin["w"].shape
    Kp = _round_up(Cin, 128)
    TK = _choose_tile(Kp, (512, 256, 128))
    Np = _round_up(Cout, 128)
    TN = _choose_tile(Np, (256, 128))
    b = _pad_matrix_bf16(lin["w"].astype(jnp.float32), Kp, Np)[None]
    shift = jnp.zeros((1, 1, Np), jnp.float32).at[0, 0, :Cout].set(lin["b"])
    return {"b": b, "shift": shift, "kh": 1, "kw": 1, "cin": Cin, "cout": Cout,
            "kp": Kp, "np": Np, "tk": TK, "tn": TN}


def prep_bottleneck_group(blocks):
    out = {"conv1": prep_conv_group([b["conv1"] for b in blocks]),
           "conv2": prep_conv_group([b["conv2"] for b in blocks]),
           "conv3": prep_conv_group([b["conv3"] for b in blocks])}
    if "downsample" in blocks[0]:
        out["downsample"] = prep_conv_group([b["downsample"] for b in blocks])
    return out


def prepare_params(params):
    towers = [params["face"], params["left"], params["right"]]
    prep = {"stem": prep_conv_group([t["stem"] for t in towers]), "layers": []}
    for li in range(len(towers[0]["layers"])):
        blocks = []
        for bi in range(len(towers[0]["layers"][li])):
            blocks.append(
                prep_bottleneck_group([t["layers"][li][bi] for t in towers]))
        prep["layers"].append(blocks)
    prep["fc"] = prep_linear_group(params["fc"])
    return prep


# ----------------------------------------------------------------------------
# Forward pass (three towers batched along a leading group axis G=3)
# ----------------------------------------------------------------------------
def bottleneck_forward(x, prep, stride):
    out = conv_bn_group(x, prep["conv1"], stride=1, padding=0, relu=True)
    out = conv_bn_group(out, prep["conv2"], stride=stride, padding=1, relu=True)
    if "downsample" in prep:
        identity = conv_bn_group(x, prep["downsample"], stride=stride,
                                 padding=0, relu=False)
    else:
        identity = x
    # residual add + ReLU fused into the conv3 GEMM epilogue
    return conv_bn_group(out, prep["conv3"], stride=1, padding=0, relu=True,
                         residual=identity)


def towers_forward(x, prep, in_stride):
    # x: (3, B, H, W, 3)
    x = conv_bn_group(x, prep["stem"], stride=in_stride, padding=3, relu=True)
    G, B, H, W, C = x.shape
    xm = maxpool_3x3_s2_p1(x.reshape(G * B, H, W, C))
    x = xm.reshape(G, B, xm.shape[1], xm.shape[2], C)
    for li, blocks in enumerate(prep["layers"]):
        stage_stride = 1 if li == 0 else 2
        for bi, bp in enumerate(blocks):
            s = stage_stride if bi == 0 else 1
            x = bottleneck_forward(x, bp, s)
    G, B, H, W, C = x.shape
    feat = global_avgpool(x.reshape(G * B, H, W, C))     # (G*B, C)
    return feat.reshape(G, B, C)


def gaze_network_forward(prep, face, left, right, in_stride=IN_STRIDE):
    x = jnp.stack([face, left, right], axis=0).astype(jnp.float32)  # (3,B,H,W,3)
    feats = towers_forward(x, prep, in_stride)                      # (3, B, C)
    feature = jnp.concatenate([feats[0], feats[1], feats[2]], axis=1)
    gaze = grouped_gemm(feature[None], prep["fc"], relu=False)[0]
    return gaze


# ----------------------------------------------------------------------------
if __name__ == "__main__":
    key = jax.random.PRNGKey(0)
    kf, kl, kr = jax.random.split(key, 3)
    B, H, W = 2, 16, 16
    # NHWC inputs (PyTorch reference would take (B, 3, 16, 16) NCHW)
    face = jax.random.normal(kf, (B, H, W, 3), jnp.float32)
    left = jax.random.normal(kl, (B, H, W, 3), jnp.float32)
    right = jax.random.normal(kr, (B, H, W, 3), jnp.float32)

    params = make_gaze_network_params(seed=0, base=BASE_WIDTH)
    prepared = prepare_params(params)   # fold BN, pad + cast weights once

    forward = jax.jit(lambda f, l, r: gaze_network_forward(prepared, f, l, r,
                                                           in_stride=IN_STRIDE))
    gaze = forward(face, left, right)
    gaze = jax.block_until_ready(gaze)

    assert gaze.shape == (B, 2), gaze.shape
    assert bool(jnp.all(jnp.isfinite(gaze)))
    print("KERNEL_OK")
</pallas_src>

<mosaic_0001>
module attributes {stable_mosaic.version = 11 : i64} {
  func.func @_gemm_bias_act_kernel(%arg0: i32, %arg1: i32, %arg2: i32, %arg3: i32, %arg4: memref<1x128x256xbf16, #tpu.memory_space<vmem>>, %arg5: memref<1x256x128xbf16, #tpu.memory_space<vmem>>, %arg6: memref<1x1x128xf32, #tpu.memory_space<vmem>>, %arg7: memref<1x128x128xf32, #tpu.memory_space<vmem>>) attributes {dimension_semantics = [#tpu.dimension_semantics<parallel>, #tpu.dimension_semantics<parallel>, #tpu.dimension_semantics<parallel>, #tpu.dimension_semantics<arbitrary>], iteration_bounds = array<i64: 3, 1, 1, 1>, scalar_prefetch = 0 : i64, scratch_operands = 0 : i64, tpu.core_type = #tpu.core_type<tc>, window_params = [{transform_indices = @transform_0, window_bounds = array<i64: 1, 128, 256>}, {transform_indices = @transform_1, window_bounds = array<i64: 1, 256, 128>}, {transform_indices = @transform_2, window_bounds = array<i64: 1, 1, 128>}, {transform_indices = @transform_3, window_bounds = array<i64: 1, 128, 128>}]} {
    %c0_i32 = arith.constant 0 : i32
    %0 = arith.cmpi eq, %arg3, %c0_i32 : i32
    %1 = arith.extui %0 : i1 to i32
    %c0_i32_0 = arith.constant 0 : i32
    %2 = arith.cmpi ne, %1, %c0_i32_0 : i32
    scf.if %2 {
      %cst_14 = arith.constant 0.000000e+00 : f32
      %17 = vector.broadcast %cst_14 : f32 to vector<128x128xf32>
      %c0_15 = arith.constant 0 : index
      %c0_16 = arith.constant 0 : index
      %c0_17 = arith.constant 0 : index
      %18 = vector.load %arg7[%c0_15, %c0_16, %c0_17] : memref<1x128x128xf32, #tpu.memory_space<vmem>>, vector<1x128x128xf32>
      %19 = vector.shape_cast %18 : vector<1x128x128xf32> to vector<128x128xf32>
      %20 = vector.shape_cast %17 : vector<128x128xf32> to vector<1x128x128xf32>
      tpu.vector_store %arg7[%c0_15, %c0_16, %c0_17], %20 {strides = array<i32>} : memref<1x128x128xf32, #tpu.memory_space<vmem>>, vector<1x128x128xf32>,
    } else {
    }
    %c0 = arith.constant 0 : index
    %c0_1 = arith.constant 0 : index
    %c0_2 = arith.constant 0 : index
    %3 = vector.load %arg7[%c0, %c0_1, %c0_2] : memref<1x128x128xf32, #tpu.memory_space<vmem>>, vector<1x128x128xf32>
    %4 = vector.shape_cast %3 : vector<1x128x128xf32> to vector<128x128xf32>
    %c0_3 = arith.constant 0 : index
    %c0_4 = arith.constant 0 : index
    %c0_5 = arith.constant 0 : index
    %5 = vector.load %arg4[%c0_3, %c0_4, %c0_5] : memref<1x128x256xbf16, #tpu.memory_space<vmem>>, vector<1x128x256xbf16>
    %6 = vector.shape_cast %5 : vector<1x128x256xbf16> to vector<128x256xbf16>
    %c0_6 = arith.constant 0 : index
    %c0_7 = arith.constant 0 : index
    %c0_8 = arith.constant 0 : index
    %7 = vector.load %arg5[%c0_6, %c0_7, %c0_8] : memref<1x256x128xbf16, #tpu.memory_space<vmem>>, vector<1x256x128xbf16>
    %8 = vector.shape_cast %7 : vector<1x256x128xbf16> to vector<256x128xbf16>
    %cst = arith.constant dense<0.000000e+00> : vector<128x128xf32>
    %9 = tpu.matmul %6, %8, %cst {dimension_numbers = #tpu.dot_dimension_numbers<[1], [0], [0], [1], [0, 0, 1, 1], [], []>} : vector<128x256xbf16>, vector<256x128xbf16>, vector<128x128xf32> -> vector<128x128xf32>
    %10 = arith.addf %4, %9 : vector<128x128xf32>
    %c0_9 = arith.constant 0 : index
    %c0_10 = arith.constant 0 : index
    %c0_11 = arith.constant 0 : index
    %11 = vector.load %arg7[%c0_9, %c0_10, %c0_11] : memref<1x128x128xf32, #tpu.memory_space<vmem>>, vector<1x128x128xf32>
    %12 = vector.shape_cast %11 : vector<1x128x128xf32> to vector<128x128xf32>
    %13 = vector.shape_cast %10 : vector<128x128xf32> to vector<1x128x128xf32>
    tpu.vector_store %arg7[%c0_9, %c0_10, %c0_11], %13 {strides = array<i32>} : memref<1x128x128xf32, #tpu.memory_space<vmem>>, vector<1x128x128xf32>,
    %c0_i32_12 = arith.constant 0 : i32
    %14 = arith.cmpi eq, %arg3, %c0_i32_12 : i32
    %15 = arith.extui %14 : i1 to i32
    %c0_i32_13 = arith.constant 0 : i32
    %16 = arith.cmpi ne, %15, %c0_i32_13 : i32
    scf.if %16 {
      %c0_14 = arith.constant 0 : index
      %c0_15 = arith.constant 0 : index
      %c0_16 = arith.constant 0 : index
      %17 = vector.load %arg7[%c0_14, %c0_15, %c0_16] : memref<1x128x128xf32, #tpu.memory_space<vmem>>, vector<1x128x128xf32>
      %18 = vector.shape_cast %17 : vector<1x128x128xf32> to vector<128x128xf32>
      %c0_17 = arith.constant 0 : index
      %c0_18 = arith.constant 0 : index
      %c0_19 = arith.constant 0 : index
      %19 = vector.load %arg6[%c0_17, %c0_18, %c0_19] : memref<1x1x128xf32, #tpu.memory_space<vmem>>, vector<1x1x128xf32>
      %20 = vector.shape_cast %19 : vector<1x1x128xf32> to vector<1x128xf32>
      %21 = vector.broadcast %20 : vector<1x128xf32> to vector<128x128xf32>
      %22 = arith.addf %18, %21 : vector<128x128xf32>
      %cst_20 = arith.constant 0.000000e+00 : f32
      %23 = vector.broadcast %cst_20 : f32 to vector<128x128xf32>
      %24 = arith.maximumf %22, %23 : vector<128x128xf32>
      %c0_21 = arith.constant 0 : index
      %c0_22 = arith.constant 0 : index
      %c0_23 = arith.constant 0 : index
      %25 = vector.load %arg7[%c0_21, %c0_22, %c0_23] : memref<1x128x128xf32, #tpu.memory_space<vmem>>, vector<1x128x128xf32>
      %26 = vector.shape_cast %25 : vector<1x128x128xf32> to vector<128x128xf32>
      %27 = vector.shape_cast %24 : vector<128x128xf32> to vector<1x128x128xf32>
      tpu.vector_store %arg7[%c0_21, %c0_22, %c0_23], %27 {strides = array<i32>} : memref<1x128x128xf32, #tpu.memory_space<vmem>>, vector<1x128x128xf32>,
    } else {
    }
    return
  }
  func.func @transform_0(%arg0: i32, %arg1: i32, %arg2: i32, %arg3: i32) -> (i32, i32, i32) {
    %c0_i32 = arith.constant 0 : i32
    return %arg0, %arg1, %arg3 : i32, i32, i32
  }
  func.func @transform_1(%arg0: i32, %arg1: i32, %arg2: i32, %arg3: i32) -> (i32, i32, i32) {
    %c0_i32 = arith.constant 0 : i32
    return %arg0, %arg3, %arg2 : i32, i32, i32
  }
  func.func @transform_2(%arg0: i32, %arg1: i32, %arg2: i32, %arg3: i32) -> (i32, i32, i32) {
    %c0_i32 = arith.constant 0 : i32
    %c0_i32_0 = arith.constant 0 : i32
    return %arg0, %c0_i32, %arg2 : i32, i32, i32
  }
  func.func @transform_3(%arg0: i32, %arg1: i32, %arg2: i32, %arg3: i32) -> (i32, i32, i32) {
    %c0_i32 = arith.constant 0 : i32
    return %arg0, %arg1, %arg2 : i32, i32, i32
  }
}

module attributes {stable_mosaic.version = 11 : i64} {
  func.func @_max_taps_kernel(%arg0: i32, %arg1: memref<96x128xf32, #tpu.memory_space<vmem>>, %arg2: memref<96x128xf32, #tpu.memory_space<vmem>>, %arg3: memref<96x128xf32, #tpu.memory_space<vmem>>, %arg4: memref<96x128xf32, #tpu.memory_space<vmem>>, %arg5: memref<96x128xf32, #tpu.memory_space<vmem>>, %arg6: memref<96x128xf32, #tpu.memory_space<vmem>>, %arg7: memref<96x128xf32, #tpu.memory_space<vmem>>, %arg8: memref<96x128xf32, #tpu.memory_space<vmem>>, %arg9: memref<96x128xf32, #tpu.memory_space<vmem>>, %arg10: memref<96x128xf32, #tpu.memory_space<vmem>>) attributes {dimension_semantics = [#tpu.dimension_semantics<parallel>], iteration_bounds = array<i64: 1>, scalar_prefetch = 0 : i64, scratch_operands = 0 : i64, tpu.core_type = #tpu.core_type<tc>, window_params = [{transform_indices = @transform_0, window_bounds = array<i64: 96, 128>}, {transform_indices = @transform_1, window_bounds = array<i64: 96, 128>}, {transform_indices = @transform_2, window_bounds = array<i64: 96, 128>}, {transform_indices = @transform_3, window_bounds = array<i64: 96, 128>}, {transform_indices = @transform_4, window_bounds = array<i64: 96, 128>}, {transform_indices = @transform_5, window_bounds = array<i64: 96, 128>}, {transform_indices = @transform_6, window_bounds = array<i64: 96, 128>}, {transform_indices = @transform_7, window_bounds = array<i64: 96, 128>}, {transform_indices = @transform_8, window_bounds = array<i64: 96, 128>}, {transform_indices = @transform_9, window_bounds = array<i64: 96, 128>}]} {
    %c0 = arith.constant 0 : index
    %c0_0 = arith.constant 0 : index
    %0 = vector.load %arg1[%c0, %c0_0] : memref<96x128xf32, #tpu.memory_space<vmem>>, vector<96x128xf32>
    %c0_1 = arith.constant 0 : index
    %c0_2 = arith.constant 0 : index
    %1 = vector.load %arg2[%c0_1, %c0_2] : memref<96x128xf32, #tpu.memory_space<vmem>>, vector<96x128xf32>
    %2 = arith.maximumf %0, %1 : vector<96x128xf32>
    %c0_3 = arith.constant 0 : index
    %c0_4 = arith.constant 0 : index
    %3 = vector.load %arg3[%c0_3, %c0_4] : memref<96x128xf32, #tpu.memory_space<vmem>>, vector<96x128xf32>
    %4 = arith.maximumf %2, %3 : vector<96x128xf32>
    %c0_5 = arith.constant 0 : index
    %c0_6 = arith.constant 0 : index
    %5 = vector.load %arg4[%c0_5, %c0_6] : memref<96x128xf32, #tpu.memory_space<vmem>>, vector<96x128xf32>
    %6 = arith.maximumf %4, %5 : vector<96x128xf32>
    %c0_7 = arith.constant 0 : index
    %c0_8 = arith.constant 0 : index
    %7 = vector.load %arg5[%c0_7, %c0_8] : memref<96x128xf32, #tpu.memory_space<vmem>>, vector<96x128xf32>
    %8 = arith.maximumf %6, %7 : vector<96x128xf32>
    %c0_9 = arith.constant 0 : index
    %c0_10 = arith.constant 0 : index
    %9 = vector.load %arg6[%c0_9, %c0_10] : memref<96x128xf32, #tpu.memory_space<vmem>>, vector<96x128xf32>
    %10 = arith.maximumf %8, %9 : vector<96x128xf32>
    %c0_11 = arith.constant 0 : index
    %c0_12 = arith.constant 0 : index
    %11 = vector.load %arg7[%c0_11, %c0_12] : memref<96x128xf32, #tpu.memory_space<vmem>>, vector<96x128xf32>
    %12 = arith.maximumf %10, %11 : vector<96x128xf32>
    %c0_13 = arith.constant 0 : index
    %c0_14 = arith.constant 0 : index
    %13 = vector.load %arg8[%c0_13, %c0_14] : memref<96x128xf32, #tpu.memory_space<vmem>>, vector<96x128xf32>
    %14 = arith.maximumf %12, %13 : vector<96x128xf32>
    %c0_15 = arith.constant 0 : index
    %c0_16 = arith.constant 0 : index
    %15 = vector.load %arg9[%c0_15, %c0_16] : memref<96x128xf32, #tpu.memory_space<vmem>>, vector<96x128xf32>
    %16 = arith.maximumf %14, %15 : vector<96x128xf32>
    %c0_17 = arith.constant 0 : index
    %c0_18 = arith.constant 0 : index
    %17 = vector.load %arg10[%c0_17, %c0_18] : memref<96x128xf32, #tpu.memory_space<vmem>>, vector<96x128xf32>
    tpu.vector_store %arg10[%c0_17, %c0_18], %16 {strides = array<i32>} : memref<96x128xf32, #tpu.memory_space<vmem>>, vector<96x128xf32>,
    return
  }
  func.func @transform_0(%arg0: i32) -> (i32, i32) {
    %c0_i32 = arith.constant 0 : i32
    %c0_i32_0 = arith.constant 0 : i32
    return %arg0, %c0_i32 : i32, i32
  }
  func.func @transform_1(%arg0: i32) -> (i32, i32) {
    %c0_i32 = arith.constant 0 : i32
    %c0_i32_0 = arith.constant 0 : i32
    return %arg0, %c0_i32 : i32, i32
  }
  func.func @transform_2(%arg0: i32) -> (i32, i32) {
    %c0_i32 = arith.constant 0 : i32
    %c0_i32_0 = arith.constant 0 : i32
    return %arg0, %c0_i32 : i32, i32
  }
  func.func @transform_3(%arg0: i32) -> (i32, i32) {
    %c0_i32 = arith.constant 0 : i32
    %c0_i32_0 = arith.constant 0 : i32
    return %arg0, %c0_i32 : i32, i32
  }
  func.func @transform_4(%arg0: i32) -> (i32, i32) {
    %c0_i32 = arith.constant 0 : i32
    %c0_i32_0 = arith.constant 0 : i32
    return %arg0, %c0_i32 : i32, i32
  }
  func.func @transform_5(%arg0: i32) -> (i32, i32) {
    %c0_i32 = arith.constant 0 : i32
    %c0_i32_0 = arith.constant 0 : i32
    return %arg0, %c0_i32 : i32, i32
  }
  func.func @transform_6(%arg0: i32) -> (i32, i32) {
    %c0_i32 = arith.constant 0 : i32
    %c0_i32_0 = arith.constant 0 : i32
    return %arg0, %c0_i32 : i32, i32
  }
  func.func @transform_7(%arg0: i32) -> (i32, i32) {
    %c0_i32 = arith.constant 0 : i32
    %c0_i32_0 = arith.constant 0 : i32
    return %arg0, %c0_i32 : i32, i32
  }
  func.func @transform_8(%arg0: i32) -> (i32, i32) {
    %c0_i32 = arith.constant 0 : i32
    %c0_i32_0 = arith.constant 0 : i32
    return %arg0, %c0_i32 : i32, i32
  }
  func.func @transform_9(%arg0: i32) -> (i32, i32) {
    %c0_i32 = arith.constant 0 : i32
    %c0_i32_0 = arith.constant 0 : i32
    return %arg0, %c0_i32 : i32, i32
  }
}

module attributes {stable_mosaic.version = 11 : i64} {
  func.func @_gemm_bias_act_kernel(%arg0: i32, %arg1: i32, %arg2: i32, %arg3: i32, %arg4: memref<1x32x128xbf16, #tpu.memory_space<vmem>>, %arg5: memref<1x128x128xbf16, #tpu.memory_space<vmem>>, %arg6: memref<1x1x128xf32, #tpu.memory_space<vmem>>, %arg7: memref<1x32x128xf32, #tpu.memory_space<vmem>>) attributes {dimension_semantics = [#tpu.dimension_semantics<parallel>, #tpu.dimension_semantics<parallel>, #tpu.dimension_semantics<parallel>, #tpu.dimension_semantics<arbitrary>], iteration_bounds = array<i64: 3, 1, 1, 1>, scalar_prefetch = 0 : i64, scratch_operands = 0 : i64, tpu.core_type = #tpu.core_type<tc>, window_params = [{transform_indices = @transform_0, window_bounds = array<i64: 1, 32, 128>}, {transform_indices = @transform_1, window_bounds = array<i64: 1, 128, 128>}, {transform_indices = @transform_2, window_bounds = array<i64: 1, 1, 128>}, {transform_indices = @transform_3, window_bounds = array<i64: 1, 32, 128>}]} {
    %c0_i32 = arith.constant 0 : i32
    %0 = arith.cmpi eq, %arg3, %c0_i32 : i32
    %1 = arith.extui %0 : i1 to i32
    %c0_i32_0 = arith.constant 0 : i32
    %2 = arith.cmpi ne, %1, %c0_i32_0 : i32
    scf.if %2 {
      %cst_14 = arith.constant 0.000000e+00 : f32
      %17 = vector.broadcast %cst_14 : f32 to vector<32x128xf32>
      %c0_15 = arith.constant 0 : index
      %c0_16 = arith.constant 0 : index
      %c0_17 = arith.constant 0 : index
      %18 = vector.load %arg7[%c0_15, %c0_16, %c0_17] : memref<1x32x128xf32, #tpu.memory_space<vmem>>, vector<1x32x128xf32>
      %19 = vector.shape_cast %18 : vector<1x32x128xf32> to vector<32x128xf32>
      %20 = vector.shape_cast %17 : vector<32x128xf32> to vector<1x32x128xf32>
      tpu.vector_store %arg7[%c0_15, %c0_16, %c0_17], %20 {strides = array<i32>} : memref<1x32x128xf32, #tpu.memory_space<vmem>>, vector<1x32x128xf32>,
    } else {
    }
    %c0 = arith.constant 0 : index
    %c0_1 = arith.constant 0 : index
    %c0_2 = arith.constant 0 : index
    %3 = vector.load %arg7[%c0, %c0_1, %c0_2] : memref<1x32x128xf32, #tpu.memory_space<vmem>>, vector<1x32x128xf32>
    %4 = vector.shape_cast %3 : vector<1x32x128xf32> to vector<32x128xf32>
    %c0_3 = arith.constant 0 : index
    %c0_4 = arith.constant 0 : index
    %c0_5 = arith.constant 0 : index
    %5 = vector.load %arg4[%c0_3, %c0_4, %c0_5] : memref<1x32x128xbf16, #tpu.memory_space<vmem>>, vector<1x32x128xbf16>
    %6 = vector.shape_cast %5 : vector<1x32x128xbf16> to vector<32x128xbf16>
    %c0_6 = arith.constant 0 : index
    %c0_7 = arith.constant 0 : index
    %c0_8 = arith.constant 0 : index
    %7 = vector.load %arg5[%c0_6, %c0_7, %c0_8] : memref<1x128x128xbf16, #tpu.memory_space<vmem>>, vector<1x128x128xbf16>
    %8 = vector.shape_cast %7 : vector<1x128x128xbf16> to vector<128x128xbf16>
    %cst = arith.constant dense<0.000000e+00> : vector<32x128xf32>
    %9 = tpu.matmul %6, %8, %cst {dimension_numbers = #tpu.dot_dimension_numbers<[1], [0], [0], [1], [0, 0, 1, 1], [], []>} : vector<32x128xbf16>, vector<128x128xbf16>, vector<32x128xf32> -> vector<32x128xf32>
    %10 = arith.addf %4, %9 : vector<32x128xf32>
    %c0_9 = arith.constant 0 : index
    %c0_10 = arith.constant 0 : index
    %c0_11 = arith.constant 0 : index
    %11 = vector.load %arg7[%c0_9, %c0_10, %c0_11] : memref<1x32x128xf32, #tpu.memory_space<vmem>>, vector<1x32x128xf32>
    %12 = vector.shape_cast %11 : vector<1x32x128xf32> to vector<32x128xf32>
    %13 = vector.shape_cast %10 : vector<32x128xf32> to vector<1x32x128xf32>
    tpu.vector_store %arg7[%c0_9, %c0_10, %c0_11], %13 {strides = array<i32>} : memref<1x32x128xf32, #tpu.memory_space<vmem>>, vector<1x32x128xf32>,
    %c0_i32_12 = arith.constant 0 : i32
    %14 = arith.cmpi eq, %arg3, %c0_i32_12 : i32
    %15 = arith.extui %14 : i1 to i32
    %c0_i32_13 = arith.constant 0 : i32
    %16 = arith.cmpi ne, %15, %c0_i32_13 : i32
    scf.if %16 {
      %c0_14 = arith.constant 0 : index
      %c0_15 = arith.constant 0 : index
      %c0_16 = arith.constant 0 : index
      %17 = vector.load %arg7[%c0_14, %c0_15, %c0_16] : memref<1x32x128xf32, #tpu.memory_space<vmem>>, vector<1x32x128xf32>
      %18 = vector.shape_cast %17 : vector<1x32x128xf32> to vector<32x128xf32>
      %c0_17 = arith.constant 0 : index
      %c0_18 = arith.constant 0 : index
      %c0_19 = arith.constant 0 : index
      %19 = vector.load %arg6[%c0_17, %c0_18, %c0_19] : memref<1x1x128xf32, #tpu.memory_space<vmem>>, vector<1x1x128xf32>
      %20 = vector.shape_cast %19 : vector<1x1x128xf32> to vector<1x128xf32>
      %21 = vector.broadcast %20 : vector<1x128xf32> to vector<32x128xf32>
      %22 = arith.addf %18, %21 : vector<32x128xf32>
      %cst_20 = arith.constant 0.000000e+00 : f32
      %23 = vector.broadcast %cst_20 : f32 to vector<32x128xf32>
      %24 = arith.maximumf %22, %23 : vector<32x128xf32>
      %c0_21 = arith.constant 0 : index
      %c0_22 = arith.constant 0 : index
      %c0_23 = arith.constant 0 : index
      %25 = vector.load %arg7[%c0_21, %c0_22, %c0_23] : memref<1x32x128xf32, #tpu.memory_space<vmem>>, vector<1x32x128xf32>
      %26 = vector.shape_cast %25 : vector<1x32x128xf32> to vector<32x128xf32>
      %27 = vector.shape_cast %24 : vector<32x128xf32> to vector<1x32x128xf32>
      tpu.vector_store %arg7[%c0_21, %c0_22, %c0_23], %27 {strides = array<i32>} : memref<1x32x128xf32, #tpu.memory_space<vmem>>, vector<1x32x128xf32>,
    } else {
    }
    return
  }
  func.func @transform_0(%arg0: i32, %arg1: i32, %arg2: i32, %arg3: i32) -> (i32, i32, i32) {
    %c0_i32 = arith.constant 0 : i32
    return %arg0, %arg1, %arg3 : i32, i32, i32
  }
  func.func @transform_1(%arg0: i32, %arg1: i32, %arg2: i32, %arg3: i32) -> (i32, i32, i32) {
    %c0_i32 = arith.constant 0 : i32
    return %arg0, %arg3, %arg2 : i32, i32, i32
  }
  func.func @transform_2(%arg0: i32, %arg1: i32, %arg2: i32, %arg3: i32) -> (i32, i32, i32) {
    %c0_i32 = arith.constant 0 : i32
    %c0_i32_0 = arith.constant 0 : i32
    return %arg0, %c0_i32, %arg2 : i32, i32, i32
  }
  func.func @transform_3(%arg0: i32, %arg1: i32, %arg2: i32, %arg3: i32) -> (i32, i32, i32) {
    %c0_i32 = arith.constant 0 : i32
    return %arg0, %arg1, %arg2 : i32, i32, i32
  }
}

module attributes {stable_mosaic.version = 11 : i64} {
  func.func @_gemm_bias_act_kernel(%arg0: i32, %arg1: i32, %arg2: i32, %arg3: i32, %arg4: memref<1x32x128xbf16, #tpu.memory_space<vmem>>, %arg5: memref<1x128x128xbf16, #tpu.memory_space<vmem>>, %arg6: memref<1x1x128xf32, #tpu.memory_space<vmem>>, %arg7: memref<1x32x128xf32, #tpu.memory_space<vmem>>) attributes {dimension_semantics = [#tpu.dimension_semantics<parallel>, #tpu.dimension_semantics<parallel>, #tpu.dimension_semantics<parallel>, #tpu.dimension_semantics<arbitrary>], iteration_bounds = array<i64: 3, 1, 1, 1>, scalar_prefetch = 0 : i64, scratch_operands = 0 : i64, tpu.core_type = #tpu.core_type<tc>, window_params = [{transform_indices = @transform_0, window_bounds = array<i64: 1, 32, 128>}, {transform_indices = @transform_1, window_bounds = array<i64: 1, 128, 128>}, {transform_indices = @transform_2, window_bounds = array<i64: 1, 1, 128>}, {transform_indices = @transform_3, window_bounds = array<i64: 1, 32, 128>}]} {
    %c0_i32 = arith.constant 0 : i32
    %0 = arith.cmpi eq, %arg3, %c0_i32 : i32
    %1 = arith.extui %0 : i1 to i32
    %c0_i32_0 = arith.constant 0 : i32
    %2 = arith.cmpi ne, %1, %c0_i32_0 : i32
    scf.if %2 {
      %cst_14 = arith.constant 0.000000e+00 : f32
      %17 = vector.broadcast %cst_14 : f32 to vector<32x128xf32>
      %c0_15 = arith.constant 0 : index
      %c0_16 = arith.constant 0 : index
      %c0_17 = arith.constant 0 : index
      %18 = vector.load %arg7[%c0_15, %c0_16, %c0_17] : memref<1x32x128xf32, #tpu.memory_space<vmem>>, vector<1x32x128xf32>
      %19 = vector.shape_cast %18 : vector<1x32x128xf32> to vector<32x128xf32>
      %20 = vector.shape_cast %17 : vector<32x128xf32> to vector<1x32x128xf32>
      tpu.vector_store %arg7[%c0_15, %c0_16, %c0_17], %20 {strides = array<i32>} : memref<1x32x128xf32, #tpu.memory_space<vmem>>, vector<1x32x128xf32>,
    } else {
    }
    %c0 = arith.constant 0 : index
    %c0_1 = arith.constant 0 : index
    %c0_2 = arith.constant 0 : index
    %3 = vector.load %arg7[%c0, %c0_1, %c0_2] : memref<1x32x128xf32, #tpu.memory_space<vmem>>, vector<1x32x128xf32>
    %4 = vector.shape_cast %3 : vector<1x32x128xf32> to vector<32x128xf32>
    %c0_3 = arith.constant 0 : index
    %c0_4 = arith.constant 0 : index
    %c0_5 = arith.constant 0 : index
    %5 = vector.load %arg4[%c0_3, %c0_4, %c0_5] : memref<1x32x128xbf16, #tpu.memory_space<vmem>>, vector<1x32x128xbf16>
    %6 = vector.shape_cast %5 : vector<1x32x128xbf16> to vector<32x128xbf16>
    %c0_6 = arith.constant 0 : index
    %c0_7 = arith.constant 0 : index
    %c0_8 = arith.constant 0 : index
    %7 = vector.load %arg5[%c0_6, %c0_7, %c0_8] : memref<1x128x128xbf16, #tpu.memory_space<vmem>>, vector<1x128x128xbf16>
    %8 = vector.shape_cast %7 : vector<1x128x128xbf16> to vector<128x128xbf16>
    %cst = arith.constant dense<0.000000e+00> : vector<32x128xf32>
    %9 = tpu.matmul %6, %8, %cst {dimension_numbers = #tpu.dot_dimension_numbers<[1], [0], [0], [1], [0, 0, 1, 1], [], []>} : vector<32x128xbf16>, vector<128x128xbf16>, vector<32x128xf32> -> vector<32x128xf32>
    %10 = arith.addf %4, %9 : vector<32x128xf32>
    %c0_9 = arith.constant 0 : index
    %c0_10 = arith.constant 0 : index
    %c0_11 = arith.constant 0 : index
    %11 = vector.load %arg7[%c0_9, %c0_10, %c0_11] : memref<1x32x128xf32, #tpu.memory_space<vmem>>, vector<1x32x128xf32>
    %12 = vector.shape_cast %11 : vector<1x32x128xf32> to vector<32x128xf32>
    %13 = vector.shape_cast %10 : vector<32x128xf32> to vector<1x32x128xf32>
    tpu.vector_store %arg7[%c0_9, %c0_10, %c0_11], %13 {strides = array<i32>} : memref<1x32x128xf32, #tpu.memory_space<vmem>>, vector<1x32x128xf32>,
    %c0_i32_12 = arith.constant 0 : i32
    %14 = arith.cmpi eq, %arg3, %c0_i32_12 : i32
    %15 = arith.extui %14 : i1 to i32
    %c0_i32_13 = arith.constant 0 : i32
    %16 = arith.cmpi ne, %15, %c0_i32_13 : i32
    scf.if %16 {
      %c0_14 = arith.constant 0 : index
      %c0_15 = arith.constant 0 : index
      %c0_16 = arith.constant 0 : index
      %17 = vector.load %arg7[%c0_14, %c0_15, %c0_16] : memref<1x32x128xf32, #tpu.memory_space<vmem>>, vector<1x32x128xf32>
      %18 = vector.shape_cast %17 : vector<1x32x128xf32> to vector<32x128xf32>
      %c0_17 = arith.constant 0 : index
      %c0_18 = arith.constant 0 : index
      %c0_19 = arith.constant 0 : index
      %19 = vector.load %arg6[%c0_17, %c0_18, %c0_19] : memref<1x1x128xf32, #tpu.memory_space<vmem>>, vector<1x1x128xf32>
      %20 = vector.shape_cast %19 : vector<1x1x128xf32> to vector<1x128xf32>
      %21 = vector.broadcast %20 : vector<1x128xf32> to vector<32x128xf32>
      %22 = arith.addf %18, %21 : vector<32x128xf32>
      %c0_20 = arith.constant 0 : index
      %c0_21 = arith.constant 0 : index
      %c0_22 = arith.constant 0 : index
      %23 = vector.load %arg7[%c0_20, %c0_21, %c0_22] : memref<1x32x128xf32, #tpu.memory_space<vmem>>, vector<1x32x128xf32>
      %24 = vector.shape_cast %23 : vector<1x32x128xf32> to vector<32x128xf32>
      %25 = vector.shape_cast %22 : vector<32x128xf32> to vector<1x32x128xf32>
      tpu.vector_store %arg7[%c0_20, %c0_21, %c0_22], %25 {strides = array<i32>} : memref<1x32x128xf32, #tpu.memory_space<vmem>>, vector<1x32x128xf32>,
    } else {
    }
    return
  }
  func.func @transform_0(%arg0: i32, %arg1: i32, %arg2: i32, %arg3: i32) -> (i32, i32, i32) {
    %c0_i32 = arith.constant 0 : i32
    return %arg0, %arg1, %arg3 : i32, i32, i32
  }
  func.func @transform_1(%arg0: i32, %arg1: i32, %arg2: i32, %arg3: i32) -> (i32, i32, i32) {
    %c0_i32 = arith.constant 0 : i32
    return %arg0, %arg3, %arg2 : i32, i32, i32
  }
  func.func @transform_2(%arg0: i32, %arg1: i32, %arg2: i32, %arg3: i32) -> (i32, i32, i32) {
    %c0_i32 = arith.constant 0 : i32
    %c0_i32_0 = arith.constant 0 : i32
    return %arg0, %c0_i32, %arg2 : i32, i32, i32
  }
  func.func @transform_3(%arg0: i32, %arg1: i32, %arg2: i32, %arg3: i32) -> (i32, i32, i32) {
    %c0_i32 = arith.constant 0 : i32
    return %arg0, %arg1, %arg2 : i32, i32, i32
  }
}

module attributes {stable_mosaic.version = 11 : i64} {
  func.func @_gemm_bias_act_kernel(%arg0: i32, %arg1: i32, %arg2: i32, %arg3: i32, %arg4: memref<1x32x128xbf16, #tpu.memory_space<vmem>>, %arg5: memref<1x128x128xbf16, #tpu.memory_space<vmem>>, %arg6: memref<1x1x128xf32, #tpu.memory_space<vmem>>, %arg7: memref<1x32x128xf32, #tpu.memory_space<vmem>>, %arg8: memref<1x32x128xf32, #tpu.memory_space<vmem>>) attributes {dimension_semantics = [#tpu.dimension_semantics<parallel>, #tpu.dimension_semantics<parallel>, #tpu.dimension_semantics<parallel>, #tpu.dimension_semantics<arbitrary>], iteration_bounds = array<i64: 3, 1, 1, 1>, scalar_prefetch = 0 : i64, scratch_operands = 0 : i64, tpu.core_type = #tpu.core_type<tc>, window_params = [{transform_indices = @transform_0, window_bounds = array<i64: 1, 32, 128>}, {transform_indices = @transform_1, window_bounds = array<i64: 1, 128, 128>}, {transform_indices = @transform_2, window_bounds = array<i64: 1, 1, 128>}, {transform_indices = @transform_3, window_bounds = array<i64: 1, 32, 128>}, {transform_indices = @transform_4, window_bounds = array<i64: 1, 32, 128>}]} {
    %c0_i32 = arith.constant 0 : i32
    %0 = arith.cmpi eq, %arg3, %c0_i32 : i32
    %1 = arith.extui %0 : i1 to i32
    %c0_i32_0 = arith.constant 0 : i32
    %2 = arith.cmpi ne, %1, %c0_i32_0 : i32
    scf.if %2 {
      %cst_14 = arith.constant 0.000000e+00 : f32
      %17 = vector.broadcast %cst_14 : f32 to vector<32x128xf32>
      %c0_15 = arith.constant 0 : index
      %c0_16 = arith.constant 0 : index
      %c0_17 = arith.constant 0 : index
      %18 = vector.load %arg8[%c0_15, %c0_16, %c0_17] : memref<1x32x128xf32, #tpu.memory_space<vmem>>, vector<1x32x128xf32>
      %19 = vector.shape_cast %18 : vector<1x32x128xf32> to vector<32x128xf32>
      %20 = vector.shape_cast %17 : vector<32x128xf32> to vector<1x32x128xf32>
      tpu.vector_store %arg8[%c0_15, %c0_16, %c0_17], %20 {strides = array<i32>} : memref<1x32x128xf32, #tpu.memory_space<vmem>>, vector<1x32x128xf32>,
    } else {
    }
    %c0 = arith.constant 0 : index
    %c0_1 = arith.constant 0 : index
    %c0_2 = arith.constant 0 : index
    %3 = vector.load %arg8[%c0, %c0_1, %c0_2] : memref<1x32x128xf32, #tpu.memory_space<vmem>>, vector<1x32x128xf32>
    %4 = vector.shape_cast %3 : vector<1x32x128xf32> to vector<32x128xf32>
    %c0_3 = arith.constant 0 : index
    %c0_4 = arith.constant 0 : index
    %c0_5 = arith.constant 0 : index
    %5 = vector.load %arg4[%c0_3, %c0_4, %c0_5] : memref<1x32x128xbf16, #tpu.memory_space<vmem>>, vector<1x32x128xbf16>
    %6 = vector.shape_cast %5 : vector<1x32x128xbf16> to vector<32x128xbf16>
    %c0_6 = arith.constant 0 : index
    %c0_7 = arith.constant 0 : index
    %c0_8 = arith.constant 0 : index
    %7 = vector.load %arg5[%c0_6, %c0_7, %c0_8] : memref<1x128x128xbf16, #tpu.memory_space<vmem>>, vector<1x128x128xbf16>
    %8 = vector.shape_cast %7 : vector<1x128x128xbf16> to vector<128x128xbf16>
    %cst = arith.constant dense<0.000000e+00> : vector<32x128xf32>
    %9 = tpu.matmul %6, %8, %cst {dimension_numbers = #tpu.dot_dimension_numbers<[1], [0], [0], [1], [0, 0, 1, 1], [], []>} : vector<32x128xbf16>, vector<128x128xbf16>, vector<32x128xf32> -> vector<32x128xf32>
    %10 = arith.addf %4, %9 : vector<32x128xf32>
    %c0_9 = arith.constant 0 : index
    %c0_10 = arith.constant 0 : index
    %c0_11 = arith.constant 0 : index
    %11 = vector.load %arg8[%c0_9, %c0_10, %c0_11] : memref<1x32x128xf32, #tpu.memory_space<vmem>>, vector<1x32x128xf32>
    %12 = vector.shape_cast %11 : vector<1x32x128xf32> to vector<32x128xf32>
    %13 = vector.shape_cast %10 : vector<32x128xf32> to vector<1x32x128xf32>
    tpu.vector_store %arg8[%c0_9, %c0_10, %c0_11], %13 {strides = array<i32>} : memref<1x32x128xf32, #tpu.memory_space<vmem>>, vector<1x32x128xf32>,
    %c0_i32_12 = arith.constant 0 : i32
    %14 = arith.cmpi eq, %arg3, %c0_i32_12 : i32
    %15 = arith.extui %14 : i1 to i32
    %c0_i32_13 = arith.constant 0 : i32
    %16 = arith.cmpi ne, %15, %c0_i32_13 : i32
    scf.if %16 {
      %c0_14 = arith.constant 0 : index
      %c0_15 = arith.constant 0 : index
      %c0_16 = arith.constant 0 : index
      %17 = vector.load %arg8[%c0_14, %c0_15, %c0_16] : memref<1x32x128xf32, #tpu.memory_space<vmem>>, vector<1x32x128xf32>
      %18 = vector.shape_cast %17 : vector<1x32x128xf32> to vector<32x128xf32>
      %c0_17 = arith.constant 0 : index
      %c0_18 = arith.constant 0 : index
      %c0_19 = arith.constant 0 : index
      %19 = vector.load %arg6[%c0_17, %c0_18, %c0_19] : memref<1x1x128xf32, #tpu.memory_space<vmem>>, vector<1x1x128xf32>
      %20 = vector.shape_cast %19 : vector<1x1x128xf32> to vector<1x128xf32>
      %21 = vector.broadcast %20 : vector<1x128xf32> to vector<32x128xf32>
      %22 = arith.addf %18, %21 : vector<32x128xf32>
      %c0_20 = arith.constant 0 : index
      %c0_21 = arith.constant 0 : index
      %c0_22 = arith.constant 0 : index
      %23 = vector.load %arg7[%c0_20, %c0_21, %c0_22] : memref<1x32x128xf32, #tpu.memory_space<vmem>>, vector<1x32x128xf32>
      %24 = vector.shape_cast %23 : vector<1x32x128xf32> to vector<32x128xf32>
      %25 = arith.addf %22, %24 : vector<32x128xf32>
      %cst_23 = arith.constant 0.000000e+00 : f32
      %26 = vector.broadcast %cst_23 : f32 to vector<32x128xf32>
      %27 = arith.maximumf %25, %26 : vector<32x128xf32>
      %c0_24 = arith.constant 0 : index
      %c0_25 = arith.constant 0 : index
      %c0_26 = arith.constant 0 : index
      %28 = vector.load %arg8[%c0_24, %c0_25, %c0_26] : memref<1x32x128xf32, #tpu.memory_space<vmem>>, vector<1x32x128xf32>
      %29 = vector.shape_cast %28 : vector<1x32x128xf32> to vector<32x128xf32>
      %30 = vector.shape_cast %27 : vector<32x128xf32> to vector<1x32x128xf32>
      tpu.vector_store %arg8[%c0_24, %c0_25, %c0_26], %30 {strides = array<i32>} : memref<1x32x128xf32, #tpu.memory_space<vmem>>, vector<1x32x128xf32>,
    } else {
    }
    return
  }
  func.func @transform_0(%arg0: i32, %arg1: i32, %arg2: i32, %arg3: i32) -> (i32, i32, i32) {
    %c0_i32 = arith.constant 0 : i32
    return %arg0, %arg1, %arg3 : i32, i32, i32
  }
  func.func @transform_1(%arg0: i32, %arg1: i32, %arg2: i32, %arg3: i32) -> (i32, i32, i32) {
    %c0_i32 = arith.constant 0 : i32
    return %arg0, %arg3, %arg2 : i32, i32, i32
  }
  func.func @transform_2(%arg0: i32, %arg1: i32, %arg2: i32, %arg3: i32) -> (i32, i32, i32) {
    %c0_i32 = arith.constant 0 : i32
    %c0_i32_0 = arith.constant 0 : i32
    return %arg0, %c0_i32, %arg2 : i32, i32, i32
  }
  func.func @transform_3(%arg0: i32, %arg1: i32, %arg2: i32, %arg3: i32) -> (i32, i32, i32) {
    %c0_i32 = arith.constant 0 : i32
    return %arg0, %arg1, %arg2 : i32, i32, i32
  }
  func.func @transform_4(%arg0: i32, %arg1: i32, %arg2: i32, %arg3: i32) -> (i32, i32, i32) {
    %c0_i32 = arith.constant 0 : i32
    return %arg0, %arg1, %arg2 : i32, i32, i32
  }
}

module attributes {stable_mosaic.version = 11 : i64} {
  func.func @_gemm_bias_act_kernel(%arg0: i32, %arg1: i32, %arg2: i32, %arg3: i32, %arg4: memref<1x8x256xbf16, #tpu.memory_space<vmem>>, %arg5: memref<1x256x128xbf16, #tpu.memory_space<vmem>>, %arg6: memref<1x1x128xf32, #tpu.memory_space<vmem>>, %arg7: memref<1x8x128xf32, #tpu.memory_space<vmem>>) attributes {dimension_semantics = [#tpu.dimension_semantics<parallel>, #tpu.dimension_semantics<parallel>, #tpu.dimension_semantics<parallel>, #tpu.dimension_semantics<arbitrary>], iteration_bounds = array<i64: 3, 1, 1, 1>, scalar_prefetch = 0 : i64, scratch_operands = 0 : i64, tpu.core_type = #tpu.core_type<tc>, window_params = [{transform_indices = @transform_0, window_bounds = array<i64: 1, 8, 256>}, {transform_indices = @transform_1, window_bounds = array<i64: 1, 256, 128>}, {transform_indices = @transform_2, window_bounds = array<i64: 1, 1, 128>}, {transform_indices = @transform_3, window_bounds = array<i64: 1, 8, 128>}]} {
    %c0_i32 = arith.constant 0 : i32
    %0 = arith.cmpi eq, %arg3, %c0_i32 : i32
    %1 = arith.extui %0 : i1 to i32
    %c0_i32_0 = arith.constant 0 : i32
    %2 = arith.cmpi ne, %1, %c0_i32_0 : i32
    scf.if %2 {
      %cst_14 = arith.constant 0.000000e+00 : f32
      %17 = vector.broadcast %cst_14 : f32 to vector<8x128xf32>
      %c0_15 = arith.constant 0 : index
      %c0_16 = arith.constant 0 : index
      %c0_17 = arith.constant 0 : index
      %18 = vector.load %arg7[%c0_15, %c0_16, %c0_17] : memref<1x8x128xf32, #tpu.memory_space<vmem>>, vector<1x8x128xf32>
      %19 = vector.shape_cast %18 : vector<1x8x128xf32> to vector<8x128xf32>
      %20 = vector.shape_cast %17 : vector<8x128xf32> to vector<1x8x128xf32>
      tpu.vector_store %arg7[%c0_15, %c0_16, %c0_17], %20 {strides = array<i32>} : memref<1x8x128xf32, #tpu.memory_space<vmem>>, vector<1x8x128xf32>,
    } else {
    }
    %c0 = arith.constant 0 : index
    %c0_1 = arith.constant 0 : index
    %c0_2 = arith.constant 0 : index
    %3 = vector.load %arg7[%c0, %c0_1, %c0_2] : memref<1x8x128xf32, #tpu.memory_space<vmem>>, vector<1x8x128xf32>
    %4 = vector.shape_cast %3 : vector<1x8x128xf32> to vector<8x128xf32>
    %c0_3 = arith.constant 0 : index
    %c0_4 = arith.constant 0 : index
    %c0_5 = arith.constant 0 : index
    %5 = vector.load %arg4[%c0_3, %c0_4, %c0_5] : memref<1x8x256xbf16, #tpu.memory_space<vmem>>, vector<1x8x256xbf16>
    %6 = vector.shape_cast %5 : vector<1x8x256xbf16> to vector<8x256xbf16>
    %c0_6 = arith.constant 0 : index
    %c0_7 = arith.constant 0 : index
    %c0_8 = arith.constant 0 : index
    %7 = vector.load %arg5[%c0_6, %c0_7, %c0_8] : memref<1x256x128xbf16, #tpu.memory_space<vmem>>, vector<1x256x128xbf16>
    %8 = vector.shape_cast %7 : vector<1x256x128xbf16> to vector<256x128xbf16>
    %cst = arith.constant dense<0.000000e+00> : vector<8x128xf32>
    %9 = tpu.matmul %6, %8, %cst {dimension_numbers = #tpu.dot_dimension_numbers<[1], [0], [0], [1], [0, 0, 1, 1], [], []>} : vector<8x256xbf16>, vector<256x128xbf16>, vector<8x128xf32> -> vector<8x128xf32>
    %10 = arith.addf %4, %9 : vector<8x128xf32>
    %c0_9 = arith.constant 0 : index
    %c0_10 = arith.constant 0 : index
    %c0_11 = arith.constant 0 : index
    %11 = vector.load %arg7[%c0_9, %c0_10, %c0_11] : memref<1x8x128xf32, #tpu.memory_space<vmem>>, vector<1x8x128xf32>
    %12 = vector.shape_cast %11 : vector<1x8x128xf32> to vector<8x128xf32>
    %13 = vector.shape_cast %10 : vector<8x128xf32> to vector<1x8x128xf32>
    tpu.vector_store %arg7[%c0_9, %c0_10, %c0_11], %13 {strides = array<i32>} : memref<1x8x128xf32, #tpu.memory_space<vmem>>, vector<1x8x128xf32>,
    %c0_i32_12 = arith.constant 0 : i32
    %14 = arith.cmpi eq, %arg3, %c0_i32_12 : i32
    %15 = arith.extui %14 : i1 to i32
    %c0_i32_13 = arith.constant 0 : i32
    %16 = arith.cmpi ne, %15, %c0_i32_13 : i32
    scf.if %16 {
      %c0_14 = arith.constant 0 : index
      %c0_15 = arith.constant 0 : index
      %c0_16 = arith.constant 0 : index
      %17 = vector.load %arg7[%c0_14, %c0_15, %c0_16] : memref<1x8x128xf32, #tpu.memory_space<vmem>>, vector<1x8x128xf32>
      %18 = vector.shape_cast %17 : vector<1x8x128xf32> to vector<8x128xf32>
      %c0_17 = arith.constant 0 : index
      %c0_18 = arith.constant 0 : index
      %c0_19 = arith.constant 0 : index
      %19 = vector.load %arg6[%c0_17, %c0_18, %c0_19] : memref<1x1x128xf32, #tpu.memory_space<vmem>>, vector<1x1x128xf32>
      %20 = vector.shape_cast %19 : vector<1x1x128xf32> to vector<1x128xf32>
      %21 = vector.broadcast %20 : vector<1x128xf32> to vector<8x128xf32>
      %22 = arith.addf %18, %21 : vector<8x128xf32>
      %cst_20 = arith.constant 0.000000e+00 : f32
      %23 = vector.broadcast %cst_20 : f32 to vector<8x128xf32>
      %24 = arith.maximumf %22, %23 : vector<8x128xf32>
      %c0_21 = arith.constant 0 : index
      %c0_22 = arith.constant 0 : index
      %c0_23 = arith.constant 0 : index
      %25 = vector.load %arg7[%c0_21, %c0_22, %c0_23] : memref<1x8x128xf32, #tpu.memory_space<vmem>>, vector<1x8x128xf32>
      %26 = vector.shape_cast %25 : vector<1x8x128xf32> to vector<8x128xf32>
      %27 = vector.shape_cast %24 : vector<8x128xf32> to vector<1x8x128xf32>
      tpu.vector_store %arg7[%c0_21, %c0_22, %c0_23], %27 {strides = array<i32>} : memref<1x8x128xf32, #tpu.memory_space<vmem>>, vector<1x8x128xf32>,
    } else {
    }
    return
  }
  func.func @transform_0(%arg0: i32, %arg1: i32, %arg2: i32, %arg3: i32) -> (i32, i32, i32) {
    %c0_i32 = arith.constant 0 : i32
    return %arg0, %arg1, %arg3 : i32, i32, i32
  }
  func.func @transform_1(%arg0: i32, %arg1: i32, %arg2: i32, %arg3: i32) -> (i32, i32, i32) {
    %c0_i32 = arith.constant 0 : i32
    return %arg0, %arg3, %arg2 : i32, i32, i32
  }
  func.func @transform_2(%arg0: i32, %arg1: i32, %arg2: i32, %arg3: i32) -> (i32, i32, i32) {
    %c0_i32 = arith.constant 0 : i32
    %c0_i32_0 = arith.constant 0 : i32
    return %arg0, %c0_i32, %arg2 : i32, i32, i32
  }
  func.func @transform_3(%arg0: i32, %arg1: i32, %arg2: i32, %arg3: i32) -> (i32, i32, i32) {
    %c0_i32 = arith.constant 0 : i32
    return %arg0, %arg1, %arg2 : i32, i32, i32
  }
}

module attributes {stable_mosaic.version = 11 : i64} {
  func.func @_gemm_bias_act_kernel(%arg0: i32, %arg1: i32, %arg2: i32, %arg3: i32, %arg4: memref<1x8x128xbf16, #tpu.memory_space<vmem>>, %arg5: memref<1x128x128xbf16, #tpu.memory_space<vmem>>, %arg6: memref<1x1x128xf32, #tpu.memory_space<vmem>>, %arg7: memref<1x8x128xf32, #tpu.memory_space<vmem>>) attributes {dimension_semantics = [#tpu.dimension_semantics<parallel>, #tpu.dimension_semantics<parallel>, #tpu.dimension_semantics<parallel>, #tpu.dimension_semantics<arbitrary>], iteration_bounds = array<i64: 3, 1, 1, 1>, scalar_prefetch = 0 : i64, scratch_operands = 0 : i64, tpu.core_type = #tpu.core_type<tc>, window_params = [{transform_indices = @transform_0, window_bounds = array<i64: 1, 8, 128>}, {transform_indices = @transform_1, window_bounds = array<i64: 1, 128, 128>}, {transform_indices = @transform_2, window_bounds = array<i64: 1, 1, 128>}, {transform_indices = @transform_3, window_bounds = array<i64: 1, 8, 128>}]} {
    %c0_i32 = arith.constant 0 : i32
    %0 = arith.cmpi eq, %arg3, %c0_i32 : i32
    %1 = arith.extui %0 : i1 to i32
    %c0_i32_0 = arith.constant 0 : i32
    %2 = arith.cmpi ne, %1, %c0_i32_0 : i32
    scf.if %2 {
      %cst_14 = arith.constant 0.000000e+00 : f32
      %17 = vector.broadcast %cst_14 : f32 to vector<8x128xf32>
      %c0_15 = arith.constant 0 : index
      %c0_16 = arith.constant 0 : index
      %c0_17 = arith.constant 0 : index
      %18 = vector.load %arg7[%c0_15, %c0_16, %c0_17] : memref<1x8x128xf32, #tpu.memory_space<vmem>>, vector<1x8x128xf32>
      %19 = vector.shape_cast %18 : vector<1x8x128xf32> to vector<8x128xf32>
      %20 = vector.shape_cast %17 : vector<8x128xf32> to vector<1x8x128xf32>
      tpu.vector_store %arg7[%c0_15, %c0_16, %c0_17], %20 {strides = array<i32>} : memref<1x8x128xf32, #tpu.memory_space<vmem>>, vector<1x8x128xf32>,
    } else {
    }
    %c0 = arith.constant 0 : index
    %c0_1 = arith.constant 0 : index
    %c0_2 = arith.constant 0 : index
    %3 = vector.load %arg7[%c0, %c0_1, %c0_2] : memref<1x8x128xf32, #tpu.memory_space<vmem>>, vector<1x8x128xf32>
    %4 = vector.shape_cast %3 : vector<1x8x128xf32> to vector<8x128xf32>
    %c0_3 = arith.constant 0 : index
    %c0_4 = arith.constant 0 : index
    %c0_5 = arith.constant 0 : index
    %5 = vector.load %arg4[%c0_3, %c0_4, %c0_5] : memref<1x8x128xbf16, #tpu.memory_space<vmem>>, vector<1x8x128xbf16>
    %6 = vector.shape_cast %5 : vector<1x8x128xbf16> to vector<8x128xbf16>
    %c0_6 = arith.constant 0 : index
    %c0_7 = arith.constant 0 : index
    %c0_8 = arith.constant 0 : index
    %7 = vector.load %arg5[%c0_6, %c0_7, %c0_8] : memref<1x128x128xbf16, #tpu.memory_space<vmem>>, vector<1x128x128xbf16>
    %8 = vector.shape_cast %7 : vector<1x128x128xbf16> to vector<128x128xbf16>
    %cst = arith.constant dense<0.000000e+00> : vector<8x128xf32>
    %9 = tpu.matmul %6, %8, %cst {dimension_numbers = #tpu.dot_dimension_numbers<[1], [0], [0], [1], [0, 0, 1, 1], [], []>} : vector<8x128xbf16>, vector<128x128xbf16>, vector<8x128xf32> -> vector<8x128xf32>
    %10 = arith.addf %4, %9 : vector<8x128xf32>
    %c0_9 = arith.constant 0 : index
    %c0_10 = arith.constant 0 : index
    %c0_11 = arith.constant 0 : index
    %11 = vector.load %arg7[%c0_9, %c0_10, %c0_11] : memref<1x8x128xf32, #tpu.memory_space<vmem>>, vector<1x8x128xf32>
    %12 = vector.shape_cast %11 : vector<1x8x128xf32> to vector<8x128xf32>
    %13 = vector.shape_cast %10 : vector<8x128xf32> to vector<1x8x128xf32>
    tpu.vector_store %arg7[%c0_9, %c0_10, %c0_11], %13 {strides = array<i32>} : memref<1x8x128xf32, #tpu.memory_space<vmem>>, vector<1x8x128xf32>,
    %c0_i32_12 = arith.constant 0 : i32
    %14 = arith.cmpi eq, %arg3, %c0_i32_12 : i32
    %15 = arith.extui %14 : i1 to i32
    %c0_i32_13 = arith.constant 0 : i32
    %16 = arith.cmpi ne, %15, %c0_i32_13 : i32
    scf.if %16 {
      %c0_14 = arith.constant 0 : index
      %c0_15 = arith.constant 0 : index
      %c0_16 = arith.constant 0 : index
      %17 = vector.load %arg7[%c0_14, %c0_15, %c0_16] : memref<1x8x128xf32, #tpu.memory_space<vmem>>, vector<1x8x128xf32>
      %18 = vector.shape_cast %17 : vector<1x8x128xf32> to vector<8x128xf32>
      %c0_17 = arith.constant 0 : index
      %c0_18 = arith.constant 0 : index
      %c0_19 = arith.constant 0 : index
      %19 = vector.load %arg6[%c0_17, %c0_18, %c0_19] : memref<1x1x128xf32, #tpu.memory_space<vmem>>, vector<1x1x128xf32>
      %20 = vector.shape_cast %19 : vector<1x1x128xf32> to vector<1x128xf32>
      %21 = vector.broadcast %20 : vector<1x128xf32> to vector<8x128xf32>
      %22 = arith.addf %18, %21 : vector<8x128xf32>
      %c0_20 = arith.constant 0 : index
      %c0_21 = arith.constant 0 : index
      %c0_22 = arith.constant 0 : index
      %23 = vector.load %arg7[%c0_20, %c0_21, %c0_22] : memref<1x8x128xf32, #tpu.memory_space<vmem>>, vector<1x8x128xf32>
      %24 = vector.shape_cast %23 : vector<1x8x128xf32> to vector<8x128xf32>
      %25 = vector.shape_cast %22 : vector<8x128xf32> to vector<1x8x128xf32>
      tpu.vector_store %arg7[%c0_20, %c0_21, %c0_22], %25 {strides = array<i32>} : memref<1x8x128xf32, #tpu.memory_space<vmem>>, vector<1x8x128xf32>,
    } else {
    }
    return
  }
  func.func @transform_0(%arg0: i32, %arg1: i32, %arg2: i32, %arg3: i32) -> (i32, i32, i32) {
    %c0_i32 = arith.constant 0 : i32
    return %arg0, %arg1, %arg3 : i32, i32, i32
  }
  func.func @transform_1(%arg0: i32, %arg1: i32, %arg2: i32, %arg3: i32) -> (i32, i32, i32) {
    %c0_i32 = arith.constant 0 : i32
    return %arg0, %arg3, %arg2 : i32, i32, i32
  }
  func.func @transform_2(%arg0: i32, %arg1: i32, %arg2: i32, %arg3: i32) -> (i32, i32, i32) {
    %c0_i32 = arith.constant 0 : i32
    %c0_i32_0 = arith.constant 0 : i32
    return %arg0, %c0_i32, %arg2 : i32, i32, i32
  }
  func.func @transform_3(%arg0: i32, %arg1: i32, %arg2: i32, %arg3: i32) -> (i32, i32, i32) {
    %c0_i32 = arith.constant 0 : i32
    return %arg0, %arg1, %arg2 : i32, i32, i32
  }
}

module attributes {stable_mosaic.version = 11 : i64} {
  func.func @_gemm_bias_act_kernel(%arg0: i32, %arg1: i32, %arg2: i32, %arg3: i32, %arg4: memref<1x8x128xbf16, #tpu.memory_space<vmem>>, %arg5: memref<1x128x128xbf16, #tpu.memory_space<vmem>>, %arg6: memref<1x1x128xf32, #tpu.memory_space<vmem>>, %arg7: memref<1x8x128xf32, #tpu.memory_space<vmem>>, %arg8: memref<1x8x128xf32, #tpu.memory_space<vmem>>) attributes {dimension_semantics = [#tpu.dimension_semantics<parallel>, #tpu.dimension_semantics<parallel>, #tpu.dimension_semantics<parallel>, #tpu.dimension_semantics<arbitrary>], iteration_bounds = array<i64: 3, 1, 1, 1>, scalar_prefetch = 0 : i64, scratch_operands = 0 : i64, tpu.core_type = #tpu.core_type<tc>, window_params = [{transform_indices = @transform_0, window_bounds = array<i64: 1, 8, 128>}, {transform_indices = @transform_1, window_bounds = array<i64: 1, 128, 128>}, {transform_indices = @transform_2, window_bounds = array<i64: 1, 1, 128>}, {transform_indices = @transform_3, window_bounds = array<i64: 1, 8, 128>}, {transform_indices = @transform_4, window_bounds = array<i64: 1, 8, 128>}]} {
    %c0_i32 = arith.constant 0 : i32
    %0 = arith.cmpi eq, %arg3, %c0_i32 : i32
    %1 = arith.extui %0 : i1 to i32
    %c0_i32_0 = arith.constant 0 : i32
    %2 = arith.cmpi ne, %1, %c0_i32_0 : i32
    scf.if %2 {
      %cst_14 = arith.constant 0.000000e+00 : f32
      %17 = vector.broadcast %cst_14 : f32 to vector<8x128xf32>
      %c0_15 = arith.constant 0 : index
      %c0_16 = arith.constant 0 : index
      %c0_17 = arith.constant 0 : index
      %18 = vector.load %arg8[%c0_15, %c0_16, %c0_17] : memref<1x8x128xf32, #tpu.memory_space<vmem>>, vector<1x8x128xf32>
      %19 = vector.shape_cast %18 : vector<1x8x128xf32> to vector<8x128xf32>
      %20 = vector.shape_cast %17 : vector<8x128xf32> to vector<1x8x128xf32>
      tpu.vector_store %arg8[%c0_15, %c0_16, %c0_17], %20 {strides = array<i32>} : memref<1x8x128xf32, #tpu.memory_space<vmem>>, vector<1x8x128xf32>,
    } else {
    }
    %c0 = arith.constant 0 : index
    %c0_1 = arith.constant 0 : index
    %c0_2 = arith.constant 0 : index
    %3 = vector.load %arg8[%c0, %c0_1, %c0_2] : memref<1x8x128xf32, #tpu.memory_space<vmem>>, vector<1x8x128xf32>
    %4 = vector.shape_cast %3 : vector<1x8x128xf32> to vector<8x128xf32>
    %c0_3 = arith.constant 0 : index
    %c0_4 = arith.constant 0 : index
    %c0_5 = arith.constant 0 : index
    %5 = vector.load %arg4[%c0_3, %c0_4, %c0_5] : memref<1x8x128xbf16, #tpu.memory_space<vmem>>, vector<1x8x128xbf16>
    %6 = vector.shape_cast %5 : vector<1x8x128xbf16> to vector<8x128xbf16>
    %c0_6 = arith.constant 0 : index
    %c0_7 = arith.constant 0 : index
    %c0_8 = arith.constant 0 : index
    %7 = vector.load %arg5[%c0_6, %c0_7, %c0_8] : memref<1x128x128xbf16, #tpu.memory_space<vmem>>, vector<1x128x128xbf16>
    %8 = vector.shape_cast %7 : vector<1x128x128xbf16> to vector<128x128xbf16>
    %cst = arith.constant dense<0.000000e+00> : vector<8x128xf32>
    %9 = tpu.matmul %6, %8, %cst {dimension_numbers = #tpu.dot_dimension_numbers<[1], [0], [0], [1], [0, 0, 1, 1], [], []>} : vector<8x128xbf16>, vector<128x128xbf16>, vector<8x128xf32> -> vector<8x128xf32>
    %10 = arith.addf %4, %9 : vector<8x128xf32>
    %c0_9 = arith.constant 0 : index
    %c0_10 = arith.constant 0 : index
    %c0_11 = arith.constant 0 : index
    %11 = vector.load %arg8[%c0_9, %c0_10, %c0_11] : memref<1x8x128xf32, #tpu.memory_space<vmem>>, vector<1x8x128xf32>
    %12 = vector.shape_cast %11 : vector<1x8x128xf32> to vector<8x128xf32>
    %13 = vector.shape_cast %10 : vector<8x128xf32> to vector<1x8x128xf32>
    tpu.vector_store %arg8[%c0_9, %c0_10, %c0_11], %13 {strides = array<i32>} : memref<1x8x128xf32, #tpu.memory_space<vmem>>, vector<1x8x128xf32>,
    %c0_i32_12 = arith.constant 0 : i32
    %14 = arith.cmpi eq, %arg3, %c0_i32_12 : i32
    %15 = arith.extui %14 : i1 to i32
    %c0_i32_13 = arith.constant 0 : i32
    %16 = arith.cmpi ne, %15, %c0_i32_13 : i32
    scf.if %16 {
      %c0_14 = arith.constant 0 : index
      %c0_15 = arith.constant 0 : index
      %c0_16 = arith.constant 0 : index
      %17 = vector.load %arg8[%c0_14, %c0_15, %c0_16] : memref<1x8x128xf32, #tpu.memory_space<vmem>>, vector<1x8x128xf32>
      %18 = vector.shape_cast %17 : vector<1x8x128xf32> to vector<8x128xf32>
      %c0_17 = arith.constant 0 : index
      %c0_18 = arith.constant 0 : index
      %c0_19 = arith.constant 0 : index
      %19 = vector.load %arg6[%c0_17, %c0_18, %c0_19] : memref<1x1x128xf32, #tpu.memory_space<vmem>>, vector<1x1x128xf32>
      %20 = vector.shape_cast %19 : vector<1x1x128xf32> to vector<1x128xf32>
      %21 = vector.broadcast %20 : vector<1x128xf32> to vector<8x128xf32>
      %22 = arith.addf %18, %21 : vector<8x128xf32>
      %c0_20 = arith.constant 0 : index
      %c0_21 = arith.constant 0 : index
      %c0_22 = arith.constant 0 : index
      %23 = vector.load %arg7[%c0_20, %c0_21, %c0_22] : memref<1x8x128xf32, #tpu.memory_space<vmem>>, vector<1x8x128xf32>
      %24 = vector.shape_cast %23 : vector<1x8x128xf32> to vector<8x128xf32>
      %25 = arith.addf %22, %24 : vector<8x128xf32>
      %cst_23 = arith.constant 0.000000e+00 : f32
      %26 = vector.broadcast %cst_23 : f32 to vector<8x128xf32>
      %27 = arith.maximumf %25, %26 : vector<8x128xf32>
      %c0_24 = arith.constant 0 : index
      %c0_25 = arith.constant 0 : index
      %c0_26 = arith.constant 0 : index
      %28 = vector.load %arg8[%c0_24, %c0_25, %c0_26] : memref<1x8x128xf32, #tpu.memory_space<vmem>>, vector<1x8x128xf32>
      %29 = vector.shape_cast %28 : vector<1x8x128xf32> to vector<8x128xf32>
      %30 = vector.shape_cast %27 : vector<8x128xf32> to vector<1x8x128xf32>
      tpu.vector_store %arg8[%c0_24, %c0_25, %c0_26], %30 {strides = array<i32>} : memref<1x8x128xf32, #tpu.memory_space<vmem>>, vector<1x8x128xf32>,
    } else {
    }
    return
  }
  func.func @transform_0(%arg0: i32, %arg1: i32, %arg2: i32, %arg3: i32) -> (i32, i32, i32) {
    %c0_i32 = arith.constant 0 : i32
    return %arg0, %arg1, %arg3 : i32, i32, i32
  }
  func.func @transform_1(%arg0: i32, %arg1: i32, %arg2: i32, %arg3: i32) -> (i32, i32, i32) {
    %c0_i32 = arith.constant 0 : i32
    return %arg0, %arg3, %arg2 : i32, i32, i32
  }
  func.func @transform_2(%arg0: i32, %arg1: i32, %arg2: i32, %arg3: i32) -> (i32, i32, i32) {
    %c0_i32 = arith.constant 0 : i32
    %c0_i32_0 = arith.constant 0 : i32
    return %arg0, %c0_i32, %arg2 : i32, i32, i32
  }
  func.func @transform_3(%arg0: i32, %arg1: i32, %arg2: i32, %arg3: i32) -> (i32, i32, i32) {
    %c0_i32 = arith.constant 0 : i32
    return %arg0, %arg1, %arg2 : i32, i32, i32
  }
  func.func @transform_4(%arg0: i32, %arg1: i32, %arg2: i32, %arg3: i32) -> (i32, i32, i32) {
    %c0_i32 = arith.constant 0 : i32
    return %arg0, %arg1, %arg2 : i32, i32, i32
  }
}

module attributes {stable_mosaic.version = 11 : i64} {
  func.func @_gemm_bias_act_kernel(%arg0: i32, %arg1: i32, %arg2: i32, %arg3: i32, %arg4: memref<1x8x128xbf16, #tpu.memory_space<vmem>>, %arg5: memref<1x128x128xbf16, #tpu.memory_space<vmem>>, %arg6: memref<1x1x128xf32, #tpu.memory_space<vmem>>, %arg7: memref<1x8x128xf32, #tpu.memory_space<vmem>>) attributes {dimension_semantics = [#tpu.dimension_semantics<parallel>, #tpu.dimension_semantics<parallel>, #tpu.dimension_semantics<parallel>, #tpu.dimension_semantics<arbitrary>], iteration_bounds = array<i64: 3, 1, 1, 1>, scalar_prefetch = 0 : i64, scratch_operands = 0 : i64, tpu.core_type = #tpu.core_type<tc>, window_params = [{transform_indices = @transform_0, window_bounds = array<i64: 1, 8, 128>}, {transform_indices = @transform_1, window_bounds = array<i64: 1, 128, 128>}, {transform_indices = @transform_2, window_bounds = array<i64: 1, 1, 128>}, {transform_indices = @transform_3, window_bounds = array<i64: 1, 8, 128>}]} {
    %c0_i32 = arith.constant 0 : i32
    %0 = arith.cmpi eq, %arg3, %c0_i32 : i32
    %1 = arith.extui %0 : i1 to i32
    %c0_i32_0 = arith.constant 0 : i32
    %2 = arith.cmpi ne, %1, %c0_i32_0 : i32
    scf.if %2 {
      %cst_14 = arith.constant 0.000000e+00 : f32
      %17 = vector.broadcast %cst_14 : f32 to vector<8x128xf32>
      %c0_15 = arith.constant 0 : index
      %c0_16 = arith.constant 0 : index
      %c0_17 = arith.constant 0 : index
      %18 = vector.load %arg7[%c0_15, %c0_16, %c0_17] : memref<1x8x128xf32, #tpu.memory_space<vmem>>, vector<1x8x128xf32>
      %19 = vector.shape_cast %18 : vector<1x8x128xf32> to vector<8x128xf32>
      %20 = vector.shape_cast %17 : vector<8x128xf32> to vector<1x8x128xf32>
      tpu.vector_store %arg7[%c0_15, %c0_16, %c0_17], %20 {strides = array<i32>} : memref<1x8x128xf32, #tpu.memory_space<vmem>>, vector<1x8x128xf32>,
    } else {
    }
    %c0 = arith.constant 0 : index
    %c0_1 = arith.constant 0 : index
    %c0_2 = arith.constant 0 : index
    %3 = vector.load %arg7[%c0, %c0_1, %c0_2] : memref<1x8x128xf32, #tpu.memory_space<vmem>>, vector<1x8x128xf32>
    %4 = vector.shape_cast %3 : vector<1x8x128xf32> to vector<8x128xf32>
    %c0_3 = arith.constant 0 : index
    %c0_4 = arith.constant 0 : index
    %c0_5 = arith.constant 0 : index
    %5 = vector.load %arg4[%c0_3, %c0_4, %c0_5] : memref<1x8x128xbf16, #tpu.memory_space<vmem>>, vector<1x8x128xbf16>
    %6 = vector.shape_cast %5 : vector<1x8x128xbf16> to vector<8x128xbf16>
    %c0_6 = arith.constant 0 : index
    %c0_7 = arith.constant 0 : index
    %c0_8 = arith.constant 0 : index
    %7 = vector.load %arg5[%c0_6, %c0_7, %c0_8] : memref<1x128x128xbf16, #tpu.memory_space<vmem>>, vector<1x128x128xbf16>
    %8 = vector.shape_cast %7 : vector<1x128x128xbf16> to vector<128x128xbf16>
    %cst = arith.constant dense<0.000000e+00> : vector<8x128xf32>
    %9 = tpu.matmul %6, %8, %cst {dimension_numbers = #tpu.dot_dimension_numbers<[1], [0], [0], [1], [0, 0, 1, 1], [], []>} : vector<8x128xbf16>, vector<128x128xbf16>, vector<8x128xf32> -> vector<8x128xf32>
    %10 = arith.addf %4, %9 : vector<8x128xf32>
    %c0_9 = arith.constant 0 : index
    %c0_10 = arith.constant 0 : index
    %c0_11 = arith.constant 0 : index
    %11 = vector.load %arg7[%c0_9, %c0_10, %c0_11] : memref<1x8x128xf32, #tpu.memory_space<vmem>>, vector<1x8x128xf32>
    %12 = vector.shape_cast %11 : vector<1x8x128xf32> to vector<8x128xf32>
    %13 = vector.shape_cast %10 : vector<8x128xf32> to vector<1x8x128xf32>
    tpu.vector_store %arg7[%c0_9, %c0_10, %c0_11], %13 {strides = array<i32>} : memref<1x8x128xf32, #tpu.memory_space<vmem>>, vector<1x8x128xf32>,
    %c0_i32_12 = arith.constant 0 : i32
    %14 = arith.cmpi eq, %arg3, %c0_i32_12 : i32
    %15 = arith.extui %14 : i1 to i32
    %c0_i32_13 = arith.constant 0 : i32
    %16 = arith.cmpi ne, %15, %c0_i32_13 : i32
    scf.if %16 {
      %c0_14 = arith.constant 0 : index
      %c0_15 = arith.constant 0 : index
      %c0_16 = arith.constant 0 : index
      %17 = vector.load %arg7[%c0_14, %c0_15, %c0_16] : memref<1x8x128xf32, #tpu.memory_space<vmem>>, vector<1x8x128xf32>
      %18 = vector.shape_cast %17 : vector<1x8x128xf32> to vector<8x128xf32>
      %c0_17 = arith.constant 0 : index
      %c0_18 = arith.constant 0 : index
      %c0_19 = arith.constant 0 : index
      %19 = vector.load %arg6[%c0_17, %c0_18, %c0_19] : memref<1x1x128xf32, #tpu.memory_space<vmem>>, vector<1x1x128xf32>
      %20 = vector.shape_cast %19 : vector<1x1x128xf32> to vector<1x128xf32>
      %21 = vector.broadcast %20 : vector<1x128xf32> to vector<8x128xf32>
      %22 = arith.addf %18, %21 : vector<8x128xf32>
      %cst_20 = arith.constant 0.000000e+00 : f32
      %23 = vector.broadcast %cst_20 : f32 to vector<8x128xf32>
      %24 = arith.maximumf %22, %23 : vector<8x128xf32>
      %c0_21 = arith.constant 0 : index
      %c0_22 = arith.constant 0 : index
      %c0_23 = arith.constant 0 : index
      %25 = vector.load %arg7[%c0_21, %c0_22, %c0_23] : memref<1x8x128xf32, #tpu.memory_space<vmem>>, vector<1x8x128xf32>
      %26 = vector.shape_cast %25 : vector<1x8x128xf32> to vector<8x128xf32>
      %27 = vector.shape_cast %24 : vector<8x128xf32> to vector<1x8x128xf32>
      tpu.vector_store %arg7[%c0_21, %c0_22, %c0_23], %27 {strides = array<i32>} : memref<1x8x128xf32, #tpu.memory_space<vmem>>, vector<1x8x128xf32>,
    } else {
    }
    return
  }
  func.func @transform_0(%arg0: i32, %arg1: i32, %arg2: i32, %arg3: i32) -> (i32, i32, i32) {
    %c0_i32 = arith.constant 0 : i32
    return %arg0, %arg1, %arg3 : i32, i32, i32
  }
  func.func @transform_1(%arg0: i32, %arg1: i32, %arg2: i32, %arg3: i32) -> (i32, i32, i32) {
    %c0_i32 = arith.constant 0 : i32
    return %arg0, %arg3, %arg2 : i32, i32, i32
  }
  func.func @transform_2(%arg0: i32, %arg1: i32, %arg2: i32, %arg3: i32) -> (i32, i32, i32) {
    %c0_i32 = arith.constant 0 : i32
    %c0_i32_0 = arith.constant 0 : i32
    return %arg0, %c0_i32, %arg2 : i32, i32, i32
  }
  func.func @transform_3(%arg0: i32, %arg1: i32, %arg2: i32, %arg3: i32) -> (i32, i32, i32) {
    %c0_i32 = arith.constant 0 : i32
    return %arg0, %arg1, %arg2 : i32, i32, i32
  }
}

module attributes {stable_mosaic.version = 11 : i64} {
  func.func @_gemm_bias_act_kernel(%arg0: i32, %arg1: i32, %arg2: i32, %arg3: i32, %arg4: memref<1x8x128xbf16, #tpu.memory_space<vmem>>, %arg5: memref<1x128x128xbf16, #tpu.memory_space<vmem>>, %arg6: memref<1x1x128xf32, #tpu.memory_space<vmem>>, %arg7: memref<1x8x128xf32, #tpu.memory_space<vmem>>) attributes {dimension_semantics = [#tpu.dimension_semantics<parallel>, #tpu.dimension_semantics<parallel>, #tpu.dimension_semantics<parallel>, #tpu.dimension_semantics<arbitrary>], iteration_bounds = array<i64: 3, 1, 1, 3>, scalar_prefetch = 0 : i64, scratch_operands = 0 : i64, tpu.core_type = #tpu.core_type<tc>, window_params = [{transform_indices = @transform_0, window_bounds = array<i64: 1, 8, 128>}, {transform_indices = @transform_1, window_bounds = array<i64: 1, 128, 128>}, {transform_indices = @transform_2, window_bounds = array<i64: 1, 1, 128>}, {transform_indices = @transform_3, window_bounds = array<i64: 1, 8, 128>}]} {
    %c0_i32 = arith.constant 0 : i32
    %0 = arith.cmpi eq, %arg3, %c0_i32 : i32
    %1 = arith.extui %0 : i1 to i32
    %c0_i32_0 = arith.constant 0 : i32
    %2 = arith.cmpi ne, %1, %c0_i32_0 : i32
    scf.if %2 {
      %cst_13 = arith.constant 0.000000e+00 : f32
      %17 = vector.broadcast %cst_13 : f32 to vector<8x128xf32>
      %c0_14 = arith.constant 0 : index
      %c0_15 = arith.constant 0 : index
      %c0_16 = arith.constant 0 : index
      %18 = vector.load %arg7[%c0_14, %c0_15, %c0_16] : memref<1x8x128xf32, #tpu.memory_space<vmem>>, vector<1x8x128xf32>
      %19 = vector.shape_cast %18 : vector<1x8x128xf32> to vector<8x128xf32>
      %20 = vector.shape_cast %17 : vector<8x128xf32> to vector<1x8x128xf32>
      tpu.vector_store %arg7[%c0_14, %c0_15, %c0_16], %20 {strides = array<i32>} : memref<1x8x128xf32, #tpu.memory_space<vmem>>, vector<1x8x128xf32>,
    } else {
    }
    %c0 = arith.constant 0 : index
    %c0_1 = arith.constant 0 : index
    %c0_2 = arith.constant 0 : index
    %3 = vector.load %arg7[%c0, %c0_1, %c0_2] : memref<1x8x128xf32, #tpu.memory_space<vmem>>, vector<1x8x128xf32>
    %4 = vector.shape_cast %3 : vector<1x8x128xf32> to vector<8x128xf32>
    %c0_3 = arith.constant 0 : index
    %c0_4 = arith.constant 0 : index
    %c0_5 = arith.constant 0 : index
    %5 = vector.load %arg4[%c0_3, %c0_4, %c0_5] : memref<1x8x128xbf16, #tpu.memory_space<vmem>>, vector<1x8x128xbf16>
    %6 = vector.shape_cast %5 : vector<1x8x128xbf16> to vector<8x128xbf16>
    %c0_6 = arith.constant 0 : index
    %c0_7 = arith.constant 0 : index
    %c0_8 = arith.constant 0 : index
    %7 = vector.load %arg5[%c0_6, %c0_7, %c0_8] : memref<1x128x128xbf16, #tpu.memory_space<vmem>>, vector<1x128x128xbf16>
    %8 = vector.shape_cast %7 : vector<1x128x128xbf16> to vector<128x128xbf16>
    %cst = arith.constant dense<0.000000e+00> : vector<8x128xf32>
    %9 = tpu.matmul %6, %8, %cst {dimension_numbers = #tpu.dot_dimension_numbers<[1], [0], [0], [1], [0, 0, 1, 1], [], []>} : vector<8x128xbf16>, vector<128x128xbf16>, vector<8x128xf32> -> vector<8x128xf32>
    %10 = arith.addf %4, %9 : vector<8x128xf32>
    %c0_9 = arith.constant 0 : index
    %c0_10 = arith.constant 0 : index
    %c0_11 = arith.constant 0 : index
    %11 = vector.load %arg7[%c0_9, %c0_10, %c0_11] : memref<1x8x128xf32, #tpu.memory_space<vmem>>, vector<1x8x128xf32>
    %12 = vector.shape_cast %11 : vector<1x8x128xf32> to vector<8x128xf32>
    %13 = vector.shape_cast %10 : vector<8x128xf32> to vector<1x8x128xf32>
    tpu.vector_store %arg7[%c0_9, %c0_10, %c0_11], %13 {strides = array<i32>} : memref<1x8x128xf32, #tpu.memory_space<vmem>>, vector<1x8x128xf32>,
    %c2_i32 = arith.constant 2 : i32
    %14 = arith.cmpi eq, %arg3, %c2_i32 : i32
    %15 = arith.extui %14 : i1 to i32
    %c0_i32_12 = arith.constant 0 : i32
    %16 = arith.cmpi ne, %15, %c0_i32_12 : i32
    scf.if %16 {
      %c0_13 = arith.constant 0 : index
      %c0_14 = arith.constant 0 : index
      %c0_15 = arith.constant 0 : index
      %17 = vector.load %arg7[%c0_13, %c0_14, %c0_15] : memref<1x8x128xf32, #tpu.memory_space<vmem>>, vector<1x8x128xf32>
      %18 = vector.shape_cast %17 : vector<1x8x128xf32> to vector<8x128xf32>
      %c0_16 = arith.constant 0 : index
      %c0_17 = arith.constant 0 : index
      %c0_18 = arith.constant 0 : index
      %19 = vector.load %arg6[%c0_16, %c0_17, %c0_18] : memref<1x1x128xf32, #tpu.memory_space<vmem>>, vector<1x1x128xf32>
      %20 = vector.shape_cast %19 : vector<1x1x128xf32> to vector<1x128xf32>
      %21 = vector.broadcast %20 : vector<1x128xf32> to vector<8x128xf32>
      %22 = arith.addf %18, %21 : vector<8x128xf32>
      %cst_19 = arith.constant 0.000000e+00 : f32
      %23 = vector.broadcast %cst_19 : f32 to vector<8x128xf32>
      %24 = arith.maximumf %22, %23 : vector<8x128xf32>
      %c0_20 = arith.constant 0 : index
      %c0_21 = arith.constant 0 : index
      %c0_22 = arith.constant 0 : index
      %25 = vector.load %arg7[%c0_20, %c0_21, %c0_22] : memref<1x8x128xf32, #tpu.memory_space<vmem>>, vector<1x8x128xf32>
      %26 = vector.shape_cast %25 : vector<1x8x128xf32> to vector<8x128xf32>
      %27 = vector.shape_cast %24 : vector<8x128xf32> to vector<1x8x128xf32>
      tpu.vector_store %arg7[%c0_20, %c0_21, %c0_22], %27 {strides = array<i32>} : memref<1x8x128xf32, #tpu.memory_space<vmem>>, vector<1x8x128xf32>,
    } else {
    }
    return
  }
  func.func @transform_0(%arg0: i32, %arg1: i32, %arg2: i32, %arg3: i32) -> (i32, i32, i32) {
    %c0_i32 = arith.constant 0 : i32
    return %arg0, %arg1, %arg3 : i32, i32, i32
  }
  func.func @transform_1(%arg0: i32, %arg1: i32, %arg2: i32, %arg3: i32) -> (i32, i32, i32) {
    %c0_i32 = arith.constant 0 : i32
    return %arg0, %arg3, %arg2 : i32, i32, i32
  }
  func.func @transform_2(%arg0: i32, %arg1: i32, %arg2: i32, %arg3: i32) -> (i32, i32, i32) {
    %c0_i32 = arith.constant 0 : i32
    %c0_i32_0 = arith.constant 0 : i32
    return %arg0, %c0_i32, %arg2 : i32, i32, i32
  }
  func.func @transform_3(%arg0: i32, %arg1: i32, %arg2: i32, %arg3: i32) -> (i32, i32, i32) {
    %c0_i32 = arith.constant 0 : i32
    return %arg0, %arg1, %arg2 : i32, i32, i32
  }
}

module attributes {stable_mosaic.version = 11 : i64} {
  func.func @_gemm_bias_act_kernel(%arg0: i32, %arg1: i32, %arg2: i32, %arg3: i32, %arg4: memref<1x8x128xbf16, #tpu.memory_space<vmem>>, %arg5: memref<1x128x128xbf16, #tpu.memory_space<vmem>>, %arg6: memref<1x1x128xf32, #tpu.memory_space<vmem>>, %arg7: memref<1x8x128xf32, #tpu.memory_space<vmem>>) attributes {dimension_semantics = [#tpu.dimension_semantics<parallel>, #tpu.dimension_semantics<parallel>, #tpu.dimension_semantics<parallel>, #tpu.dimension_semantics<arbitrary>], iteration_bounds = array<i64: 3, 1, 1, 5>, scalar_prefetch = 0 : i64, scratch_operands = 0 : i64, tpu.core_type = #tpu.core_type<tc>, window_params = [{transform_indices = @transform_0, window_bounds = array<i64: 1, 8, 128>}, {transform_indices = @transform_1, window_bounds = array<i64: 1, 128, 128>}, {transform_indices = @transform_2, window_bounds = array<i64: 1, 1, 128>}, {transform_indices = @transform_3, window_bounds = array<i64: 1, 8, 128>}]} {
    %c0_i32 = arith.constant 0 : i32
    %0 = arith.cmpi eq, %arg3, %c0_i32 : i32
    %1 = arith.extui %0 : i1 to i32
    %c0_i32_0 = arith.constant 0 : i32
    %2 = arith.cmpi ne, %1, %c0_i32_0 : i32
    scf.if %2 {
      %cst_13 = arith.constant 0.000000e+00 : f32
      %17 = vector.broadcast %cst_13 : f32 to vector<8x128xf32>
      %c0_14 = arith.constant 0 : index
      %c0_15 = arith.constant 0 : index
      %c0_16 = arith.constant 0 : index
      %18 = vector.load %arg7[%c0_14, %c0_15, %c0_16] : memref<1x8x128xf32, #tpu.memory_space<vmem>>, vector<1x8x128xf32>
      %19 = vector.shape_cast %18 : vector<1x8x128xf32> to vector<8x128xf32>
      %20 = vector.shape_cast %17 : vector<8x128xf32> to vector<1x8x128xf32>
      tpu.vector_store %arg7[%c0_14, %c0_15, %c0_16], %20 {strides = array<i32>} : memref<1x8x128xf32, #tpu.memory_space<vmem>>, vector<1x8x128xf32>,
    } else {
    }
    %c0 = arith.constant 0 : index
    %c0_1 = arith.constant 0 : index
    %c0_2 = arith.constant 0 : index
    %3 = vector.load %arg7[%c0, %c0_1, %c0_2] : memref<1x8x128xf32, #tpu.memory_space<vmem>>, vector<1x8x128xf32>
    %4 = vector.shape_cast %3 : vector<1x8x128xf32> to vector<8x128xf32>
    %c0_3 = arith.constant 0 : index
    %c0_4 = arith.constant 0 : index
    %c0_5 = arith.constant 0 : index
    %5 = vector.load %arg4[%c0_3, %c0_4, %c0_5] : memref<1x8x128xbf16, #tpu.memory_space<vmem>>, vector<1x8x128xbf16>
    %6 = vector.shape_cast %5 : vector<1x8x128xbf16> to vector<8x128xbf16>
    %c0_6 = arith.constant 0 : index
    %c0_7 = arith.constant 0 : index
    %c0_8 = arith.constant 0 : index
    %7 = vector.load %arg5[%c0_6, %c0_7, %c0_8] : memref<1x128x128xbf16, #tpu.memory_space<vmem>>, vector<1x128x128xbf16>
    %8 = vector.shape_cast %7 : vector<1x128x128xbf16> to vector<128x128xbf16>
    %cst = arith.constant dense<0.000000e+00> : vector<8x128xf32>
    %9 = tpu.matmul %6, %8, %cst {dimension_numbers = #tpu.dot_dimension_numbers<[1], [0], [0], [1], [0, 0, 1, 1], [], []>} : vector<8x128xbf16>, vector<128x128xbf16>, vector<8x128xf32> -> vector<8x128xf32>
    %10 = arith.addf %4, %9 : vector<8x128xf32>
    %c0_9 = arith.constant 0 : index
    %c0_10 = arith.constant 0 : index
    %c0_11 = arith.constant 0 : index
    %11 = vector.load %arg7[%c0_9, %c0_10, %c0_11] : memref<1x8x128xf32, #tpu.memory_space<vmem>>, vector<1x8x128xf32>
    %12 = vector.shape_cast %11 : vector<1x8x128xf32> to vector<8x128xf32>
    %13 = vector.shape_cast %10 : vector<8x128xf32> to vector<1x8x128xf32>
    tpu.vector_store %arg7[%c0_9, %c0_10, %c0_11], %13 {strides = array<i32>} : memref<1x8x128xf32, #tpu.memory_space<vmem>>, vector<1x8x128xf32>,
    %c4_i32 = arith.constant 4 : i32
    %14 = arith.cmpi eq, %arg3, %c4_i32 : i32
    %15 = arith.extui %14 : i1 to i32
    %c0_i32_12 = arith.constant 0 : i32
    %16 = arith.cmpi ne, %15, %c0_i32_12 : i32
    scf.if %16 {
      %c0_13 = arith.constant 0 : index
      %c0_14 = arith.constant 0 : index
      %c0_15 = arith.constant 0 : index
      %17 = vector.load %arg7[%c0_13, %c0_14, %c0_15] : memref<1x8x128xf32, #tpu.memory_space<vmem>>, vector<1x8x128xf32>
      %18 = vector.shape_cast %17 : vector<1x8x128xf32> to vector<8x128xf32>
      %c0_16 = arith.constant 0 : index
      %c0_17 = arith.constant 0 : index
      %c0_18 = arith.constant 0 : index
      %19 = vector.load %arg6[%c0_16, %c0_17, %c0_18] : memref<1x1x128xf32, #tpu.memory_space<vmem>>, vector<1x1x128xf32>
      %20 = vector.shape_cast %19 : vector<1x1x128xf32> to vector<1x128xf32>
      %21 = vector.broadcast %20 : vector<1x128xf32> to vector<8x128xf32>
      %22 = arith.addf %18, %21 : vector<8x128xf32>
      %cst_19 = arith.constant 0.000000e+00 : f32
      %23 = vector.broadcast %cst_19 : f32 to vector<8x128xf32>
      %24 = arith.maximumf %22, %23 : vector<8x128xf32>
      %c0_20 = arith.constant 0 : index
      %c0_21 = arith.constant 0 : index
      %c0_22 = arith.constant 0 : index
      %25 = vector.load %arg7[%c0_20, %c0_21, %c0_22] : memref<1x8x128xf32, #tpu.memory_space<vmem>>, vector<1x8x128xf32>
      %26 = vector.shape_cast %25 : vector<1x8x128xf32> to vector<8x128xf32>
      %27 = vector.shape_cast %24 : vector<8x128xf32> to vector<1x8x128xf32>
      tpu.vector_store %arg7[%c0_20, %c0_21, %c0_22], %27 {strides = array<i32>} : memref<1x8x128xf32, #tpu.memory_space<vmem>>, vector<1x8x128xf32>,
    } else {
    }
    return
  }
  func.func @transform_0(%arg0: i32, %arg1: i32, %arg2: i32, %arg3: i32) -> (i32, i32, i32) {
    %c0_i32 = arith.constant 0 : i32
    return %arg0, %arg1, %arg3 : i32, i32, i32
  }
  func.func @transform_1(%arg0: i32, %arg1: i32, %arg2: i32, %arg3: i32) -> (i32, i32, i32) {
    %c0_i32 = arith.constant 0 : i32
    return %arg0, %arg3, %arg2 : i32, i32, i32
  }
  func.func @transform_2(%arg0: i32, %arg1: i32, %arg2: i32, %arg3: i32) -> (i32, i32, i32) {
    %c0_i32 = arith.constant 0 : i32
    %c0_i32_0 = arith.constant 0 : i32
    return %arg0, %c0_i32, %arg2 : i32, i32, i32
  }
  func.func @transform_3(%arg0: i32, %arg1: i32, %arg2: i32, %arg3: i32) -> (i32, i32, i32) {
    %c0_i32 = arith.constant 0 : i32
    return %arg0, %arg1, %arg2 : i32, i32, i32
  }
}

module attributes {stable_mosaic.version = 11 : i64} {
  func.func @_gemm_bias_act_kernel(%arg0: i32, %arg1: i32, %arg2: i32, %arg3: i32, %arg4: memref<1x8x128xbf16, #tpu.memory_space<vmem>>, %arg5: memref<1x128x256xbf16, #tpu.memory_space<vmem>>, %arg6: memref<1x1x256xf32, #tpu.memory_space<vmem>>, %arg7: memref<1x8x256xf32, #tpu.memory_space<vmem>>) attributes {dimension_semantics = [#tpu.dimension_semantics<parallel>, #tpu.dimension_semantics<parallel>, #tpu.dimension_semantics<parallel>, #tpu.dimension_semantics<arbitrary>], iteration_bounds = array<i64: 3, 1, 1, 1>, scalar_prefetch = 0 : i64, scratch_operands = 0 : i64, tpu.core_type = #tpu.core_type<tc>, window_params = [{transform_indices = @transform_0, window_bounds = array<i64: 1, 8, 128>}, {transform_indices = @transform_1, window_bounds = array<i64: 1, 128, 256>}, {transform_indices = @transform_2, window_bounds = array<i64: 1, 1, 256>}, {transform_indices = @transform_3, window_bounds = array<i64: 1, 8, 256>}]} {
    %c0_i32 = arith.constant 0 : i32
    %0 = arith.cmpi eq, %arg3, %c0_i32 : i32
    %1 = arith.extui %0 : i1 to i32
    %c0_i32_0 = arith.constant 0 : i32
    %2 = arith.cmpi ne, %1, %c0_i32_0 : i32
    scf.if %2 {
      %cst_14 = arith.constant 0.000000e+00 : f32
      %17 = vector.broadcast %cst_14 : f32 to vector<8x256xf32>
      %c0_15 = arith.constant 0 : index
      %c0_16 = arith.constant 0 : index
      %c0_17 = arith.constant 0 : index
      %18 = vector.load %arg7[%c0_15, %c0_16, %c0_17] : memref<1x8x256xf32, #tpu.memory_space<vmem>>, vector<1x8x256xf32>
      %19 = vector.shape_cast %18 : vector<1x8x256xf32> to vector<8x256xf32>
      %20 = vector.shape_cast %17 : vector<8x256xf32> to vector<1x8x256xf32>
      tpu.vector_store %arg7[%c0_15, %c0_16, %c0_17], %20 {strides = array<i32>} : memref<1x8x256xf32, #tpu.memory_space<vmem>>, vector<1x8x256xf32>,
    } else {
    }
    %c0 = arith.constant 0 : index
    %c0_1 = arith.constant 0 : index
    %c0_2 = arith.constant 0 : index
    %3 = vector.load %arg7[%c0, %c0_1, %c0_2] : memref<1x8x256xf32, #tpu.memory_space<vmem>>, vector<1x8x256xf32>
    %4 = vector.shape_cast %3 : vector<1x8x256xf32> to vector<8x256xf32>
    %c0_3 = arith.constant 0 : index
    %c0_4 = arith.constant 0 : index
    %c0_5 = arith.constant 0 : index
    %5 = vector.load %arg4[%c0_3, %c0_4, %c0_5] : memref<1x8x128xbf16, #tpu.memory_space<vmem>>, vector<1x8x128xbf16>
    %6 = vector.shape_cast %5 : vector<1x8x128xbf16> to vector<8x128xbf16>
    %c0_6 = arith.constant 0 : index
    %c0_7 = arith.constant 0 : index
    %c0_8 = arith.constant 0 : index
    %7 = vector.load %arg5[%c0_6, %c0_7, %c0_8] : memref<1x128x256xbf16, #tpu.memory_space<vmem>>, vector<1x128x256xbf16>
    %8 = vector.shape_cast %7 : vector<1x128x256xbf16> to vector<128x256xbf16>
    %cst = arith.constant dense<0.000000e+00> : vector<8x256xf32>
    %9 = tpu.matmul %6, %8, %cst {dimension_numbers = #tpu.dot_dimension_numbers<[1], [0], [0], [1], [0, 0, 1, 1], [], []>} : vector<8x128xbf16>, vector<128x256xbf16>, vector<8x256xf32> -> vector<8x256xf32>
    %10 = arith.addf %4, %9 : vector<8x256xf32>
    %c0_9 = arith.constant 0 : index
    %c0_10 = arith.constant 0 : index
    %c0_11 = arith.constant 0 : index
    %11 = vector.load %arg7[%c0_9, %c0_10, %c0_11] : memref<1x8x256xf32, #tpu.memory_space<vmem>>, vector<1x8x256xf32>
    %12 = vector.shape_cast %11 : vector<1x8x256xf32> to vector<8x256xf32>
    %13 = vector.shape_cast %10 : vector<8x256xf32> to vector<1x8x256xf32>
    tpu.vector_store %arg7[%c0_9, %c0_10, %c0_11], %13 {strides = array<i32>} : memref<1x8x256xf32, #tpu.memory_space<vmem>>, vector<1x8x256xf32>,
    %c0_i32_12 = arith.constant 0 : i32
    %14 = arith.cmpi eq, %arg3, %c0_i32_12 : i32
    %15 = arith.extui %14 : i1 to i32
    %c0_i32_13 = arith.constant 0 : i32
    %16 = arith.cmpi ne, %15, %c0_i32_13 : i32
    scf.if %16 {
      %c0_14 = arith.constant 0 : index
      %c0_15 = arith.constant 0 : index
      %c0_16 = arith.constant 0 : index
      %17 = vector.load %arg7[%c0_14, %c0_15, %c0_16] : memref<1x8x256xf32, #tpu.memory_space<vmem>>, vector<1x8x256xf32>
      %18 = vector.shape_cast %17 : vector<1x8x256xf32> to vector<8x256xf32>
      %c0_17 = arith.constant 0 : index
      %c0_18 = arith.constant 0 : index
      %c0_19 = arith.constant 0 : index
      %19 = vector.load %arg6[%c0_17, %c0_18, %c0_19] : memref<1x1x256xf32, #tpu.memory_space<vmem>>, vector<1x1x256xf32>
      %20 = vector.shape_cast %19 : vector<1x1x256xf32> to vector<1x256xf32>
      %21 = vector.broadcast %20 : vector<1x256xf32> to vector<8x256xf32>
      %22 = arith.addf %18, %21 : vector<8x256xf32>
      %c0_20 = arith.constant 0 : index
      %c0_21 = arith.constant 0 : index
      %c0_22 = arith.constant 0 : index
      %23 = vector.load %arg7[%c0_20, %c0_21, %c0_22] : memref<1x8x256xf32, #tpu.memory_space<vmem>>, vector<1x8x256xf32>
      %24 = vector.shape_cast %23 : vector<1x8x256xf32> to vector<8x256xf32>
      %25 = vector.shape_cast %22 : vector<8x256xf32> to vector<1x8x256xf32>
      tpu.vector_store %arg7[%c0_20, %c0_21, %c0_22], %25 {strides = array<i32>} : memref<1x8x256xf32, #tpu.memory_space<vmem>>, vector<1x8x256xf32>,
    } else {
    }
    return
  }
  func.func @transform_0(%arg0: i32, %arg1: i32, %arg2: i32, %arg3: i32) -> (i32, i32, i32) {
    %c0_i32 = arith.constant 0 : i32
    return %arg0, %arg1, %arg3 : i32, i32, i32
  }
  func.func @transform_1(%arg0: i32, %arg1: i32, %arg2: i32, %arg3: i32) -> (i32, i32, i32) {
    %c0_i32 = arith.constant 0 : i32
    return %arg0, %arg3, %arg2 : i32, i32, i32
  }
  func.func @transform_2(%arg0: i32, %arg1: i32, %arg2: i32, %arg3: i32) -> (i32, i32, i32) {
    %c0_i32 = arith.constant 0 : i32
    %c0_i32_0 = arith.constant 0 : i32
    return %arg0, %c0_i32, %arg2 : i32, i32, i32
  }
  func.func @transform_3(%arg0: i32, %arg1: i32, %arg2: i32, %arg3: i32) -> (i32, i32, i32) {
    %c0_i32 = arith.constant 0 : i32
    return %arg0, %arg1, %arg2 : i32, i32, i32
  }
}

module attributes {stable_mosaic.version = 11 : i64} {
  func.func @_gemm_bias_act_kernel(%arg0: i32, %arg1: i32, %arg2: i32, %arg3: i32, %arg4: memref<1x8x128xbf16, #tpu.memory_space<vmem>>, %arg5: memref<1x128x256xbf16, #tpu.memory_space<vmem>>, %arg6: memref<1x1x256xf32, #tpu.memory_space<vmem>>, %arg7: memref<1x8x256xf32, #tpu.memory_space<vmem>>, %arg8: memref<1x8x256xf32, #tpu.memory_space<vmem>>) attributes {dimension_semantics = [#tpu.dimension_semantics<parallel>, #tpu.dimension_semantics<parallel>, #tpu.dimension_semantics<parallel>, #tpu.dimension_semantics<arbitrary>], iteration_bounds = array<i64: 3, 1, 1, 1>, scalar_prefetch = 0 : i64, scratch_operands = 0 : i64, tpu.core_type = #tpu.core_type<tc>, window_params = [{transform_indices = @transform_0, window_bounds = array<i64: 1, 8, 128>}, {transform_indices = @transform_1, window_bounds = array<i64: 1, 128, 256>}, {transform_indices = @transform_2, window_bounds = array<i64: 1, 1, 256>}, {transform_indices = @transform_3, window_bounds = array<i64: 1, 8, 256>}, {transform_indices = @transform_4, window_bounds = array<i64: 1, 8, 256>}]} {
    %c0_i32 = arith.constant 0 : i32
    %0 = arith.cmpi eq, %arg3, %c0_i32 : i32
    %1 = arith.extui %0 : i1 to i32
    %c0_i32_0 = arith.constant 0 : i32
    %2 = arith.cmpi ne, %1, %c0_i32_0 : i32
    scf.if %2 {
      %cst_14 = arith.constant 0.000000e+00 : f32
      %17 = vector.broadcast %cst_14 : f32 to vector<8x256xf32>
      %c0_15 = arith.constant 0 : index
      %c0_16 = arith.constant 0 : index
      %c0_17 = arith.constant 0 : index
      %18 = vector.load %arg8[%c0_15, %c0_16, %c0_17] : memref<1x8x256xf32, #tpu.memory_space<vmem>>, vector<1x8x256xf32>
      %19 = vector.shape_cast %18 : vector<1x8x256xf32> to vector<8x256xf32>
      %20 = vector.shape_cast %17 : vector<8x256xf32> to vector<1x8x256xf32>
      tpu.vector_store %arg8[%c0_15, %c0_16, %c0_17], %20 {strides = array<i32>} : memref<1x8x256xf32, #tpu.memory_space<vmem>>, vector<1x8x256xf32>,
    } else {
    }
    %c0 = arith.constant 0 : index
    %c0_1 = arith.constant 0 : index
    %c0_2 = arith.constant 0 : index
    %3 = vector.load %arg8[%c0, %c0_1, %c0_2] : memref<1x8x256xf32, #tpu.memory_space<vmem>>, vector<1x8x256xf32>
    %4 = vector.shape_cast %3 : vector<1x8x256xf32> to vector<8x256xf32>
    %c0_3 = arith.constant 0 : index
    %c0_4 = arith.constant 0 : index
    %c0_5 = arith.constant 0 : index
    %5 = vector.load %arg4[%c0_3, %c0_4, %c0_5] : memref<1x8x128xbf16, #tpu.memory_space<vmem>>, vector<1x8x128xbf16>
    %6 = vector.shape_cast %5 : vector<1x8x128xbf16> to vector<8x128xbf16>
    %c0_6 = arith.constant 0 : index
    %c0_7 = arith.constant 0 : index
    %c0_8 = arith.constant 0 : index
    %7 = vector.load %arg5[%c0_6, %c0_7, %c0_8] : memref<1x128x256xbf16, #tpu.memory_space<vmem>>, vector<1x128x256xbf16>
    %8 = vector.shape_cast %7 : vector<1x128x256xbf16> to vector<128x256xbf16>
    %cst = arith.constant dense<0.000000e+00> : vector<8x256xf32>
    %9 = tpu.matmul %6, %8, %cst {dimension_numbers = #tpu.dot_dimension_numbers<[1], [0], [0], [1], [0, 0, 1, 1], [], []>} : vector<8x128xbf16>, vector<128x256xbf16>, vector<8x256xf32> -> vector<8x256xf32>
    %10 = arith.addf %4, %9 : vector<8x256xf32>
    %c0_9 = arith.constant 0 : index
    %c0_10 = arith.constant 0 : index
    %c0_11 = arith.constant 0 : index
    %11 = vector.load %arg8[%c0_9, %c0_10, %c0_11] : memref<1x8x256xf32, #tpu.memory_space<vmem>>, vector<1x8x256xf32>
    %12 = vector.shape_cast %11 : vector<1x8x256xf32> to vector<8x256xf32>
    %13 = vector.shape_cast %10 : vector<8x256xf32> to vector<1x8x256xf32>
    tpu.vector_store %arg8[%c0_9, %c0_10, %c0_11], %13 {strides = array<i32>} : memref<1x8x256xf32, #tpu.memory_space<vmem>>, vector<1x8x256xf32>,
    %c0_i32_12 = arith.constant 0 : i32
    %14 = arith.cmpi eq, %arg3, %c0_i32_12 : i32
    %15 = arith.extui %14 : i1 to i32
    %c0_i32_13 = arith.constant 0 : i32
    %16 = arith.cmpi ne, %15, %c0_i32_13 : i32
    scf.if %16 {
      %c0_14 = arith.constant 0 : index
      %c0_15 = arith.constant 0 : index
      %c0_16 = arith.constant 0 : index
      %17 = vector.load %arg8[%c0_14, %c0_15, %c0_16] : memref<1x8x256xf32, #tpu.memory_space<vmem>>, vector<1x8x256xf32>
      %18 = vector.shape_cast %17 : vector<1x8x256xf32> to vector<8x256xf32>
      %c0_17 = arith.constant 0 : index
      %c0_18 = arith.constant 0 : index
      %c0_19 = arith.constant 0 : index
      %19 = vector.load %arg6[%c0_17, %c0_18, %c0_19] : memref<1x1x256xf32, #tpu.memory_space<vmem>>, vector<1x1x256xf32>
      %20 = vector.shape_cast %19 : vector<1x1x256xf32> to vector<1x256xf32>
      %21 = vector.broadcast %20 : vector<1x256xf32> to vector<8x256xf32>
      %22 = arith.addf %18, %21 : vector<8x256xf32>
      %c0_20 = arith.constant 0 : index
      %c0_21 = arith.constant 0 : index
      %c0_22 = arith.constant 0 : index
      %23 = vector.load %arg7[%c0_20, %c0_21, %c0_22] : memref<1x8x256xf32, #tpu.memory_space<vmem>>, vector<1x8x256xf32>
      %24 = vector.shape_cast %23 : vector<1x8x256xf32> to vector<8x256xf32>
      %25 = arith.addf %22, %24 : vector<8x256xf32>
      %cst_23 = arith.constant 0.000000e+00 : f32
      %26 = vector.broadcast %cst_23 : f32 to vector<8x256xf32>
      %27 = arith.maximumf %25, %26 : vector<8x256xf32>
      %c0_24 = arith.constant 0 : index
      %c0_25 = arith.constant 0 : index
      %c0_26 = arith.constant 0 : index
      %28 = vector.load %arg8[%c0_24, %c0_25, %c0_26] : memref<1x8x256xf32, #tpu.memory_space<vmem>>, vector<1x8x256xf32>
      %29 = vector.shape_cast %28 : vector<1x8x256xf32> to vector<8x256xf32>
      %30 = vector.shape_cast %27 : vector<8x256xf32> to vector<1x8x256xf32>
      tpu.vector_store %arg8[%c0_24, %c0_25, %c0_26], %30 {strides = array<i32>} : memref<1x8x256xf32, #tpu.memory_space<vmem>>, vector<1x8x256xf32>,
    } else {
    }
    return
  }
  func.func @transform_0(%arg0: i32, %arg1: i32, %arg2: i32, %arg3: i32) -> (i32, i32, i32) {
    %c0_i32 = arith.constant 0 : i32
    return %arg0, %arg1, %arg3 : i32, i32, i32
  }
  func.func @transform_1(%arg0: i32, %arg1: i32, %arg2: i32, %arg3: i32) -> (i32, i32, i32) {
    %c0_i32 = arith.constant 0 : i32
    return %arg0, %arg3, %arg2 : i32, i32, i32
  }
  func.func @transform_2(%arg0: i32, %arg1: i32, %arg2: i32, %arg3: i32) -> (i32, i32, i32) {
    %c0_i32 = arith.constant 0 : i32
    %c0_i32_0 = arith.constant 0 : i32
    return %arg0, %c0_i32, %arg2 : i32, i32, i32
  }
  func.func @transform_3(%arg0: i32, %arg1: i32, %arg2: i32, %arg3: i32) -> (i32, i32, i32) {
    %c0_i32 = arith.constant 0 : i32
    return %arg0, %arg1, %arg2 : i32, i32, i32
  }
  func.func @transform_4(%arg0: i32, %arg1: i32, %arg2: i32, %arg3: i32) -> (i32, i32, i32) {
    %c0_i32 = arith.constant 0 : i32
    return %arg0, %arg1, %arg2 : i32, i32, i32
  }
}

module attributes {stable_mosaic.version = 11 : i64} {
  func.func @_avgpool_kernel(%arg0: i32, %arg1: memref<6x8x256xf32, #tpu.memory_space<vmem>>, %arg2: memref<6x256xf32, #tpu.memory_space<vmem>>) attributes {dimension_semantics = [#tpu.dimension_semantics<arbitrary>], iteration_bounds = array<i64: 1>, scalar_prefetch = 0 : i64, scratch_operands = 0 : i64, tpu.core_type = #tpu.core_type<tc>, window_params = [{transform_indices = @transform_0, window_bounds = array<i64: 6, 8, 256>}, {pipeline_mode = #tpu.pipeline_mode<synchronous>, transform_indices = @transform_1, window_bounds = array<i64: 6, 256>}]} {
    %c0_i32 = arith.constant 0 : i32
    %0 = arith.cmpi eq, %arg0, %c0_i32 : i32
    %1 = arith.extui %0 : i1 to i32
    %c0_i32_0 = arith.constant 0 : i32
    %2 = arith.cmpi ne, %1, %c0_i32_0 : i32
    scf.if %2 {
      %cst_9 = arith.constant 0.000000e+00 : f32
      %11 = vector.broadcast %cst_9 : f32 to vector<6x256xf32>
      %c0_10 = arith.constant 0 : index
      %c0_11 = arith.constant 0 : index
      %12 = vector.load %arg2[%c0_10, %c0_11] : memref<6x256xf32, #tpu.memory_space<vmem>>, vector<6x256xf32>
      tpu.vector_store %arg2[%c0_10, %c0_11], %11 {strides = array<i32>} : memref<6x256xf32, #tpu.memory_space<vmem>>, vector<6x256xf32>,
    } else {
    }
    %c0 = arith.constant 0 : index
    %c0_1 = arith.constant 0 : index
    %3 = vector.load %arg2[%c0, %c0_1] : memref<6x256xf32, #tpu.memory_space<vmem>>, vector<6x256xf32>
    %c0_2 = arith.constant 0 : index
    %c0_3 = arith.constant 0 : index
    %c0_4 = arith.constant 0 : index
    %4 = vector.load %arg1[%c0_2, %c0_3, %c0_4] : memref<6x8x256xf32, #tpu.memory_space<vmem>>, vector<6x8x256xf32>
    %cst = arith.constant dense<0.000000e+00> : vector<6x256xf32>
    %5 = vector.multi_reduction <add>, %4, %cst [1] : vector<6x8x256xf32> to vector<6x256xf32>
    %6 = arith.addf %3, %5 : vector<6x256xf32>
    %c0_5 = arith.constant 0 : index
    %c0_6 = arith.constant 0 : index
    %7 = vector.load %arg2[%c0_5, %c0_6] : memref<6x256xf32, #tpu.memory_space<vmem>>, vector<6x256xf32>
    tpu.vector_store %arg2[%c0_5, %c0_6], %6 {strides = array<i32>} : memref<6x256xf32, #tpu.memory_space<vmem>>, vector<6x256xf32>,
    %c0_i32_7 = arith.constant 0 : i32
    %8 = arith.cmpi eq, %arg0, %c0_i32_7 : i32
    %9 = arith.extui %8 : i1 to i32
    %c0_i32_8 = arith.constant 0 : i32
    %10 = arith.cmpi ne, %9, %c0_i32_8 : i32
    scf.if %10 {
      %c0_9 = arith.constant 0 : index
      %c0_10 = arith.constant 0 : index
      %11 = vector.load %arg2[%c0_9, %c0_10] : memref<6x256xf32, #tpu.memory_space<vmem>>, vector<6x256xf32>
      %cst_11 = arith.constant 1.000000e+00 : f32
      %12 = vector.broadcast %cst_11 : f32 to vector<6x256xf32>
      %13 = arith.mulf %11, %12 : vector<6x256xf32>
      %c0_12 = arith.constant 0 : index
      %c0_13 = arith.constant 0 : index
      %14 = vector.load %arg2[%c0_12, %c0_13] : memref<6x256xf32, #tpu.memory_space<vmem>>, vector<6x256xf32>
      tpu.vector_store %arg2[%c0_12, %c0_13], %13 {strides = array<i32>} : memref<6x256xf32, #tpu.memory_space<vmem>>, vector<6x256xf32>,
    } else {
    }
    return
  }
  func.func @transform_0(%arg0: i32) -> (i32, i32, i32) {
    %c0_i32 = arith.constant 0 : i32
    %c0_i32_0 = arith.constant 0 : i32
    %c0_i32_1 = arith.constant 0 : i32
    return %c0_i32, %arg0, %c0_i32_0 : i32, i32, i32
  }
  func.func @transform_1(%arg0: i32) -> (i32, i32) {
    %c0_i32 = arith.constant 0 : i32
    %c0_i32_0 = arith.constant 0 : i32
    %c0_i32_1 = arith.constant 0 : i32
    return %c0_i32, %c0_i32_0 : i32, i32
  }
}

module attributes {stable_mosaic.version = 11 : i64} {
  func.func @_gemm_bias_act_kernel(%arg0: i32, %arg1: i32, %arg2: i32, %arg3: i32, %arg4: memref<1x8x256xbf16, #tpu.memory_space<vmem>>, %arg5: memref<1x256x128xbf16, #tpu.memory_space<vmem>>, %arg6: memref<1x1x128xf32, #tpu.memory_space<vmem>>, %arg7: memref<1x8x128xf32, #tpu.memory_space<vmem>>) attributes {dimension_semantics = [#tpu.dimension_semantics<parallel>, #tpu.dimension_semantics<parallel>, #tpu.dimension_semantics<parallel>, #tpu.dimension_semantics<arbitrary>], iteration_bounds = array<i64: 1, 1, 1, 3>, scalar_prefetch = 0 : i64, scratch_operands = 0 : i64, tpu.core_type = #tpu.core_type<tc>, window_params = [{transform_indices = @transform_0, window_bounds = array<i64: 1, 8, 256>}, {transform_indices = @transform_1, window_bounds = array<i64: 1, 256, 128>}, {transform_indices = @transform_2, window_bounds = array<i64: 1, 1, 128>}, {transform_indices = @transform_3, window_bounds = array<i64: 1, 8, 128>}]} {
    %c0_i32 = arith.constant 0 : i32
    %0 = arith.cmpi eq, %arg3, %c0_i32 : i32
    %1 = arith.extui %0 : i1 to i32
    %c0_i32_0 = arith.constant 0 : i32
    %2 = arith.cmpi ne, %1, %c0_i32_0 : i32
    scf.if %2 {
      %cst_13 = arith.constant 0.000000e+00 : f32
      %17 = vector.broadcast %cst_13 : f32 to vector<8x128xf32>
      %c0_14 = arith.constant 0 : index
      %c0_15 = arith.constant 0 : index
      %c0_16 = arith.constant 0 : index
      %18 = vector.load %arg7[%c0_14, %c0_15, %c0_16] : memref<1x8x128xf32, #tpu.memory_space<vmem>>, vector<1x8x128xf32>
      %19 = vector.shape_cast %18 : vector<1x8x128xf32> to vector<8x128xf32>
      %20 = vector.shape_cast %17 : vector<8x128xf32> to vector<1x8x128xf32>
      tpu.vector_store %arg7[%c0_14, %c0_15, %c0_16], %20 {strides = array<i32>} : memref<1x8x128xf32, #tpu.memory_space<vmem>>, vector<1x8x128xf32>,
    } else {
    }
    %c0 = arith.constant 0 : index
    %c0_1 = arith.constant 0 : index
    %c0_2 = arith.constant 0 : index
    %3 = vector.load %arg7[%c0, %c0_1, %c0_2] : memref<1x8x128xf32, #tpu.memory_space<vmem>>, vector<1x8x128xf32>
    %4 = vector.shape_cast %3 : vector<1x8x128xf32> to vector<8x128xf32>
    %c0_3 = arith.constant 0 : index
    %c0_4 = arith.constant 0 : index
    %c0_5 = arith.constant 0 : index
    %5 = vector.load %arg4[%c0_3, %c0_4, %c0_5] : memref<1x8x256xbf16, #tpu.memory_space<vmem>>, vector<1x8x256xbf16>
    %6 = vector.shape_cast %5 : vector<1x8x256xbf16> to vector<8x256xbf16>
    %c0_6 = arith.constant 0 : index
    %c0_7 = arith.constant 0 : index
    %c0_8 = arith.constant 0 : index
    %7 = vector.load %arg5[%c0_6, %c0_7, %c0_8] : memref<1x256x128xbf16, #tpu.memory_space<vmem>>, vector<1x256x128xbf16>
    %8 = vector.shape_cast %7 : vector<1x256x128xbf16> to vector<256x128xbf16>
    %cst = arith.constant dense<0.000000e+00> : vector<8x128xf32>
    %9 = tpu.matmul %6, %8, %cst {dimension_numbers = #tpu.dot_dimension_numbers<[1], [0], [0], [1], [0, 0, 1, 1], [], []>} : vector<8x256xbf16>, vector<256x128xbf16>, vector<8x128xf32> -> vector<8x128xf32>
    %10 = arith.addf %4, %9 : vector<8x128xf32>
    %c0_9 = arith.constant 0 : index
    %c0_10 = arith.constant 0 : index
    %c0_11 = arith.constant 0 : index
    %11 = vector.load %arg7[%c0_9, %c0_10, %c0_11] : memref<1x8x128xf32, #tpu.memory_space<vmem>>, vector<1x8x128xf32>
    %12 = vector.shape_cast %11 : vector<1x8x128xf32> to vector<8x128xf32>
    %13 = vector.shape_cast %10 : vector<8x128xf32> to vector<1x8x128xf32>
    tpu.vector_store %arg7[%c0_9, %c0_10, %c0_11], %13 {strides = array<i32>} : memref<1x8x128xf32, #tpu.memory_space<vmem>>, vector<1x8x128xf32>,
    %c2_i32 = arith.constant 2 : i32
    %14 = arith.cmpi eq, %arg3, %c2_i32 : i32
    %15 = arith.extui %14 : i1 to i32
    %c0_i32_12 = arith.constant 0 : i32
    %16 = arith.cmpi ne, %15, %c0_i32_12 : i32
    scf.if %16 {
      %c0_13 = arith.constant 0 : index
      %c0_14 = arith.constant 0 : index
      %c0_15 = arith.constant 0 : index
      %17 = vector.load %arg7[%c0_13, %c0_14, %c0_15] : memref<1x8x128xf32, #tpu.memory_space<vmem>>, vector<1x8x128xf32>
      %18 = vector.shape_cast %17 : vector<1x8x128xf32> to vector<8x128xf32>
      %c0_16 = arith.constant 0 : index
      %c0_17 = arith.constant 0 : index
      %c0_18 = arith.constant 0 : index
      %19 = vector.load %arg6[%c0_16, %c0_17, %c0_18] : memref<1x1x128xf32, #tpu.memory_space<vmem>>, vector<1x1x128xf32>
      %20 = vector.shape_cast %19 : vector<1x1x128xf32> to vector<1x128xf32>
      %21 = vector.broadcast %20 : vector<1x128xf32> to vector<8x128xf32>
      %22 = arith.addf %18, %21 : vector<8x128xf32>
      %c0_19 = arith.constant 0 : index
      %c0_20 = arith.constant 0 : index
      %c0_21 = arith.constant 0 : index
      %23 = vector.load %arg7[%c0_19, %c0_20, %c0_21] : memref<1x8x128xf32, #tpu.memory_space<vmem>>, vector<1x8x128xf32>
      %24 = vector.shape_cast %23 : vector<1x8x128xf32> to vector<8x128xf32>
      %25 = vector.shape_cast %22 : vector<8x128xf32> to vector<1x8x128xf32>
      tpu.vector_store %arg7[%c0_19, %c0_20, %c0_21], %25 {strides = array<i32>} : memref<1x8x128xf32, #tpu.memory_space<vmem>>, vector<1x8x128xf32>,
    } else {
    }
    return
  }
  func.func @transform_0(%arg0: i32, %arg1: i32, %arg2: i32, %arg3: i32) -> (i32, i32, i32) {
    %c0_i32 = arith.constant 0 : i32
    return %arg0, %arg1, %arg3 : i32, i32, i32
  }
  func.func @transform_1(%arg0: i32, %arg1: i32, %arg2: i32, %arg3: i32) -> (i32, i32, i32) {
    %c0_i32 = arith.constant 0 : i32
    return %arg0, %arg3, %arg2 : i32, i32, i32
  }
  func.func @transform_2(%arg0: i32, %arg1: i32, %arg2: i32, %arg3: i32) -> (i32, i32, i32) {
    %c0_i32 = arith.constant 0 : i32
    %c0_i32_0 = arith.constant 0 : i32
    return %arg0, %c0_i32, %arg2 : i32, i32, i32
  }
  func.func @transform_3(%arg0: i32, %arg1: i32, %arg2: i32, %arg3: i32) -> (i32, i32, i32) {
    %c0_i32 = arith.constant 0 : i32
    return %arg0, %arg1, %arg2 : i32, i32, i32
  }
}

</mosaic_0001>

<bundles_post_ra>
// kernel: _lambda_.56
= control target key start
LH: loop header
LB: loop body
LE: loop exit
PB: predicated region body
PF: predicated region fallthrough
CT: control target
= control target key end

     0   :  { %s1167_s12 = smov 0   ;;  %s1169_s13 = smov 0   ;;  %s1287_s0 = inlined_call_operand.vmem [shape: bf16[3,128,256], index: 0, kind: input, shape index: {}]   ;;  %s1288_s1 = inlined_call_operand.vmem [shape: bf16[3,256,128], index: 1, kind: input, shape index: {}]   ;;  %s1289_s2 = inlined_call_operand.vmem [shape: f32[3,1,128], index: 2, kind: input, shape index: {}]   ;;  %s1290_s3 = inlined_call_operand.vmem [shape: f32[3,128,128], index: 3, kind: output, shape index: {}]  }
   0x1   :  { %s1171_s14 = smov 0  }
   0x2 LB: > { %s39_s15 = sadd.s32 1, %s1141_s13  ;;  %p933_p0 = scmp.ge.s32.totalorder %s1145_s14, 1  ;;  %s1145_s14 = sphi %s1171_s14, %s13_s14   ;;  %s1141_s13 = sphi %s1169_s13, %s1292_s13   ;;  %s1137_s12 = sphi %s1167_s12, %s1291_s12  }
   0x3   : > { %p41_p1 = scmp.ge.s32.totalorder %s39_s15, 3  ;;  %p217_p2 = scmp.lt.s32.totalorder %s1145_s14, 4 }
   0x5   : > { %s1294_s15 = smov (%p41_p1, %s39_s15), 0  ;;  %p218_p3 = pnand %p933_p0, %p217_p2 }
   0x6   : > { %p277_p4 = scmp.lt.s32.totalorder (!%p218_p3), %s1137_s12, 2 }
   0x7   : > { %221 = sbr.rel (%p218_p3) target bundleno = 278 (0x116), region = 32 }
   0xc   : > { %s1296_s12 = smov (!%p277_p4, %s1137_s12), 2 }
   0xd   : > { %s1188_s16 = sshll.u32 %s1296_s12, 7  ;;  %s309_s25 = scalar_lea.vmem %s1289_s2, %s1296_s12 }
   0xe   : > { %s1194_s19 = scalar_lea.vmem %s1288_s1, %s1188_s16  ;;  %s1209_s22 = scalar_lea.vmem %s1287_s0, %s1188_s16  ;;  %v1238_v38 = vld [vmem:[%s309_s25] ss:$0 sm:$0xff] }
   0xf   : > { %v1083_v0 = vld [vmem:[%s1194_s19 + $0x78] sm:$0xff]   ;;  %v1085_v2 = vld [vmem:[%s1194_s19 + $0x70] sm:$0xff]   ;;  %v1087_v4 = vld [vmem:[%s1194_s19 + $0x68] sm:$0xff]   ;;  %s1246_s28 = scalar_lea.vmem %s1290_s3, %s1188_s16 }
  0x10   : > { %v1084_v1 = vld [vmem:[%s1194_s19 + $0x38] sm:$0xff]   ;;  %978 = vmatprep.subr.bf16.mxu0 %v1083_v0  ;;  %1042 = vmatprep.subr.bf16.mxu1 %v1083_v0  ;;  %v1086_v3 = vld [vmem:[%s1194_s19 + $0x30] sm:$0xff]   ;;  %v1088_v5 = vld [vmem:[%s1194_s19 + $0x28] sm:$0xff]  }
  0x11   : > { %979 = vmatpush3.bf16.msra.mxu0 %v1084_v1  ;;  %1050 = vmatpush3.bf16.msra.mxu1 %v1084_v1  ;;  %v1089_v6 = vld [vmem:[%s1194_s19 + $0x60] sm:$0xff]   ;;  %v1091_v8 = vld [vmem:[%s1194_s19 + $0x58] sm:$0xff]   ;;  %v1093_v10 = vld [vmem:[%s1194_s19 + $0x50] sm:$0xff]  }
  0x12   : > { %980 = vmatprep.subr.bf16.mxu0 %v1085_v2  ;;  %1043 = vmatprep.subr.bf16.mxu1 %v1085_v2  ;;  %v1090_v7 = vld [vmem:[%s1194_s19 + $0x20] sm:$0xff]   ;;  %v1092_v9 = vld [vmem:[%s1194_s19 + $0x18] sm:$0xff]   ;;  %v1094_v13 = vld [vmem:[%s1194_s19 + $0x10] sm:$0xff]  }
  0x13   : > { %v1101_v11 = vld [vmem:[%s1209_s22 + $0x4] ss:$8 sps:$4 sm:$0xff]   ;;  %v1099_v18 = vld [vmem:[%s1209_s22] ss:$8 sps:$4 sm:$0xff]   ;;  %v1105_v20 = vld [vmem:[%s1209_s22 + $0x14] ss:$8 sps:$4 sm:$0xff]  }
  0x14   : > { %v1104_v12 = vld [vmem:[%s1209_s22 + $0x44] ss:$8 sps:$4 sm:$0xff]   ;;  %616 = vmatprep.mubr.bf16.mxu0 %v1101_v11  ;;  %v1102_v19 = vld [vmem:[%s1209_s22 + $0x40] ss:$8 sps:$4 sm:$0xff]   ;;  %v1107_v21 = vld [vmem:[%s1209_s22 + $0x54] ss:$8 sps:$4 sm:$0xff]  }
  0x15   : > { %981 = vmatpush3.bf16.msra.mxu0 %v1086_v3  ;;  %1051 = vmatpush3.bf16.msra.mxu1 %v1086_v3  ;;  %v1095_v14 = vld [vmem:[%s1194_s19 + $0x48] sm:$0xff]   ;;  %v1097_v16 = vld [vmem:[%s1194_s19 + $0x40] sm:$0xff]   ;;  %v1109_v22 = vld [vmem:[%s1209_s22 + $0x10] ss:$8 sps:$4 sm:$0xff]  }
  0x16   : > { %982 = vmatprep.subr.bf16.mxu0 %v1087_v4  ;;  %1044 = vmatprep.subr.bf16.mxu1 %v1087_v4  ;;  %v1096_v15 = vld [vmem:[%s1194_s19 + $0x8] sm:$0xff]   ;;  %v1098_v17 = vld [vmem:[%s1194_s19] sm:$0xff]   ;;  %v1110_v23 = vld [vmem:[%s1209_s22 + $0x50] ss:$8 sps:$4 sm:$0xff]  }
  0x17   : > { %648 = vmatprep.mubr.bf16.mxu1 %v1104_v12  ;;  %v1111_v24 = vld [vmem:[%s1209_s22 + $0x24] ss:$8 sps:$4 sm:$0xff]   ;;  %v1115_v26 = vld [vmem:[%s1209_s22 + $0x20] ss:$8 sps:$4 sm:$0xff]   ;;  %v1117_v28 = vld [vmem:[%s1209_s22 + $0x34] ss:$8 sps:$4 sm:$0xff]  }
  0x18   : > { %v1113_v25 = vld [vmem:[%s1209_s22 + $0x64] ss:$8 sps:$4 sm:$0xff]   ;;  %v1116_v27 = vld [vmem:[%s1209_s22 + $0x60] ss:$8 sps:$4 sm:$0xff]   ;;  %v1119_v29 = vld [vmem:[%s1209_s22 + $0x74] ss:$8 sps:$4 sm:$0xff]  }
  0x19   : > { %983 = vmatpush3.bf16.msra.mxu0 %v1088_v5  ;;  %1052 = vmatpush3.bf16.msra.mxu1 %v1088_v5  ;;  %v1121_v30 = vld [vmem:[%s1209_s22 + $0x30] ss:$8 sps:$4 sm:$0xff]  }
  0x1a   : > { %984 = vmatprep.subr.bf16.mxu0 %v1089_v6  ;;  %1045 = vmatprep.subr.bf16.mxu1 %v1089_v6  ;;  %v1122_v31 = vld [vmem:[%s1209_s22 + $0x70] ss:$8 sps:$4 sm:$0xff]  }
  0x1d   : > { %985 = vmatpush3.bf16.msra.mxu0 %v1090_v7  ;;  %1053 = vmatpush3.bf16.msra.mxu1 %v1090_v7 }
  0x1e   : > { %986 = vmatprep.subr.bf16.mxu0 %v1091_v8  ;;  %1046 = vmatprep.subr.bf16.mxu1 %v1091_v8 }
  0x21   : > { %987 = vmatpush3.bf16.msra.mxu0 %v1092_v9  ;;  %1054 = vmatpush3.bf16.msra.mxu1 %v1092_v9 }
  0x22   : > { %988 = vmatprep.subr.bf16.mxu0 %v1093_v10  ;;  %1047 = vmatprep.subr.bf16.mxu1 %v1093_v10 }
  0x25   : > { %989 = vmatpush3.bf16.msra.mxu0 %v1094_v13  ;;  %1055 = vmatpush3.bf16.msra.mxu1 %v1094_v13 }
  0x26   : > { %990 = vmatprep.subr.bf16.mxu0 %v1095_v14  ;;  %1048 = vmatprep.subr.bf16.mxu1 %v1095_v14 }
  0x29   : > { %991 = vmatpush3.bf16.msra.mxu0 %v1096_v15  ;;  %1056 = vmatpush3.bf16.msra.mxu1 %v1096_v15 }
  0x2a   : > { %992 = vmatprep.subr.bf16.mxu0 %v1097_v16  ;;  %1049 = vmatprep.subr.bf16.mxu1 %v1097_v16 }
  0x2d   : > { %993 = vmatpush3.bf16.msra.mxu0 %v1098_v17  ;;  %1057 = vmatpush3.bf16.msra.mxu1 %v1098_v17 }
  0x30   : > { %617 = vmatmul.mubr.bf16.vlgmr.msra.gmra.mxu0 %v1099_v18  ;;  %649 = vmatmul.mubr.bf16.vlgmr.msra.gmra.mxu1 %v1102_v19 }
  0x31   : > { %624 = vmatprep.mubr.bf16.mxu0 %v1105_v20  ;;  %656 = vmatprep.mubr.bf16.mxu1 %v1107_v21 }
  0x38   : > { %625 = vmatmul.mubr.bf16.gmra.mxu0 %v1109_v22  ;;  %657 = vmatmul.mubr.bf16.gmra.mxu1 %v1110_v23 }
  0x39   : > { %632 = vmatprep.mubr.bf16.mxu0 %v1111_v24  ;;  %664 = vmatprep.mubr.bf16.mxu1 %v1113_v25 }
  0x40   : > { %633 = vmatmul.mubr.bf16.gmra.mxu0 %v1115_v26  ;;  %665 = vmatmul.mubr.bf16.gmra.mxu1 %v1116_v27 }
  0x41   : > { %640 = vmatprep.mubr.bf16.mxu0 %v1117_v28  ;;  %672 = vmatprep.mubr.bf16.mxu1 %v1119_v29 }
  0x48   : > { %641 = vmatmul.mubr.bf16.gmra.mxu0 %v1121_v30  ;;  %673 = vmatmul.mubr.bf16.gmra.mxu1 %v1122_v31 }
  0xf0   : > { %v994_v32 = vpop.f32.mrf.mxu0  ;;  %v1018_v33 = vpop.f32.mrf.mxu1 }
  0xf2   : > { %v995_v34 = vpop.f32.mrf.mxu0  ;;  %v1019_v35 = vpop.f32.mrf.mxu1 }
  0xf3   : > { %v996_v36 = vadd.f32 %v995_v34, %v994_v32  ;;  %v1020_v37 = vadd.f32 %v1019_v35, %v1018_v33 }
  0xf4   : > { %v997_v39 = vpop.f32.mrf.mxu0  ;;  %v1021_v40 = vpop.f32.mrf.mxu1 }
  0xf5   : > { %v739_v43 = vadd.f32 %v996_v36, %v1238_v38  ;;  %v747_v44 = vadd.f32 %v1020_v37, %v1238_v38 }
  0xf6   : > { %v998_v41 = vpop.f32.mrf.mxu0  ;;  %v1022_v42 = vpop.f32.mrf.mxu1 }
  0xf7   : > { %v999_v45 = vadd.f32 %v998_v41, %v997_v39  ;;  %v1023_v46 = vadd.f32 %v1022_v42, %v1021_v40  ;;  %v755_v49 = vmax.f32 %v739_v43, 0.0  ;;  %v763_v50 = vmax.f32 %v747_v44, 0.0 }
  0xf8   : > { %v1000_v47 = vpop.f32.mrf.mxu0  ;;  %v1024_v48 = vpop.f32.mrf.mxu1 }
  0xf9   : > { %771 = vst [vmem:[%s1246_s28] sm:$0xff] %v755_v49  ;;  %779 = vst [vmem:[%s1246_s28 + $0x40] sm:$0xff] %v763_v50  ;;  %v740_v53 = vadd.f32 %v999_v45, %v1238_v38  ;;  %v748_v54 = vadd.f32 %v1023_v46, %v1238_v38 }
  0xfa   : > { %v1001_v51 = vpop.f32.mrf.mxu0  ;;  %v1025_v52 = vpop.f32.mrf.mxu1 }
  0xfb   : > { %v1002_v55 = vadd.f32 %v1001_v51, %v1000_v47  ;;  %v1026_v56 = vadd.f32 %v1025_v52, %v1024_v48  ;;  %v756_v59 = vmax.f32 %v740_v53, 0.0  ;;  %v764_v60 = vmax.f32 %v748_v54, 0.0 }
  0xfc   : > { %v1003_v57 = vpop.f32.mrf.mxu0  ;;  %v1027_v58 = vpop.f32.mrf.mxu1 }
  0xfd   : > { %772 = vst [vmem:[%s1246_s28 + $0x8] sm:$0xff] %v756_v59  ;;  %780 = vst [vmem:[%s1246_s28 + $0x48] sm:$0xff] %v764_v60  ;;  %v741_v63 = vadd.f32 %v1002_v55, %v1238_v38  ;;  %v749_v0 = vadd.f32 %v1026_v56, %v1238_v38 }
  0xfe   : > { %v1004_v61 = vpop.f32.mrf.mxu0  ;;  %v1028_v62 = vpop.f32.mrf.mxu1 }
  0xff   : > { %v1005_v1 = vadd.f32 %v1004_v61, %v1003_v57  ;;  %v1029_v2 = vadd.f32 %v1028_v62, %v1027_v58  ;;  %v757_v5 = vmax.f32 %v741_v63, 0.0  ;;  %v765_v6 = vmax.f32 %v749_v0, 0.0 }
 0x100   : > { %v1006_v3 = vpop.f32.mrf.mxu0  ;;  %v1030_v4 = vpop.f32.mrf.mxu1 }
 0x101   : > { %773 = vst [vmem:[%s1246_s28 + $0x10] sm:$0xff] %v757_v5  ;;  %781 = vst [vmem:[%s1246_s28 + $0x50] sm:$0xff] %v765_v6  ;;  %v742_v9 = vadd.f32 %v1005_v1, %v1238_v38  ;;  %v750_v10 = vadd.f32 %v1029_v2, %v1238_v38 }
 0x102   : > { %v1007_v7 = vpop.f32.mrf.mxu0  ;;  %v1031_v8 = vpop.f32.mrf.mxu1 }
 0x103   : > { %v1008_v11 = vadd.f32 %v1007_v7, %v1006_v3  ;;  %v1032_v12 = vadd.f32 %v1031_v8, %v1030_v4  ;;  %v758_v15 = vmax.f32 %v742_v9, 0.0  ;;  %v766_v16 = vmax.f32 %v750_v10, 0.0 }
 0x104   : > { %v1009_v13 = vpop.f32.mrf.mxu0  ;;  %v1033_v14 = vpop.f32.mrf.mxu1 }
 0x105   : > { %774 = vst [vmem:[%s1246_s28 + $0x18] sm:$0xff] %v758_v15  ;;  %782 = vst [vmem:[%s1246_s28 + $0x58] sm:$0xff] %v766_v16  ;;  %v743_v19 = vadd.f32 %v1008_v11, %v1238_v38  ;;  %v751_v20 = vadd.f32 %v1032_v12, %v1238_v38 }
 0x106   : > { %v1010_v17 = vpop.f32.mrf.mxu0  ;;  %v1034_v18 = vpop.f32.mrf.mxu1 }
 0x107   : > { %v1011_v21 = vadd.f32 %v1010_v17, %v1009_v13  ;;  %v1035_v22 = vadd.f32 %v1034_v18, %v1033_v14  ;;  %v759_v25 = vmax.f32 %v743_v19, 0.0  ;;  %v767_v26 = vmax.f32 %v751_v20, 0.0 }
 0x108   : > { %v1012_v23 = vpop.f32.mrf.mxu0  ;;  %v1036_v24 = vpop.f32.mrf.mxu1 }
 0x109   : > { %775 = vst [vmem:[%s1246_s28 + $0x20] sm:$0xff] %v759_v25  ;;  %783 = vst [vmem:[%s1246_s28 + $0x60] sm:$0xff] %v767_v26  ;;  %v744_v29 = vadd.f32 %v1011_v21, %v1238_v38  ;;  %v752_v30 = vadd.f32 %v1035_v22, %v1238_v38 }
 0x10a   : > { %v1013_v27 = vpop.f32.mrf.mxu0  ;;  %v1037_v28 = vpop.f32.mrf.mxu1 }
 0x10b   : > { %v1014_v31 = vadd.f32 %v1013_v27, %v1012_v23  ;;  %v1038_v32 = vadd.f32 %v1037_v28, %v1036_v24  ;;  %v760_v35 = vmax.f32 %v744_v29, 0.0  ;;  %v768_v36 = vmax.f32 %v752_v30, 0.0 }
 0x10c   : > { %v1015_v33 = vpop.f32.mrf.mxu0  ;;  %v1039_v34 = vpop.f32.mrf.mxu1 }
 0x10d   : > { %776 = vst [vmem:[%s1246_s28 + $0x28] sm:$0xff] %v760_v35  ;;  %784 = vst [vmem:[%s1246_s28 + $0x68] sm:$0xff] %v768_v36  ;;  %v745_v40 = vadd.f32 %v1014_v31, %v1238_v38  ;;  %v753_v41 = vadd.f32 %v1038_v32, %v1238_v38 }
 0x10e   : > { %v1016_v37 = vpop.f32.mrf.mxu0  ;;  %v1040_v39 = vpop.f32.mrf.mxu1 }
 0x10f   : > { %v1017_v42 = vadd.f32 %v1016_v37, %v1015_v33  ;;  %v1041_v43 = vadd.f32 %v1040_v39, %v1039_v34  ;;  %v761_v44 = vmax.f32 %v745_v40, 0.0  ;;  %v769_v45 = vmax.f32 %v753_v41, 0.0 }
 0x111   : > { %777 = vst [vmem:[%s1246_s28 + $0x30] sm:$0xff] %v761_v44  ;;  %785 = vst [vmem:[%s1246_s28 + $0x70] sm:$0xff] %v769_v45  ;;  %v746_v46 = vadd.f32 %v1017_v42, %v1238_v38  ;;  %v754_v47 = vadd.f32 %v1041_v43, %v1238_v38 }
 0x113   : > { %v762_v48 = vmax.f32 %v746_v46, 0.0  ;;  %v770_v49 = vmax.f32 %v754_v47, 0.0 }
 0x115   : > { %778 = vst [vmem:[%s1246_s28 + $0x38] sm:$0xff] %v762_v48  ;;  %786 = vst [vmem:[%s1246_s28 + $0x78] sm:$0xff] %v770_v49 }
 0x116 PF: > { %s13_s14 = sadd.s32 1, %s1145_s14   ;;  %s1291_s12 = smov %s1141_s13 }
 0x117   : > { %p10_p5 = scmp.ge.s32.totalorder %s13_s14, 5   ;;  %s1292_s13 = smov %s1294_s15 }
 0x119   :  { %12 = sbr.rel (!%p10_p5) target bundleno = 2 (0x2), region = 76 }

// kernel: _lambda_.58
= control target key start
LH: loop header
LB: loop body
LE: loop exit
PB: predicated region body
PF: predicated region fallthrough
CT: control target
= control target key end

     0   :  { %s766_s12 = smov 0   ;;  %s768_s13 = smov 0   ;;  %s811_s0 = inlined_call_operand.vmem [shape: bf16[3,32,128], index: 0, kind: input, shape index: {}]   ;;  %s812_s1 = inlined_call_operand.vmem [shape: bf16[3,128,128], index: 1, kind: input, shape index: {}]   ;;  %s813_s2 = inlined_call_operand.vmem [shape: f32[3,1,128], index: 2, kind: input, shape index: {}]   ;;  %s814_s3 = inlined_call_operand.vmem [shape: f32[3,32,128], index: 3, kind: output, shape index: {}]  }
   0x1   :  { %s770_s14 = smov 0  }
   0x2 LB: > { %s39_s15 = sadd.s32 1, %s740_s13  ;;  %p634_p0 = scmp.ge.s32.totalorder %s744_s14, 1  ;;  %s744_s14 = sphi %s770_s14, %s13_s14   ;;  %s740_s13 = sphi %s768_s13, %s816_s13   ;;  %s736_s12 = sphi %s766_s12, %s815_s12  }
   0x3   : > { %p41_p1 = scmp.ge.s32.totalorder %s39_s15, 3  ;;  %p214_p2 = scmp.lt.s32.totalorder %s744_s14, 4 }
   0x5   : > { %s818_s15 = smov (%p41_p1, %s39_s15), 0  ;;  %p215_p3 = pnand %p634_p0, %p214_p2 }
   0x6   : > { %p271_p4 = scmp.lt.s32.totalorder (!%p215_p3), %s736_s12, 2 }
   0x7   : > { %218 = sbr.rel (%p215_p3) target bundleno = 252 (0xfc), region = 32 }
   0xc   : > { %s820_s12 = smov (!%p271_p4, %s736_s12), 2 }
   0xd   : > { %s655_s16 = sshll.u32 %s820_s12, 6  ;;  %s654_s20 = sshll.u32 %s820_s12, 4 }
   0xe   : > { %s294_s19 = scalar_lea.vmem %s812_s1, %s655_s16  ;;  %s281_s23 = scalar_lea.vmem %s811_s0, %s654_s20 }
   0xf   : > { %v712_v0 = vld [vmem:[%s294_s19 + $0x38] sm:$0xff]   ;;  %v713_v1 = vld [vmem:[%s294_s19 + $0x30] sm:$0xff]   ;;  %v714_v2 = vld [vmem:[%s294_s19 + $0x28] sm:$0xff]   ;;  %s301_s26 = scalar_lea.vmem %s813_s2, %s820_s12  ;;  %s656_s27 = sshll.u32 %s820_s12, 5 }
  0x10   : > { %667 = vmatprep.subr.bf16.mxu0 %v712_v0  ;;  %v715_v3 = vld [vmem:[%s294_s19 + $0x20] sm:$0xff]   ;;  %v716_v5 = vld [vmem:[%s294_s19 + $0x18] sm:$0xff]   ;;  %v717_v6 = vld [vmem:[%s294_s19 + $0x10] sm:$0xff]   ;;  %s313_s30 = scalar_lea.vmem %s814_s3, %s656_s27 }
  0x11   : > { %668 = vmatpush3.bf16.msra.mxu0 %v712_v0  ;;  %v720_v4 = vld [vmem:[%s281_s23] sm:$0xff]   ;;  %v718_v7 = vld [vmem:[%s294_s19 + $0x8] sm:$0xff]  }
  0x12   : > { %669 = vmatprep.subr.bf16.mxu0 %v713_v1  ;;  %683 = vmatprep.mubr.bf16.mxu0 %v720_v4  ;;  %v719_v8 = vld [vmem:[%s294_s19] sm:$0xff]   ;;  %v721_v9 = vld [vmem:[%s281_s23 + $0x8] sm:$0xff]  }
  0x13   : > { %v651_v11 = vld [vmem:[%s301_s26] ss:$0 sm:$0xff] }
  0x15   : > { %670 = vmatpush3.bf16.msra.mxu0 %v713_v1 }
  0x16   : > { %671 = vmatprep.subr.bf16.mxu0 %v714_v2 }
  0x19   : > { %672 = vmatpush3.bf16.msra.mxu0 %v714_v2 }
  0x1a   : > { %673 = vmatprep.subr.bf16.mxu0 %v715_v3 }
  0x1d   : > { %674 = vmatpush3.bf16.msra.mxu0 %v715_v3 }
  0x1e   : > { %675 = vmatprep.subr.bf16.mxu0 %v716_v5 }
  0x21   : > { %676 = vmatpush3.bf16.msra.mxu0 %v716_v5 }
  0x22   : > { %677 = vmatprep.subr.bf16.mxu0 %v717_v6 }
  0x25   : > { %678 = vmatpush3.bf16.msra.mxu0 %v717_v6 }
  0x26   : > { %679 = vmatprep.subr.bf16.mxu0 %v718_v7 }
  0x29   : > { %680 = vmatpush3.bf16.msra.mxu0 %v718_v7 }
  0x2a   : > { %681 = vmatprep.subr.bf16.mxu0 %v719_v8 }
  0x2d   : > { %682 = vmatpush3.bf16.msra.mxu0 %v719_v8 }
  0x30   : > { %684 = vmatmul.mubr.bf16.vlgmr.msra.gmra.mxu0 %v721_v9 }
  0xf0   : > { %v685_v10 = vpop.f32.mrf.mxu0 }
  0xf1   : > { %v481_v13 = vadd.f32 %v685_v10, %v651_v11 }
  0xf2   : > { %v442_v12 = vpop.f32.mrf.mxu0 }
  0xf3   : > { %v485_v15 = vmax.f32 %v481_v13, 0.0  ;;  %v479_v16 = vadd.f32 %v651_v11, %v442_v12 }
  0xf4   : > { %v686_v14 = vpop.f32.mrf.mxu0 }
  0xf5   : > { %489 = vst [vmem:[%s313_s30 + $0x10] sm:$0xff] %v485_v15  ;;  %v483_v18 = vmax.f32 %v479_v16, 0.0  ;;  %v482_v19 = vadd.f32 %v686_v14, %v651_v11 }
  0xf6   : > { %v445_v17 = vpop.f32.mrf.mxu0 }
  0xf7   : > { %487 = vst [vmem:[%s313_s30] sm:$0xff] %v483_v18  ;;  %v486_v20 = vmax.f32 %v482_v19, 0.0  ;;  %v480_v21 = vadd.f32 %v651_v11, %v445_v17 }
  0xf9   : > { %490 = vst [vmem:[%s313_s30 + $0x18] sm:$0xff] %v486_v20  ;;  %v484_v22 = vmax.f32 %v480_v21, 0.0 }
  0xfb   : > { %488 = vst [vmem:[%s313_s30 + $0x8] sm:$0xff] %v484_v22 }
  0xfc PF: > { %s13_s14 = sadd.s32 1, %s744_s14   ;;  %s815_s12 = smov %s740_s13 }
  0xfd   : > { %p10_p5 = scmp.ge.s32.totalorder %s13_s14, 5   ;;  %s816_s13 = smov %s818_s15 }
  0xff   :  { %12 = sbr.rel (!%p10_p5) target bundleno = 2 (0x2), region = 76 }

// kernel: _lambda_.57
= control target key start
LH: loop header
LB: loop body
LE: loop exit
PB: predicated region body
PF: predicated region fallthrough
CT: control target
= control target key end

     0   :  { %s662_s0 = inlined_call_operand.vmem [shape: f32[96,128], index: 0, kind: input, shape index: {}]   ;;  %s663_s1 = inlined_call_operand.vmem [shape: f32[96,128], index: 1, kind: input, shape index: {}]   ;;  %s664_s2 = inlined_call_operand.vmem [shape: f32[96,128], index: 2, kind: input, shape index: {}]   ;;  %s665_s3 = inlined_call_operand.vmem [shape: f32[96,128], index: 3, kind: input, shape index: {}]   ;;  %s666_s4 = inlined_call_operand.vmem [shape: f32[96,128], index: 4, kind: input, shape index: {}]   ;;  %s667_s5 = inlined_call_operand.vmem [shape: f32[96,128], index: 5, kind: input, shape index: {}]   ;;  %s668_s6 = inlined_call_operand.vmem [shape: f32[96,128], index: 6, kind: input, shape index: {}]   ;;  %s669_s7 = inlined_call_operand.vmem [shape: f32[96,128], index: 7, kind: input, shape index: {}]   ;;  %s670_s8 = inlined_call_operand.vmem [shape: f32[96,128], index: 8, kind: input, shape index: {}]   ;;  %s671_s9 = inlined_call_operand.vmem [shape: f32[96,128], index: 9, kind: output, shape index: {}]  }
   0x1   :  { %v32_v0 = vld [vmem:[%s662_s0] sm:$0xff]  ;;  %v33_v6 = vld [vmem:[%s662_s0 + $0x8] sm:$0xff]  ;;  %v34_v15 = vld [vmem:[%s662_s0 + $0x10] sm:$0xff] }
   0x2   :  { %v44_v1 = vld [vmem:[%s663_s1] sm:$0xff]  ;;  %v45_v7 = vld [vmem:[%s663_s1 + $0x8] sm:$0xff]  ;;  %v46_v16 = vld [vmem:[%s663_s1 + $0x10] sm:$0xff] }
   0x3   :  { %v68_v2 = vld [vmem:[%s664_s2] sm:$0xff]  ;;  %v56_v3 = vmax.f32 %v32_v0, %v44_v1  ;;  %v69_v8 = vld [vmem:[%s664_s2 + $0x8] sm:$0xff]  ;;  %v57_v10 = vmax.f32 %v33_v6, %v45_v7  ;;  %v70_v17 = vld [vmem:[%s664_s2 + $0x10] sm:$0xff]  ;;  %v58_v20 = vmax.f32 %v34_v15, %v46_v16 }
   0x4   :  { %v92_v4 = vld [vmem:[%s665_s3] sm:$0xff]  ;;  %v93_v13 = vld [vmem:[%s665_s3 + $0x8] sm:$0xff]  ;;  %v94_v24 = vld [vmem:[%s665_s3 + $0x10] sm:$0xff] }
   0x5   :  { %v80_v5 = vmax.f32 %v56_v3, %v68_v2  ;;  %v116_v9 = vld [vmem:[%s666_s4] sm:$0xff]  ;;  %v81_v14 = vmax.f32 %v57_v10, %v69_v8  ;;  %v117_v19 = vld [vmem:[%s666_s4 + $0x8] sm:$0xff]  ;;  %v82_v26 = vmax.f32 %v58_v20, %v70_v17  ;;  %v35_v27 = vld [vmem:[%s662_s0 + $0x18] sm:$0xff] }
   0x6   :  { %v140_v12 = vld [vmem:[%s667_s5] sm:$0xff]  ;;  %v141_v23 = vld [vmem:[%s667_s5 + $0x8] sm:$0xff]  ;;  %v47_v28 = vld [vmem:[%s663_s1 + $0x18] sm:$0xff] }
   0x7   :  { %v104_v11 = vmax.f32 %v80_v5, %v92_v4  ;;  %v164_v21 = vld [vmem:[%s668_s6] sm:$0xff]  ;;  %v105_v22 = vmax.f32 %v81_v14, %v93_v13  ;;  %v71_v29 = vld [vmem:[%s664_s2 + $0x18] sm:$0xff]  ;;  %v118_v33 = vld [vmem:[%s666_s4 + $0x10] sm:$0xff]  ;;  %v59_v34 = vmax.f32 %v35_v27, %v47_v28  ;;  %v106_v37 = vmax.f32 %v82_v26, %v94_v24 }
   0x8   :  { %v188_v30 = vld [vmem:[%s669_s7] sm:$0xff]  ;;  %v165_v36 = vld [vmem:[%s668_s6 + $0x8] sm:$0xff]  ;;  %v142_v38 = vld [vmem:[%s667_s5 + $0x10] sm:$0xff] }
   0x9   :  { %v128_v18 = vmax.f32 %v104_v11, %v116_v9  ;;  %v212_v31 = vld [vmem:[%s670_s8] sm:$0xff]  ;;  %v129_v32 = vmax.f32 %v105_v22, %v117_v19  ;;  %v95_v39 = vld [vmem:[%s665_s3 + $0x18] sm:$0xff]  ;;  %v83_v41 = vmax.f32 %v59_v34, %v71_v29  ;;  %v189_v46 = vld [vmem:[%s669_s7 + $0x8] sm:$0xff]  ;;  %v130_v48 = vmax.f32 %v106_v37, %v118_v33 }
   0xa   :  { %v36_v42 = vld [vmem:[%s662_s0 + $0x20] sm:$0xff]  ;;  %v213_v47 = vld [vmem:[%s670_s8 + $0x8] sm:$0xff]  ;;  %v119_v49 = vld [vmem:[%s666_s4 + $0x18] sm:$0xff] }
   0xb   :  { %v152_v25 = vmax.f32 %v128_v18, %v140_v12  ;;  %v153_v40 = vmax.f32 %v129_v32, %v141_v23  ;;  %v48_v43 = vld [vmem:[%s663_s1 + $0x20] sm:$0xff]  ;;  %v166_v52 = vld [vmem:[%s668_s6 + $0x10] sm:$0xff]  ;;  %v107_v53 = vmax.f32 %v83_v41, %v95_v39  ;;  %v143_v54 = vld [vmem:[%s667_s5 + $0x18] sm:$0xff]  ;;  %v154_v57 = vmax.f32 %v130_v48, %v142_v38 }
   0xc   :  { %v72_v44 = vld [vmem:[%s664_s2 + $0x20] sm:$0xff]  ;;  %v60_v50 = vmax.f32 %v36_v42, %v48_v43  ;;  %v37_v59 = vld [vmem:[%s662_s0 + $0x28] sm:$0xff]  ;;  %v190_v63 = vld [vmem:[%s669_s7 + $0x10] sm:$0xff] }
   0xd   :  { %v176_v35 = vmax.f32 %v152_v25, %v164_v21  ;;  %v177_v51 = vmax.f32 %v153_v40, %v165_v36  ;;  %v96_v55 = vld [vmem:[%s665_s3 + $0x20] sm:$0xff]  ;;  %v49_v60 = vld [vmem:[%s663_s1 + $0x28] sm:$0xff]  ;;  %v214_v0 = vld [vmem:[%s670_s8 + $0x10] sm:$0xff]  ;;  %v131_v1 = vmax.f32 %v107_v53, %v119_v49  ;;  %v178_v4 = vmax.f32 %v154_v57, %v166_v52 }
   0xe   :  { %v84_v58 = vmax.f32 %v60_v50, %v72_v44  ;;  %v73_v61 = vld [vmem:[%s664_s2 + $0x28] sm:$0xff]  ;;  %v120_v2 = vld [vmem:[%s666_s4 + $0x20] sm:$0xff]  ;;  %v61_v3 = vmax.f32 %v37_v59, %v49_v60  ;;  %v167_v5 = vld [vmem:[%s668_s6 + $0x18] sm:$0xff] }
   0xf   :  { %v200_v45 = vmax.f32 %v176_v35, %v188_v30  ;;  %v201_v62 = vmax.f32 %v177_v51, %v189_v46  ;;  %v144_v7 = vld [vmem:[%s667_s5 + $0x20] sm:$0xff]  ;;  %v97_v8 = vld [vmem:[%s665_s3 + $0x28] sm:$0xff]  ;;  %v155_v10 = vmax.f32 %v131_v1, %v143_v54  ;;  %v38_v12 = vld [vmem:[%s662_s0 + $0x30] sm:$0xff]  ;;  %v202_v15 = vmax.f32 %v178_v4, %v190_v63 }
  0x10   :  { %v108_v6 = vmax.f32 %v84_v58, %v96_v55  ;;  %v85_v11 = vmax.f32 %v61_v3, %v73_v61  ;;  %v50_v13 = vld [vmem:[%s663_s1 + $0x30] sm:$0xff]  ;;  %v191_v16 = vld [vmem:[%s669_s7 + $0x18] sm:$0xff]  ;;  %v121_v19 = vld [vmem:[%s666_s4 + $0x28] sm:$0xff] }
  0x11   :  { %v224_v56 = vmax.f32 %v200_v45, %v212_v31  ;;  %v225_v9 = vmax.f32 %v201_v62, %v213_v47  ;;  %v74_v14 = vld [vmem:[%s664_s2 + $0x30] sm:$0xff]  ;;  %v215_v17 = vld [vmem:[%s670_s8 + $0x18] sm:$0xff]  ;;  %v62_v20 = vmax.f32 %v38_v12, %v50_v13  ;;  %v179_v21 = vmax.f32 %v155_v10, %v167_v5  ;;  %v168_v22 = vld [vmem:[%s668_s6 + $0x20] sm:$0xff] }
  0x12   :  { %v132_v18 = vmax.f32 %v108_v6, %v120_v2  ;;  %v109_v23 = vmax.f32 %v85_v11, %v97_v8  ;;  %v145_v24 = vld [vmem:[%s667_s5 + $0x28] sm:$0xff]  ;;  %v98_v25 = vld [vmem:[%s665_s3 + $0x30] sm:$0xff]  ;;  %v226_v26 = vmax.f32 %v202_v15, %v214_v0  ;;  %v39_v29 = vld [vmem:[%s662_s0 + $0x38] sm:$0xff] }
  0x13   :  { %236 = vst [vmem:[%s671_s9] sm:$0xff] %v224_v56  ;;  %237 = vst [vmem:[%s671_s9 + $0x8] sm:$0xff] %v225_v9  ;;  %v86_v28 = vmax.f32 %v62_v20, %v74_v14  ;;  %v51_v30 = vld [vmem:[%s663_s1 + $0x38] sm:$0xff]  ;;  %v203_v32 = vmax.f32 %v179_v21, %v191_v16  ;;  %v192_v33 = vld [vmem:[%s669_s7 + $0x20] sm:$0xff] }
  0x14   :  { %v156_v27 = vmax.f32 %v132_v18, %v144_v7  ;;  %v75_v31 = vld [vmem:[%s664_s2 + $0x38] sm:$0xff]  ;;  %v216_v34 = vld [vmem:[%s670_s8 + $0x20] sm:$0xff]  ;;  %v133_v35 = vmax.f32 %v109_v23, %v121_v19  ;;  %v122_v36 = vld [vmem:[%s666_s4 + $0x30] sm:$0xff]  ;;  %v63_v37 = vmax.f32 %v39_v29, %v51_v30  ;;  %238 = vst [vmem:[%s671_s9 + $0x10] sm:$0xff] %v226_v26 }
  0x15   :  { %v169_v39 = vld [vmem:[%s668_s6 + $0x28] sm:$0xff]  ;;  %v110_v40 = vmax.f32 %v86_v28, %v98_v25  ;;  %v146_v41 = vld [vmem:[%s667_s5 + $0x30] sm:$0xff]  ;;  %v99_v42 = vld [vmem:[%s665_s3 + $0x38] sm:$0xff]  ;;  %v227_v43 = vmax.f32 %v203_v32, %v215_v17 }
  0x16   :  { %v180_v38 = vmax.f32 %v156_v27, %v168_v22  ;;  %v157_v44 = vmax.f32 %v133_v35, %v145_v24  ;;  %v87_v45 = vmax.f32 %v63_v37, %v75_v31  ;;  %v40_v46 = vld [vmem:[%s662_s0 + $0x40] sm:$0xff]  ;;  %v193_v50 = vld [vmem:[%s669_s7 + $0x28] sm:$0xff]  ;;  %v123_v53 = vld [vmem:[%s666_s4 + $0x38] sm:$0xff] }
  0x17   :  { %v52_v47 = vld [vmem:[%s663_s1 + $0x40] sm:$0xff]  ;;  %v217_v51 = vld [vmem:[%s670_s8 + $0x28] sm:$0xff]  ;;  %v134_v52 = vmax.f32 %v110_v40, %v122_v36  ;;  %239 = vst [vmem:[%s671_s9 + $0x18] sm:$0xff] %v227_v43  ;;  %v170_v56 = vld [vmem:[%s668_s6 + $0x30] sm:$0xff] }
  0x18   :  { %v76_v48 = vld [vmem:[%s664_s2 + $0x40] sm:$0xff]  ;;  %v204_v49 = vmax.f32 %v180_v38, %v192_v33  ;;  %v64_v54 = vmax.f32 %v40_v46, %v52_v47  ;;  %v181_v55 = vmax.f32 %v157_v44, %v169_v39  ;;  %v111_v57 = vmax.f32 %v87_v45, %v99_v42  ;;  %v147_v58 = vld [vmem:[%s667_s5 + $0x38] sm:$0xff]  ;;  %v41_v63 = vld [vmem:[%s662_s0 + $0x48] sm:$0xff] }
  0x19   :  { %v100_v59 = vld [vmem:[%s665_s3 + $0x40] sm:$0xff]  ;;  %v158_v61 = vmax.f32 %v134_v52, %v146_v41  ;;  %v53_v0 = vld [vmem:[%s663_s1 + $0x48] sm:$0xff]  ;;  %v194_v3 = vld [vmem:[%s669_s7 + $0x30] sm:$0xff] }
  0x1a   :  { %v228_v60 = vmax.f32 %v204_v49, %v216_v34  ;;  %v88_v62 = vmax.f32 %v64_v54, %v76_v48  ;;  %v77_v1 = vld [vmem:[%s664_s2 + $0x48] sm:$0xff]  ;;  %v205_v2 = vmax.f32 %v181_v55, %v193_v50  ;;  %v218_v4 = vld [vmem:[%s670_s8 + $0x30] sm:$0xff]  ;;  %v135_v5 = vmax.f32 %v111_v57, %v123_v53  ;;  %v124_v6 = vld [vmem:[%s666_s4 + $0x40] sm:$0xff] }
  0x1b   :  { %v65_v7 = vmax.f32 %v41_v63, %v53_v0  ;;  %v182_v8 = vmax.f32 %v158_v61, %v170_v56  ;;  %v171_v9 = vld [vmem:[%s668_s6 + $0x38] sm:$0xff]  ;;  %v148_v11 = vld [vmem:[%s667_s5 + $0x40] sm:$0xff]  ;;  %v101_v12 = vld [vmem:[%s665_s3 + $0x48] sm:$0xff] }
  0x1c   :  { %240 = vst [vmem:[%s671_s9 + $0x20] sm:$0xff] %v228_v60  ;;  %v112_v10 = vmax.f32 %v88_v62, %v100_v59  ;;  %v229_v13 = vmax.f32 %v205_v2, %v217_v51  ;;  %v159_v14 = vmax.f32 %v135_v5, %v147_v58  ;;  %v42_v16 = vld [vmem:[%s662_s0 + $0x50] sm:$0xff]  ;;  %v195_v20 = vld [vmem:[%s669_s7 + $0x38] sm:$0xff]  ;;  %v125_v23 = vld [vmem:[%s666_s4 + $0x48] sm:$0xff] }
  0x1d   :  { %v89_v15 = vmax.f32 %v65_v7, %v77_v1  ;;  %v54_v17 = vld [vmem:[%s663_s1 + $0x50] sm:$0xff]  ;;  %v206_v19 = vmax.f32 %v182_v8, %v194_v3  ;;  %v219_v21 = vld [vmem:[%s670_s8 + $0x38] sm:$0xff]  ;;  %v172_v26 = vld [vmem:[%s668_s6 + $0x40] sm:$0xff] }
  0x1e   :  { %v78_v18 = vld [vmem:[%s664_s2 + $0x50] sm:$0xff]  ;;  %v136_v22 = vmax.f32 %v112_v10, %v124_v6  ;;  %v66_v24 = vmax.f32 %v42_v16, %v54_v17  ;;  %241 = vst [vmem:[%s671_s9 + $0x28] sm:$0xff] %v229_v13  ;;  %v183_v25 = vmax.f32 %v159_v14, %v171_v9  ;;  %v149_v28 = vld [vmem:[%s667_s5 + $0x48] sm:$0xff]  ;;  %v43_v33 = vld [vmem:[%s662_s0 + $0x58] sm:$0xff] }
  0x1f   :  { %v113_v27 = vmax.f32 %v89_v15, %v101_v12  ;;  %v102_v29 = vld [vmem:[%s665_s3 + $0x50] sm:$0xff]  ;;  %v230_v30 = vmax.f32 %v206_v19, %v218_v4  ;;  %v55_v34 = vld [vmem:[%s663_s1 + $0x58] sm:$0xff]  ;;  %v196_v37 = vld [vmem:[%s669_s7 + $0x40] sm:$0xff] }
  0x20   :  { %v160_v31 = vmax.f32 %v136_v22, %v148_v11  ;;  %v90_v32 = vmax.f32 %v66_v24, %v78_v18  ;;  %v79_v35 = vld [vmem:[%s664_s2 + $0x58] sm:$0xff]  ;;  %v207_v36 = vmax.f32 %v183_v25, %v195_v20  ;;  %v126_v39 = vld [vmem:[%s666_s4 + $0x50] sm:$0xff]  ;;  %v67_v40 = vmax.f32 %v43_v33, %v55_v34  ;;  %v173_v42 = vld [vmem:[%s668_s6 + $0x48] sm:$0xff] }
  0x21   :  { %v137_v38 = vmax.f32 %v113_v27, %v125_v23  ;;  %242 = vst [vmem:[%s671_s9 + $0x30] sm:$0xff] %v230_v30  ;;  %v103_v44 = vld [vmem:[%s665_s3 + $0x58] sm:$0xff]  ;;  %v220_v46 = vld [vmem:[%s670_s8 + $0x40] sm:$0xff]  ;;  %v150_v48 = vld [vmem:[%s667_s5 + $0x50] sm:$0xff] }
  0x22   :  { %v184_v41 = vmax.f32 %v160_v31, %v172_v26  ;;  %v114_v43 = vmax.f32 %v90_v32, %v102_v29  ;;  %v231_v45 = vmax.f32 %v207_v36, %v219_v21  ;;  %v91_v49 = vmax.f32 %v67_v40, %v79_v35  ;;  %v197_v51 = vld [vmem:[%s669_s7 + $0x48] sm:$0xff]  ;;  %v127_v53 = vld [vmem:[%s666_s4 + $0x58] sm:$0xff]  ;;  %v174_v55 = vld [vmem:[%s668_s6 + $0x50] sm:$0xff] }
  0x23   :  { %v161_v47 = vmax.f32 %v137_v38, %v149_v28  ;;  %v221_v58 = vld [vmem:[%s670_s8 + $0x48] sm:$0xff]  ;;  %v151_v60 = vld [vmem:[%s667_s5 + $0x58] sm:$0xff]  ;;  %v198_v62 = vld [vmem:[%s669_s7 + $0x50] sm:$0xff] }
  0x24   :  { %v208_v50 = vmax.f32 %v184_v41, %v196_v37  ;;  %v138_v52 = vmax.f32 %v114_v43, %v126_v39  ;;  %243 = vst [vmem:[%s671_s9 + $0x38] sm:$0xff] %v231_v45  ;;  %v115_v56 = vmax.f32 %v91_v49, %v103_v44  ;;  %v175_v1 = vld [vmem:[%s668_s6 + $0x58] sm:$0xff]  ;;  %v222_v3 = vld [vmem:[%s670_s8 + $0x50] sm:$0xff] }
  0x25   :  { %v185_v54 = vmax.f32 %v161_v47, %v173_v42  ;;  %v199_v6 = vld [vmem:[%s669_s7 + $0x58] sm:$0xff] }
  0x26   :  { %v232_v57 = vmax.f32 %v208_v50, %v220_v46  ;;  %v162_v59 = vmax.f32 %v138_v52, %v150_v48  ;;  %v139_v63 = vmax.f32 %v115_v56, %v127_v53  ;;  %v223_v9 = vld [vmem:[%s670_s8 + $0x58] sm:$0xff] }
  0x27   :  { %v209_v61 = vmax.f32 %v185_v54, %v197_v51 }
  0x28   :  { %244 = vst [vmem:[%s671_s9 + $0x40] sm:$0xff] %v232_v57  ;;  %v186_v0 = vmax.f32 %v162_v59, %v174_v55  ;;  %v163_v4 = vmax.f32 %v139_v63, %v151_v60 }
  0x29   :  { %v233_v2 = vmax.f32 %v209_v61, %v221_v58 }
  0x2a   :  { %v210_v5 = vmax.f32 %v186_v0, %v198_v62  ;;  %v187_v7 = vmax.f32 %v163_v4, %v175_v1 }
  0x2b   :  { %245 = vst [vmem:[%s671_s9 + $0x48] sm:$0xff] %v233_v2 }
  0x2c   :  { %v234_v8 = vmax.f32 %v210_v5, %v222_v3  ;;  %v211_v10 = vmax.f32 %v187_v7, %v199_v6 }
  0x2e   :  { %246 = vst [vmem:[%s671_s9 + $0x50] sm:$0xff] %v234_v8  ;;  %v235_v11 = vmax.f32 %v211_v10, %v223_v9 }
  0x30   :  { %247 = vst [vmem:[%s671_s9 + $0x58] sm:$0xff] %v235_v11 }

// kernel: _lambda_.60
= control target key start
LH: loop header
LB: loop body
LE: loop exit
PB: predicated region body
PF: predicated region fallthrough
CT: control target
= control target key end

     0   :  { %s762_s12 = smov 0   ;;  %s764_s13 = smov 0   ;;  %s807_s0 = inlined_call_operand.vmem [shape: bf16[3,32,128], index: 0, kind: input, shape index: {}]   ;;  %s808_s1 = inlined_call_operand.vmem [shape: bf16[3,128,128], index: 1, kind: input, shape index: {}]   ;;  %s809_s2 = inlined_call_operand.vmem [shape: f32[3,1,128], index: 2, kind: input, shape index: {}]   ;;  %s810_s3 = inlined_call_operand.vmem [shape: f32[3,32,128], index: 3, kind: output, shape index: {}]  }
   0x1   :  { %s766_s14 = smov 0  }
   0x2 LB: > { %s39_s15 = sadd.s32 1, %s736_s13  ;;  %p630_p0 = scmp.ge.s32.totalorder %s740_s14, 1  ;;  %s740_s14 = sphi %s766_s14, %s13_s14   ;;  %s736_s13 = sphi %s764_s13, %s812_s13   ;;  %s732_s12 = sphi %s762_s12, %s811_s12  }
   0x3   : > { %p41_p1 = scmp.ge.s32.totalorder %s39_s15, 3  ;;  %p214_p2 = scmp.lt.s32.totalorder %s740_s14, 4 }
   0x5   : > { %s814_s15 = smov (%p41_p1, %s39_s15), 0  ;;  %p215_p3 = pnand %p630_p0, %p214_p2 }
   0x6   : > { %p271_p4 = scmp.lt.s32.totalorder (!%p215_p3), %s732_s12, 2 }
   0x7   : > { %218 = sbr.rel (%p215_p3) target bundleno = 250 (0xfa), region = 32 }
   0xc   : > { %s816_s12 = smov (!%p271_p4, %s732_s12), 2 }
   0xd   : > { %s651_s16 = sshll.u32 %s816_s12, 6  ;;  %s650_s20 = sshll.u32 %s816_s12, 4 }
   0xe   : > { %s294_s19 = scalar_lea.vmem %s808_s1, %s651_s16  ;;  %s281_s23 = scalar_lea.vmem %s807_s0, %s650_s20 }
   0xf   : > { %v708_v0 = vld [vmem:[%s294_s19 + $0x38] sm:$0xff]   ;;  %v709_v1 = vld [vmem:[%s294_s19 + $0x30] sm:$0xff]   ;;  %v710_v2 = vld [vmem:[%s294_s19 + $0x28] sm:$0xff]   ;;  %s301_s26 = scalar_lea.vmem %s809_s2, %s816_s12  ;;  %s652_s27 = sshll.u32 %s816_s12, 5 }
  0x10   : > { %663 = vmatprep.subr.bf16.mxu0 %v708_v0  ;;  %v711_v3 = vld [vmem:[%s294_s19 + $0x20] sm:$0xff]   ;;  %v712_v5 = vld [vmem:[%s294_s19 + $0x18] sm:$0xff]   ;;  %v713_v6 = vld [vmem:[%s294_s19 + $0x10] sm:$0xff]   ;;  %s313_s30 = scalar_lea.vmem %s810_s3, %s652_s27 }
  0x11   : > { %664 = vmatpush3.bf16.msra.mxu0 %v708_v0  ;;  %v716_v4 = vld [vmem:[%s281_s23] sm:$0xff]   ;;  %v714_v7 = vld [vmem:[%s294_s19 + $0x8] sm:$0xff]  }
  0x12   : > { %665 = vmatprep.subr.bf16.mxu0 %v709_v1  ;;  %679 = vmatprep.mubr.bf16.mxu0 %v716_v4  ;;  %v715_v8 = vld [vmem:[%s294_s19] sm:$0xff]   ;;  %v717_v9 = vld [vmem:[%s281_s23 + $0x8] sm:$0xff]  }
  0x13   : > { %v647_v11 = vld [vmem:[%s301_s26] ss:$0 sm:$0xff] }
  0x15   : > { %666 = vmatpush3.bf16.msra.mxu0 %v709_v1 }
  0x16   : > { %667 = vmatprep.subr.bf16.mxu0 %v710_v2 }
  0x19   : > { %668 = vmatpush3.bf16.msra.mxu0 %v710_v2 }
  0x1a   : > { %669 = vmatprep.subr.bf16.mxu0 %v711_v3 }
  0x1d   : > { %670 = vmatpush3.bf16.msra.mxu0 %v711_v3 }
  0x1e   : > { %671 = vmatprep.subr.bf16.mxu0 %v712_v5 }
  0x21   : > { %672 = vmatpush3.bf16.msra.mxu0 %v712_v5 }
  0x22   : > { %673 = vmatprep.subr.bf16.mxu0 %v713_v6 }
  0x25   : > { %674 = vmatpush3.bf16.msra.mxu0 %v713_v6 }
  0x26   : > { %675 = vmatprep.subr.bf16.mxu0 %v714_v7 }
  0x29   : > { %676 = vmatpush3.bf16.msra.mxu0 %v714_v7 }
  0x2a   : > { %677 = vmatprep.subr.bf16.mxu0 %v715_v8 }
  0x2d   : > { %678 = vmatpush3.bf16.msra.mxu0 %v715_v8 }
  0x30   : > { %680 = vmatmul.mubr.bf16.vlgmr.msra.gmra.mxu0 %v717_v9 }
  0xf0   : > { %v681_v10 = vpop.f32.mrf.mxu0 }
  0xf1   : > { %v481_v13 = vadd.f32 %v681_v10, %v647_v11 }
  0xf2   : > { %v442_v12 = vpop.f32.mrf.mxu0 }
  0xf3   : > { %485 = vst [vmem:[%s313_s30 + $0x10] sm:$0xff] %v481_v13  ;;  %v479_v15 = vadd.f32 %v647_v11, %v442_v12 }
  0xf4   : > { %v682_v14 = vpop.f32.mrf.mxu0 }
  0xf5   : > { %483 = vst [vmem:[%s313_s30] sm:$0xff] %v479_v15  ;;  %v482_v17 = vadd.f32 %v682_v14, %v647_v11 }
  0xf6   : > { %v445_v16 = vpop.f32.mrf.mxu0 }
  0xf7   : > { %486 = vst [vmem:[%s313_s30 + $0x18] sm:$0xff] %v482_v17  ;;  %v480_v18 = vadd.f32 %v647_v11, %v445_v16 }
  0xf9   : > { %484 = vst [vmem:[%s313_s30 + $0x8] sm:$0xff] %v480_v18 }
  0xfa PF: > { %s13_s14 = sadd.s32 1, %s740_s14   ;;  %s811_s12 = smov %s736_s13 }
  0xfb   : > { %p10_p5 = scmp.ge.s32.totalorder %s13_s14, 5   ;;  %s812_s13 = smov %s814_s15 }
  0xfd   :  { %12 = sbr.rel (!%p10_p5) target bundleno = 2 (0x2), region = 76 }

// kernel: _lambda_.61
= control target key start
LH: loop header
LB: loop body
LE: loop exit
PB: predicated region body
PF: predicated region fallthrough
CT: control target
= control target key end

     0   :  { %s877_s15 = smov 0   ;;  %s879_s16 = smov 0   ;;  %s925_s0 = inlined_call_operand.vmem [shape: bf16[3,32,128], index: 0, kind: input, shape index: {}]   ;;  %s926_s1 = inlined_call_operand.vmem [shape: bf16[3,128,128], index: 1, kind: input, shape index: {}]   ;;  %s927_s2 = inlined_call_operand.vmem [shape: f32[3,1,128], index: 2, kind: input, shape index: {}]   ;;  %s928_s3 = inlined_call_operand.vmem [shape: f32[3,32,128], index: 3, kind: input, shape index: {}]   ;;  %s929_s4 = inlined_call_operand.vmem [shape: f32[3,32,128], index: 4, kind: output, shape index: {}]  }
   0x1   :  { %s881_s17 = smov 0  }
   0x2 LB: > { %s40_s18 = sadd.s32 1, %s846_s16  ;;  %p737_p0 = scmp.ge.s32.totalorder %s850_s17, 1  ;;  %s850_s17 = sphi %s881_s17, %s14_s17   ;;  %s846_s16 = sphi %s879_s16, %s931_s16   ;;  %s842_s15 = sphi %s877_s15, %s930_s15  }
   0x3   : > { %p42_p1 = scmp.ge.s32.totalorder %s40_s18, 3  ;;  %p261_p2 = scmp.lt.s32.totalorder %s850_s17, 4 }
   0x5   : > { %s933_s18 = smov (%p42_p1, %s40_s18), 0  ;;  %p262_p3 = pnand %p737_p0, %p261_p2 }
   0x6   : > { %p332_p4 = scmp.lt.s32.totalorder (!%p262_p3), %s842_s15, 2 }
   0x7   : > { %265 = sbr.rel (%p262_p3) target bundleno = 254 (0xfe), region = 36 }
   0xc   : > { %s935_s15 = smov (!%p332_p4, %s842_s15), 2 }
   0xd   : > { %s760_s19 = sshll.u32 %s935_s15, 6  ;;  %s759_s23 = sshll.u32 %s935_s15, 4 }
   0xe   : > { %s355_s22 = scalar_lea.vmem %s926_s1, %s760_s19  ;;  %s342_s26 = scalar_lea.vmem %s925_s0, %s759_s23 }
   0xf   : > { %v818_v0 = vld [vmem:[%s355_s22 + $0x38] sm:$0xff]   ;;  %v819_v1 = vld [vmem:[%s355_s22 + $0x30] sm:$0xff]   ;;  %v820_v2 = vld [vmem:[%s355_s22 + $0x28] sm:$0xff]   ;;  %s761_s27 = sshll.u32 %s935_s15, 5  ;;  %s362_s30 = scalar_lea.vmem %s927_s2, %s935_s15 }
  0x10   : > { %773 = vmatprep.subr.bf16.mxu0 %v818_v0  ;;  %v821_v3 = vld [vmem:[%s355_s22 + $0x20] sm:$0xff]   ;;  %v822_v5 = vld [vmem:[%s355_s22 + $0x18] sm:$0xff]   ;;  %v823_v6 = vld [vmem:[%s355_s22 + $0x10] sm:$0xff]   ;;  %s374_s7 = scalar_lea.vmem %s928_s3, %s761_s27  ;;  %s387_s10 = scalar_lea.vmem %s929_s4, %s761_s27 }
  0x11   : > { %774 = vmatpush3.bf16.msra.mxu0 %v818_v0  ;;  %v826_v4 = vld [vmem:[%s342_s26] sm:$0xff]   ;;  %v824_v7 = vld [vmem:[%s355_s22 + $0x8] sm:$0xff]   ;;  %v559_v12 = vld [vmem:[%s374_s7 + $0x10] sm:$0xff] }
  0x12   : > { %775 = vmatprep.subr.bf16.mxu0 %v819_v1  ;;  %789 = vmatprep.mubr.bf16.mxu0 %v826_v4  ;;  %v825_v8 = vld [vmem:[%s355_s22] sm:$0xff]   ;;  %v827_v9 = vld [vmem:[%s342_s26 + $0x8] sm:$0xff]   ;;  %v560_v19 = vld [vmem:[%s374_s7 + $0x18] sm:$0xff] }
  0x13   : > { %v756_v11 = vld [vmem:[%s362_s30] ss:$0 sm:$0xff]  ;;  %v558_v24 = vld [vmem:[%s374_s7 + $0x8] sm:$0xff] }
  0x14   : > { %v557_v15 = vld [vmem:[%s374_s7] sm:$0xff] }
  0x15   : > { %776 = vmatpush3.bf16.msra.mxu0 %v819_v1 }
  0x16   : > { %777 = vmatprep.subr.bf16.mxu0 %v820_v2 }
  0x19   : > { %778 = vmatpush3.bf16.msra.mxu0 %v820_v2 }
  0x1a   : > { %779 = vmatprep.subr.bf16.mxu0 %v821_v3 }
  0x1d   : > { %780 = vmatpush3.bf16.msra.mxu0 %v821_v3 }
  0x1e   : > { %781 = vmatprep.subr.bf16.mxu0 %v822_v5 }
  0x21   : > { %782 = vmatpush3.bf16.msra.mxu0 %v822_v5 }
  0x22   : > { %783 = vmatprep.subr.bf16.mxu0 %v823_v6 }
  0x25   : > { %784 = vmatpush3.bf16.msra.mxu0 %v823_v6 }
  0x26   : > { %785 = vmatprep.subr.bf16.mxu0 %v824_v7 }
  0x29   : > { %786 = vmatpush3.bf16.msra.mxu0 %v824_v7 }
  0x2a   : > { %787 = vmatprep.subr.bf16.mxu0 %v825_v8 }
  0x2d   : > { %788 = vmatpush3.bf16.msra.mxu0 %v825_v8 }
  0x30   : > { %790 = vmatmul.mubr.bf16.vlgmr.msra.gmra.mxu0 %v827_v9 }
  0xf0   : > { %v791_v10 = vpop.f32.mrf.mxu0 }
  0xf1   : > { %v555_v14 = vadd.f32 %v791_v10, %v756_v11 }
  0xf2   : > { %v516_v13 = vpop.f32.mrf.mxu0 }
  0xf3   : > { %v563_v17 = vadd.f32 %v559_v12, %v555_v14  ;;  %v553_v18 = vadd.f32 %v756_v11, %v516_v13 }
  0xf4   : > { %v792_v16 = vpop.f32.mrf.mxu0 }
  0xf5   : > { %v567_v21 = vmax.f32 %v563_v17, 0.0  ;;  %v561_v22 = vadd.f32 %v557_v15, %v553_v18  ;;  %v556_v23 = vadd.f32 %v792_v16, %v756_v11 }
  0xf6   : > { %v519_v20 = vpop.f32.mrf.mxu0 }
  0xf7   : > { %571 = vst [vmem:[%s387_s10 + $0x10] sm:$0xff] %v567_v21  ;;  %v565_v25 = vmax.f32 %v561_v22, 0.0  ;;  %v564_v26 = vadd.f32 %v560_v19, %v556_v23  ;;  %v554_v27 = vadd.f32 %v756_v11, %v519_v20 }
  0xf9   : > { %569 = vst [vmem:[%s387_s10] sm:$0xff] %v565_v25  ;;  %v568_v28 = vmax.f32 %v564_v26, 0.0  ;;  %v562_v29 = vadd.f32 %v558_v24, %v554_v27 }
  0xfb   : > { %572 = vst [vmem:[%s387_s10 + $0x18] sm:$0xff] %v568_v28  ;;  %v566_v30 = vmax.f32 %v562_v29, 0.0 }
  0xfd   : > { %570 = vst [vmem:[%s387_s10 + $0x8] sm:$0xff] %v566_v30 }
  0xfe PF: > { %s14_s17 = sadd.s32 1, %s850_s17   ;;  %s930_s15 = smov %s846_s16 }
  0xff   : > { %p11_p5 = scmp.ge.s32.totalorder %s14_s17, 5   ;;  %s931_s16 = smov %s933_s18 }
 0x101   :  { %13 = sbr.rel (!%p11_p5) target bundleno = 2 (0x2), region = 83 }

// kernel: _lambda_.69
= control target key start
LH: loop header
LB: loop body
LE: loop exit
PB: predicated region body
PF: predicated region fallthrough
CT: control target
= control target key end

     0   :  { %s786_s12 = smov 0   ;;  %s788_s13 = smov 0   ;;  %s852_s0 = inlined_call_operand.vmem [shape: bf16[3,8,256], index: 0, kind: input, shape index: {}]   ;;  %s853_s1 = inlined_call_operand.vmem [shape: bf16[3,256,128], index: 1, kind: input, shape index: {}]   ;;  %s854_s2 = inlined_call_operand.vmem [shape: f32[3,1,128], index: 2, kind: input, shape index: {}]   ;;  %s855_s3 = inlined_call_operand.vmem [shape: f32[3,8,128], index: 3, kind: output, shape index: {}]  }
   0x1   :  { %s790_s14 = smov 0  }
   0x2 LB: > { %s39_s15 = sadd.s32 1, %s760_s13  ;;  %p648_p0 = scmp.ge.s32.totalorder %s764_s14, 1  ;;  %s764_s14 = sphi %s790_s14, %s13_s14   ;;  %s760_s13 = sphi %s788_s13, %s857_s13   ;;  %s756_s12 = sphi %s786_s12, %s856_s12  }
   0x3   : > { %p41_p1 = scmp.ge.s32.totalorder %s39_s15, 3  ;;  %p215_p2 = scmp.lt.s32.totalorder %s764_s14, 4 }
   0x5   : > { %s859_s15 = smov (%p41_p1, %s39_s15), 0  ;;  %p216_p3 = pnand %p648_p0, %p215_p2 }
   0x6   : > { %p271_p4 = scmp.lt.s32.totalorder (!%p216_p3), %s756_s12, 2 }
   0x7   : > { %219 = sbr.rel (%p216_p3) target bundleno = 250 (0xfa), region = 32 }
   0xc   : > { %s861_s12 = smov (!%p271_p4, %s756_s12), 2 }
   0xd   : > { %s676_s16 = sshll.u32 %s861_s12, 7  ;;  %s675_s20 = sshll.u32 %s861_s12, 3 }
   0xe   : > { %s810_s19 = scalar_lea.vmem %s853_s1, %s676_s16  ;;  %s282_s23 = scalar_lea.vmem %s852_s0, %s675_s20 }
   0xf   : > { %v724_v0 = vld [vmem:[%s810_s19 + $0x78] sm:$0xff]   ;;  %v726_v2 = vld [vmem:[%s810_s19 + $0x70] sm:$0xff]   ;;  %v728_v4 = vld [vmem:[%s810_s19 + $0x68] sm:$0xff]   ;;  %s302_s26 = scalar_lea.vmem %s854_s2, %s861_s12  ;;  %s312_s29 = scalar_lea.vmem %s855_s3, %s675_s20 }
  0x10   : > { %v725_v1 = vld [vmem:[%s810_s19 + $0x38] sm:$0xff]   ;;  %677 = vmatprep.subr.bf16.mxu0 %v724_v0  ;;  %v727_v3 = vld [vmem:[%s810_s19 + $0x30] sm:$0xff]   ;;  %v729_v5 = vld [vmem:[%s810_s19 + $0x28] sm:$0xff]  }
  0x11   : > { %678 = vmatpush3.bf16.msra.mxu0 %v725_v1  ;;  %v730_v6 = vld [vmem:[%s810_s19 + $0x60] sm:$0xff]   ;;  %v732_v8 = vld [vmem:[%s810_s19 + $0x58] sm:$0xff]   ;;  %v734_v10 = vld [vmem:[%s810_s19 + $0x50] sm:$0xff]  }
  0x12   : > { %679 = vmatprep.subr.bf16.mxu0 %v726_v2  ;;  %v731_v7 = vld [vmem:[%s810_s19 + $0x20] sm:$0xff]   ;;  %v733_v9 = vld [vmem:[%s810_s19 + $0x18] sm:$0xff]   ;;  %v735_v13 = vld [vmem:[%s810_s19 + $0x10] sm:$0xff]  }
  0x13   : > { %v320_v11 = vld [vmem:[%s282_s23] sm:$0xff]  ;;  %v736_v14 = vld [vmem:[%s810_s19 + $0x48] sm:$0xff]  }
  0x14   : > { %v655_v12 = vcombine.high %v320_v11, %v320_v11  ;;  %v737_v15 = vld [vmem:[%s810_s19 + $0x8] sm:$0xff]   ;;  %v738_v16 = vld [vmem:[%s810_s19 + $0x40] sm:$0xff]   ;;  %v654_v18 = vcombine.low %v320_v11, %v320_v11 }
  0x15   : > { %680 = vmatpush3.bf16.msra.mxu0 %v727_v3  ;;  %v739_v17 = vld [vmem:[%s810_s19] sm:$0xff]  }
  0x16   : > { %681 = vmatprep.subr.bf16.mxu0 %v728_v4  ;;  %488 = vmatprep.mubr.bf16.mxu0 %v655_v12  ;;  %v672_v22 = vld [vmem:[%s302_s26] ss:$0 sm:$0xff] }
  0x19   : > { %682 = vmatpush3.bf16.msra.mxu0 %v729_v5 }
  0x1a   : > { %683 = vmatprep.subr.bf16.mxu0 %v730_v6 }
  0x1d   : > { %684 = vmatpush3.bf16.msra.mxu0 %v731_v7 }
  0x1e   : > { %685 = vmatprep.subr.bf16.mxu0 %v732_v8 }
  0x21   : > { %686 = vmatpush3.bf16.msra.mxu0 %v733_v9 }
  0x22   : > { %687 = vmatprep.subr.bf16.mxu0 %v734_v10 }
  0x25   : > { %688 = vmatpush3.bf16.msra.mxu0 %v735_v13 }
  0x26   : > { %689 = vmatprep.subr.bf16.mxu0 %v736_v14 }
  0x29   : > { %690 = vmatpush3.bf16.msra.mxu0 %v737_v15 }
  0x2a   : > { %691 = vmatprep.subr.bf16.mxu0 %v738_v16 }
  0x2d   : > { %692 = vmatpush3.bf16.msra.mxu0 %v739_v17 }
  0x30   : > { %489 = vmatmul.mubr.bf16.vlgmr.msra.gmra.mxu0 %v654_v18 }
  0xf0   : > { %v693_v19 = vpop.f32.mrf.mxu0 }
  0xf2   : > { %v694_v20 = vpop.f32.mrf.mxu0 }
  0xf3   : > { %v695_v21 = vadd.f32 %v694_v20, %v693_v19 }
  0xf4   : > { %v696_v23 = vpop.f32.mrf.mxu0 }
  0xf5   : > { %v509_v25 = vadd.f32 %v695_v21, %v672_v22 }
  0xf6   : > { %v697_v24 = vpop.f32.mrf.mxu0 }
  0xf7   : > { %v510_v26 = vmax.f32 %v509_v25, 0.0 }
  0xf9   : > { %511 = vst [vmem:[%s312_s29] sm:$0xff] %v510_v26 }
  0xfa PF: > { %s13_s14 = sadd.s32 1, %s764_s14   ;;  %s856_s12 = smov %s760_s13 }
  0xfb   : > { %p10_p5 = scmp.ge.s32.totalorder %s13_s14, 5   ;;  %s857_s13 = smov %s859_s15 }
  0xfd   :  { %12 = sbr.rel (!%p10_p5) target bundleno = 2 (0x2), region = 76 }

// kernel: _lambda_.70
= control target key start
LH: loop header
LB: loop body
LE: loop exit
PB: predicated region body
PF: predicated region fallthrough
CT: control target
= control target key end

     0   :  { %s685_s12 = smov 0   ;;  %s687_s13 = smov 0   ;;  %s730_s0 = inlined_call_operand.vmem [shape: bf16[3,8,128], index: 0, kind: input, shape index: {}]   ;;  %s731_s1 = inlined_call_operand.vmem [shape: bf16[3,128,128], index: 1, kind: input, shape index: {}]   ;;  %s732_s2 = inlined_call_operand.vmem [shape: f32[3,1,128], index: 2, kind: input, shape index: {}]   ;;  %s733_s3 = inlined_call_operand.vmem [shape: f32[3,8,128], index: 3, kind: output, shape index: {}]  }
   0x1   :  { %s689_s14 = smov 0  }
   0x2 LB: > { %s39_s15 = sadd.s32 1, %s657_s13  ;;  %p559_p0 = scmp.ge.s32.totalorder %s661_s14, 1  ;;  %s661_s14 = sphi %s689_s14, %s13_s14   ;;  %s657_s13 = sphi %s687_s13, %s735_s13   ;;  %s653_s12 = sphi %s685_s12, %s734_s12  }
   0x3   : > { %p41_p1 = scmp.ge.s32.totalorder %s39_s15, 3  ;;  %p211_p2 = scmp.lt.s32.totalorder %s661_s14, 4 }
   0x5   : > { %s737_s15 = smov (%p41_p1, %s39_s15), 0  ;;  %p212_p3 = pnand %p559_p0, %p211_p2 }
   0x6   : > { %p263_p4 = scmp.lt.s32.totalorder (!%p212_p3), %s653_s12, 2 }
   0x7   : > { %215 = sbr.rel (%p212_p3) target bundleno = 246 (0xf6), region = 32 }
   0xc   : > { %v663_v0 = vmov 0.0   ;;  %vm664_vm0 = vmmov 0   ;;  %s739_s12 = smov (!%p263_p4, %s653_s12), 2 }
   0xd   : > { %585 = vmatprep.subr.bf16.mxu0 %v663_v0  ;;  %601 = vmatprep.mubr.msk.bf16.mxu0 %vm664_vm0, %v663_v0  ;;  %s575_s16 = sshll.u32 %s739_s12, 6  ;;  %s560_s20 = sshll.u32 %s739_s12, 2 }
   0xe   : > { %s284_s19 = scalar_lea.vmem %s731_s1, %s575_s16  ;;  %s272_s23 = scalar_lea.vmem %s730_s0, %s560_s20 }
   0xf   : > { %v631_v1 = vld [vmem:[%s284_s19 + $0x38] sm:$0xff]   ;;  %v632_v2 = vld [vmem:[%s284_s19 + $0x30] sm:$0xff]   ;;  %v633_v3 = vld [vmem:[%s284_s19 + $0x28] sm:$0xff]   ;;  %s291_s26 = scalar_lea.vmem %s732_s2, %s739_s12  ;;  %s563_s27 = sshll.u32 %s739_s12, 3 }
  0x10   : > { %586 = vmatpush3.bf16.msra.mxu0 %v631_v1  ;;  %v634_v4 = vld [vmem:[%s284_s19 + $0x20] sm:$0xff]   ;;  %v635_v5 = vld [vmem:[%s284_s19 + $0x18] sm:$0xff]   ;;  %v636_v6 = vld [vmem:[%s284_s19 + $0x10] sm:$0xff]   ;;  %s301_s30 = scalar_lea.vmem %s733_s3, %s563_s27 }
  0x11   : > { %587 = vmatprep.subr.bf16.mxu0 %v663_v0  ;;  %v637_v7 = vld [vmem:[%s284_s19 + $0x8] sm:$0xff]   ;;  %v638_v8 = vld [vmem:[%s284_s19] sm:$0xff]  }
  0x12   : > { %v309_v9 = vld [vmem:[%s272_s23] sm:$0xf] }
  0x13   : > { %v572_v11 = vld [vmem:[%s291_s26] ss:$0 sm:$0xff] }
  0x14   : > { %588 = vmatpush3.bf16.msra.mxu0 %v632_v2 }
  0x15   : > { %589 = vmatprep.subr.bf16.mxu0 %v663_v0 }
  0x18   : > { %590 = vmatpush3.bf16.msra.mxu0 %v633_v3 }
  0x19   : > { %591 = vmatprep.subr.bf16.mxu0 %v663_v0 }
  0x1c   : > { %592 = vmatpush3.bf16.msra.mxu0 %v634_v4 }
  0x1d   : > { %593 = vmatprep.subr.bf16.mxu0 %v663_v0 }
  0x20   : > { %594 = vmatpush3.bf16.msra.mxu0 %v635_v5 }
  0x21   : > { %595 = vmatprep.subr.bf16.mxu0 %v663_v0 }
  0x24   : > { %596 = vmatpush3.bf16.msra.mxu0 %v636_v6 }
  0x25   : > { %597 = vmatprep.subr.bf16.mxu0 %v663_v0 }
  0x28   : > { %598 = vmatpush3.bf16.msra.mxu0 %v637_v7 }
  0x29   : > { %599 = vmatprep.subr.bf16.mxu0 %v663_v0 }
  0x2c   : > { %600 = vmatpush3.bf16.msra.mxu0 %v638_v8 }
  0x2f   : > { %602 = vmatmul.mubr.bf16.vlgmr.msra.gmra.mxu0 %v309_v9 }
  0xef   : > { %v408_v10 = vpop.f32.mrf.mxu0 }
  0xf0   : > { %v427_v13 = vadd.f32 %v572_v11, %v408_v10 }
  0xf1   : > { %v603_v12 = vpop.f32.mrf.mxu0 }
  0xf2   : > { %428 = vst [vmem:[%s301_s30] sm:$0xff] %v427_v13 }
  0xf3   : > { %v411_v14 = vpop.f32.mrf.mxu0 }
  0xf5   : > { %v604_v15 = vpop.f32.mrf.mxu0 }
  0xf6 PF: > { %s13_s14 = sadd.s32 1, %s661_s14   ;;  %s734_s12 = smov %s657_s13 }
  0xf7   : > { %p10_p5 = scmp.ge.s32.totalorder %s13_s14, 5   ;;  %s735_s13 = smov %s737_s15 }
  0xf9   :  { %12 = sbr.rel (!%p10_p5) target bundleno = 2 (0x2), region = 76 }

// kernel: _lambda_.71
= control target key start
LH: loop header
LB: loop body
LE: loop exit
PB: predicated region body
PF: predicated region fallthrough
CT: control target
= control target key end

     0   :  { %s778_s15 = smov 0   ;;  %s780_s16 = smov 0   ;;  %s826_s0 = inlined_call_operand.vmem [shape: bf16[3,8,128], index: 0, kind: input, shape index: {}]   ;;  %s827_s1 = inlined_call_operand.vmem [shape: bf16[3,128,128], index: 1, kind: input, shape index: {}]   ;;  %s828_s2 = inlined_call_operand.vmem [shape: f32[3,1,128], index: 2, kind: input, shape index: {}]   ;;  %s829_s3 = inlined_call_operand.vmem [shape: f32[3,8,128], index: 3, kind: input, shape index: {}]   ;;  %s830_s4 = inlined_call_operand.vmem [shape: f32[3,8,128], index: 4, kind: output, shape index: {}]  }
   0x1   :  { %s782_s17 = smov 0  }
   0x2 LB: > { %s40_s18 = sadd.s32 1, %s745_s16  ;;  %p646_p0 = scmp.ge.s32.totalorder %s749_s17, 1  ;;  %s749_s17 = sphi %s782_s17, %s14_s17   ;;  %s745_s16 = sphi %s780_s16, %s832_s16   ;;  %s741_s15 = sphi %s778_s15, %s831_s15  }
   0x3   : > { %p42_p1 = scmp.ge.s32.totalorder %s40_s18, 3  ;;  %p255_p2 = scmp.lt.s32.totalorder %s749_s17, 4 }
   0x5   : > { %s834_s18 = smov (%p42_p1, %s40_s18), 0  ;;  %p256_p3 = pnand %p646_p0, %p255_p2 }
   0x6   : > { %p319_p4 = scmp.lt.s32.totalorder (!%p256_p3), %s741_s15, 2 }
   0x7   : > { %259 = sbr.rel (%p256_p3) target bundleno = 247 (0xf7), region = 36 }
   0xc   : > { %v751_v0 = vmov 0.0   ;;  %vm752_vm0 = vmmov 0   ;;  %s836_s15 = smov (!%p319_p4, %s741_s15), 2 }
   0xd   : > { %673 = vmatprep.subr.bf16.mxu0 %v751_v0  ;;  %689 = vmatprep.mubr.msk.bf16.mxu0 %vm752_vm0, %v751_v0  ;;  %s663_s19 = sshll.u32 %s836_s15, 6  ;;  %s647_s23 = sshll.u32 %s836_s15, 2 }
   0xe   : > { %s340_s22 = scalar_lea.vmem %s827_s1, %s663_s19  ;;  %s328_s26 = scalar_lea.vmem %s826_s0, %s647_s23 }
   0xf   : > { %v719_v1 = vld [vmem:[%s340_s22 + $0x38] sm:$0xff]   ;;  %v720_v2 = vld [vmem:[%s340_s22 + $0x30] sm:$0xff]   ;;  %v721_v3 = vld [vmem:[%s340_s22 + $0x28] sm:$0xff]   ;;  %s650_s27 = sshll.u32 %s836_s15, 3  ;;  %s347_s30 = scalar_lea.vmem %s828_s2, %s836_s15 }
  0x10   : > { %674 = vmatpush3.bf16.msra.mxu0 %v719_v1  ;;  %v722_v4 = vld [vmem:[%s340_s22 + $0x20] sm:$0xff]   ;;  %v723_v5 = vld [vmem:[%s340_s22 + $0x18] sm:$0xff]   ;;  %v724_v6 = vld [vmem:[%s340_s22 + $0x10] sm:$0xff]   ;;  %s357_s7 = scalar_lea.vmem %s829_s3, %s650_s27  ;;  %s367_s10 = scalar_lea.vmem %s830_s4, %s650_s27 }
  0x11   : > { %675 = vmatprep.subr.bf16.mxu0 %v751_v0  ;;  %v725_v7 = vld [vmem:[%s340_s22 + $0x8] sm:$0xff]   ;;  %v726_v8 = vld [vmem:[%s340_s22] sm:$0xff]  }
  0x12   : > { %v375_v9 = vld [vmem:[%s328_s26] sm:$0xf] }
  0x13   : > { %v660_v11 = vld [vmem:[%s347_s30] ss:$0 sm:$0xff] }
  0x14   : > { %676 = vmatpush3.bf16.msra.mxu0 %v720_v2  ;;  %v494_v12 = vld [vmem:[%s357_s7] sm:$0xff] }
  0x15   : > { %677 = vmatprep.subr.bf16.mxu0 %v751_v0 }
  0x18   : > { %678 = vmatpush3.bf16.msra.mxu0 %v721_v3 }
  0x19   : > { %679 = vmatprep.subr.bf16.mxu0 %v751_v0 }
  0x1c   : > { %680 = vmatpush3.bf16.msra.mxu0 %v722_v4 }
  0x1d   : > { %681 = vmatprep.subr.bf16.mxu0 %v751_v0 }
  0x20   : > { %682 = vmatpush3.bf16.msra.mxu0 %v723_v5 }
  0x21   : > { %683 = vmatprep.subr.bf16.mxu0 %v751_v0 }
  0x24   : > { %684 = vmatpush3.bf16.msra.mxu0 %v724_v6 }
  0x25   : > { %685 = vmatprep.subr.bf16.mxu0 %v751_v0 }
  0x28   : > { %686 = vmatpush3.bf16.msra.mxu0 %v725_v7 }
  0x29   : > { %687 = vmatprep.subr.bf16.mxu0 %v751_v0 }
  0x2c   : > { %688 = vmatpush3.bf16.msra.mxu0 %v726_v8 }
  0x2f   : > { %690 = vmatmul.mubr.bf16.vlgmr.msra.gmra.mxu0 %v375_v9 }
  0xef   : > { %v474_v10 = vpop.f32.mrf.mxu0 }
  0xf0   : > { %v493_v14 = vadd.f32 %v660_v11, %v474_v10 }
  0xf1   : > { %v691_v13 = vpop.f32.mrf.mxu0 }
  0xf2   : > { %v495_v16 = vadd.f32 %v494_v12, %v493_v14 }
  0xf3   : > { %v477_v15 = vpop.f32.mrf.mxu0 }
  0xf4   : > { %v496_v18 = vmax.f32 %v495_v16, 0.0 }
  0xf5   : > { %v692_v17 = vpop.f32.mrf.mxu0 }
  0xf6   : > { %497 = vst [vmem:[%s367_s10] sm:$0xff] %v496_v18 }
  0xf7 PF: > { %s14_s17 = sadd.s32 1, %s749_s17   ;;  %s831_s15 = smov %s745_s16 }
  0xf8   : > { %p11_p5 = scmp.ge.s32.totalorder %s14_s17, 5   ;;  %s832_s16 = smov %s834_s18 }
  0xfa   :  { %13 = sbr.rel (!%p11_p5) target bundleno = 2 (0x2), region = 83 }

// kernel: _lambda_.72
= control target key start
LH: loop header
LB: loop body
LE: loop exit
PB: predicated region body
PF: predicated region fallthrough
CT: control target
= control target key end

     0   :  { %s686_s12 = smov 0   ;;  %s688_s13 = smov 0   ;;  %s731_s0 = inlined_call_operand.vmem [shape: bf16[3,8,128], index: 0, kind: input, shape index: {}]   ;;  %s732_s1 = inlined_call_operand.vmem [shape: bf16[3,128,128], index: 1, kind: input, shape index: {}]   ;;  %s733_s2 = inlined_call_operand.vmem [shape: f32[3,1,128], index: 2, kind: input, shape index: {}]   ;;  %s734_s3 = inlined_call_operand.vmem [shape: f32[3,8,128], index: 3, kind: output, shape index: {}]  }
   0x1   :  { %s690_s14 = smov 0  }
   0x2 LB: > { %s39_s15 = sadd.s32 1, %s658_s13  ;;  %p560_p0 = scmp.ge.s32.totalorder %s662_s14, 1  ;;  %s662_s14 = sphi %s690_s14, %s13_s14   ;;  %s658_s13 = sphi %s688_s13, %s736_s13   ;;  %s654_s12 = sphi %s686_s12, %s735_s12  }
   0x3   : > { %p41_p1 = scmp.ge.s32.totalorder %s39_s15, 3  ;;  %p211_p2 = scmp.lt.s32.totalorder %s662_s14, 4 }
   0x5   : > { %s738_s15 = smov (%p41_p1, %s39_s15), 0  ;;  %p212_p3 = pnand %p560_p0, %p211_p2 }
   0x6   : > { %p263_p4 = scmp.lt.s32.totalorder (!%p212_p3), %s654_s12, 2 }
   0x7   : > { %215 = sbr.rel (%p212_p3) target bundleno = 246 (0xf6), region = 32 }
   0xc   : > { %v664_v0 = vmov 0.0   ;;  %vm665_vm0 = vmmov 0   ;;  %s740_s12 = smov (!%p263_p4, %s654_s12), 2 }
   0xd   : > { %586 = vmatprep.subr.bf16.mxu0 %v664_v0  ;;  %602 = vmatprep.mubr.msk.bf16.mxu0 %vm665_vm0, %v664_v0  ;;  %s576_s16 = sshll.u32 %s740_s12, 6  ;;  %s561_s20 = sshll.u32 %s740_s12, 2 }
   0xe   : > { %s284_s19 = scalar_lea.vmem %s732_s1, %s576_s16  ;;  %s272_s23 = scalar_lea.vmem %s731_s0, %s561_s20 }
   0xf   : > { %v632_v1 = vld [vmem:[%s284_s19 + $0x38] sm:$0xff]   ;;  %v633_v2 = vld [vmem:[%s284_s19 + $0x30] sm:$0xff]   ;;  %v634_v3 = vld [vmem:[%s284_s19 + $0x28] sm:$0xff]   ;;  %s291_s26 = scalar_lea.vmem %s733_s2, %s740_s12  ;;  %s564_s27 = sshll.u32 %s740_s12, 3 }
  0x10   : > { %587 = vmatpush3.bf16.msra.mxu0 %v632_v1  ;;  %v635_v4 = vld [vmem:[%s284_s19 + $0x20] sm:$0xff]   ;;  %v636_v5 = vld [vmem:[%s284_s19 + $0x18] sm:$0xff]   ;;  %v637_v6 = vld [vmem:[%s284_s19 + $0x10] sm:$0xff]   ;;  %s301_s30 = scalar_lea.vmem %s734_s3, %s564_s27 }
  0x11   : > { %588 = vmatprep.subr.bf16.mxu0 %v664_v0  ;;  %v638_v7 = vld [vmem:[%s284_s19 + $0x8] sm:$0xff]   ;;  %v639_v8 = vld [vmem:[%s284_s19] sm:$0xff]  }
  0x12   : > { %v309_v9 = vld [vmem:[%s272_s23] sm:$0xf] }
  0x13   : > { %v573_v11 = vld [vmem:[%s291_s26] ss:$0 sm:$0xff] }
  0x14   : > { %589 = vmatpush3.bf16.msra.mxu0 %v633_v2 }
  0x15   : > { %590 = vmatprep.subr.bf16.mxu0 %v664_v0 }
  0x18   : > { %591 = vmatpush3.bf16.msra.mxu0 %v634_v3 }
  0x19   : > { %592 = vmatprep.subr.bf16.mxu0 %v664_v0 }
  0x1c   : > { %593 = vmatpush3.bf16.msra.mxu0 %v635_v4 }
  0x1d   : > { %594 = vmatprep.subr.bf16.mxu0 %v664_v0 }
  0x20   : > { %595 = vmatpush3.bf16.msra.mxu0 %v636_v5 }
  0x21   : > { %596 = vmatprep.subr.bf16.mxu0 %v664_v0 }
  0x24   : > { %597 = vmatpush3.bf16.msra.mxu0 %v637_v6 }
  0x25   : > { %598 = vmatprep.subr.bf16.mxu0 %v664_v0 }
  0x28   : > { %599 = vmatpush3.bf16.msra.mxu0 %v638_v7 }
  0x29   : > { %600 = vmatprep.subr.bf16.mxu0 %v664_v0 }
  0x2c   : > { %601 = vmatpush3.bf16.msra.mxu0 %v639_v8 }
  0x2f   : > { %603 = vmatmul.mubr.bf16.vlgmr.msra.gmra.mxu0 %v309_v9 }
  0xef   : > { %v408_v10 = vpop.f32.mrf.mxu0 }
  0xf0   : > { %v427_v13 = vadd.f32 %v573_v11, %v408_v10 }
  0xf1   : > { %v604_v12 = vpop.f32.mrf.mxu0 }
  0xf2   : > { %v428_v15 = vmax.f32 %v427_v13, 0.0 }
  0xf3   : > { %v411_v14 = vpop.f32.mrf.mxu0 }
  0xf4   : > { %429 = vst [vmem:[%s301_s30] sm:$0xff] %v428_v15 }
  0xf5   : > { %v605_v16 = vpop.f32.mrf.mxu0 }
  0xf6 PF: > { %s13_s14 = sadd.s32 1, %s662_s14   ;;  %s735_s12 = smov %s658_s13 }
  0xf7   : > { %p10_p5 = scmp.ge.s32.totalorder %s13_s14, 5   ;;  %s736_s13 = smov %s738_s15 }
  0xf9   :  { %12 = sbr.rel (!%p10_p5) target bundleno = 2 (0x2), region = 76 }

// kernel: _lambda_.82
= control target key start
LH: loop header
LB: loop body
LE: loop exit
PB: predicated region body
PF: predicated region fallthrough
CT: control target
= control target key end

     0   :  { %s739_s12 = smov 0   ;;  %s741_s13 = smov 0   ;;  %s824_s0 = inlined_call_operand.vmem [shape: bf16[3,8,384], index: 0, kind: input, shape index: {}]   ;;  %s825_s1 = inlined_call_operand.vmem [shape: bf16[3,384,128], index: 1, kind: input, shape index: {}]   ;;  %s826_s2 = inlined_call_operand.vmem [shape: f32[3,1,128], index: 2, kind: input, shape index: {}]   ;;  %s827_s3 = inlined_call_operand.vmem [shape: f32[3,8,128], index: 3, kind: output, shape index: {}]  }
   0x1   :  { %s743_s14 = smov 0   ;;  %s745_s15 = smov 0  }
   0x2   :  { %s747_s16 = smov 0  }
   0x3 LB: > { %s28_s17 = sadd.s32 1, %s706_s14  ;;  %s39_s18 = sadd.s32 1, %s710_s15  ;;  %s714_s16 = sphi %s747_s16, %s13_s16   ;;  %s710_s15 = sphi %s745_s15, %s831_s15   ;;  %s706_s14 = sphi %s743_s14, %s830_s14   ;;  %s702_s13 = sphi %s741_s13, %s829_s13   ;;  %s698_s12 = sphi %s739_s12, %s828_s12  }
   0x4   : > { %p29_p0 = scmp.ge.s32.totalorder %s28_s17, 3  ;;  %p576_p1 = scmp.ge.s32.totalorder %s714_s16, 1 }
   0x5   : > { %p213_p2 = scmp.lt.s32.totalorder %s714_s16, 10 }
   0x6   : > { %s833_s17 = smov (%p29_p0, %s28_s17), 0  ;;  %s835_s18 = smov (!%p29_p0, %s39_s18), %s710_s15 }
   0x7   : > { %p214_p3 = pnand %p576_p1, %p213_p2  ;;  %p41_p4 = scmp.ge.s32.totalorder %s835_s18, 3 }
   0x8   : > { %p267_p5 = scmp.lt.s32.totalorder (!%p214_p3), %s702_s13, 2  ;;  %p271_p6 = scmp.lt.s32.totalorder (!%p214_p3), %s698_s12, 2 }
   0x9   : > { %s837_s18 = smov (%p41_p4, %s835_s18), 0  ;;  %217 = sbr.rel (%p214_p3) target bundleno = 269 (0x10d), region = 32 }
   0xa   : > { %s578_s19 = sshll.u32 (!%p214_p3), %s698_s12, 4  ;;  %p581_p8 = scmp.ne.s32.totalorder (!%p214_p3), %s698_s12, 0 }
   0xb   : > { %p282_p7 = scmp.lt.s32.totalorder (!%p214_p3), %s578_s19, 47 }
   0xe   : > { %s839_s13 = smov (!%p267_p5, %s702_s13), 2  ;;  %s841_s19 = smov (!%p282_p7, %s578_s19), 47 }
   0xf   : > { %s272_s20 = scalar_select %p271_p6, %s698_s12, 2 }
  0x10   : > { %s623_s21 = smul.u32 3, %s839_s13  ;;  %s297_s25 = scalar_lea.vmem %s826_s2, %s839_s13 }
  0x11   : > { %s624_s22 = smul.u32 48, %s839_s13  ;;  %s580_s27 = sshll.u32 %s839_s13, 3 }
  0x12   : > { %s276_s26 = sadd.s32 %s623_s21, %s272_s20  ;;  %s786_s4 = scalar_lea.vmem %s827_s3, %s580_s27 }
  0x13   : > { %s577_s28 = sshll.u32 %s276_s26, 2  ;;  %s288_s8 = sadd.s32 %s624_s22, %s841_s19 }
  0x14   : > { %s791_s7 = scalar_lea.vmem %s824_s0, %s577_s28  ;;  %s579_s9 = sshll.u32 %s288_s8, 2 }
  0x15   : > { %s290_s23 = scalar_lea.vmem %s825_s1, %s579_s9  ;;  %312 = sbr.rel (%p581_p8) target bundleno = 28 (0x1c), region = 36 }
  0x1a   : > { %v716_v0 = vmov 0.0  }
  0x1b   : > { %313 = vst [vmem:[%s786_s4] sm:$0xff] %v716_v0 }
  0x1c PF: > { %v668_v1 = vld [vmem:[%s290_s23 + $0x38] sm:$0xff]   ;;  %v717_v2 = vmov 0.0   ;;  %v669_v3 = vld [vmem:[%s290_s23 + $0x30] sm:$0xff]   ;;  %vm718_vm0 = vmmov 0   ;;  %v670_v4 = vld [vmem:[%s290_s23 + $0x28] sm:$0xff]   ;;  %p590_p9 = scmp.ne.s32.totalorder %s698_s12, 2 }
  0x1d   : > { %603 = vmatprep.subr.bf16.mxu0 %v717_v2  ;;  %619 = vmatprep.mubr.msk.bf16.mxu0 %vm718_vm0, %v717_v2  ;;  %v671_v5 = vld [vmem:[%s290_s23 + $0x20] sm:$0xff]   ;;  %v672_v6 = vld [vmem:[%s290_s23 + $0x18] sm:$0xff]   ;;  %v673_v7 = vld [vmem:[%s290_s23 + $0x10] sm:$0xff]  }
  0x1e   : > { %604 = vmatpush3.bf16.msra.mxu0 %v668_v1  ;;  %v674_v8 = vld [vmem:[%s290_s23 + $0x8] sm:$0xff]   ;;  %v675_v9 = vld [vmem:[%s290_s23] sm:$0xff]  }
  0x1f   : > { %605 = vmatprep.subr.bf16.mxu0 %v717_v2  ;;  %v315_v10 = vld [vmem:[%s791_s7] sm:$0xf] }
  0x22   : > { %606 = vmatpush3.bf16.msra.mxu0 %v669_v3  ;;  %v314_v11 = vld [vmem:[%s786_s4] sm:$0xff] }
  0x23   : > { %607 = vmatprep.subr.bf16.mxu0 %v717_v2 }
  0x26   : > { %608 = vmatpush3.bf16.msra.mxu0 %v670_v4 }
  0x27   : > { %609 = vmatprep.subr.bf16.mxu0 %v717_v2 }
  0x2a   : > { %610 = vmatpush3.bf16.msra.mxu0 %v671_v5 }
  0x2b   : > { %611 = vmatprep.subr.bf16.mxu0 %v717_v2 }
  0x2e   : > { %612 = vmatpush3.bf16.msra.mxu0 %v672_v6 }
  0x2f   : > { %613 = vmatprep.subr.bf16.mxu0 %v717_v2 }
  0x32   : > { %614 = vmatpush3.bf16.msra.mxu0 %v673_v7 }
  0x33   : > { %615 = vmatprep.subr.bf16.mxu0 %v717_v2 }
  0x36   : > { %616 = vmatpush3.bf16.msra.mxu0 %v674_v8 }
  0x37   : > { %617 = vmatprep.subr.bf16.mxu0 %v717_v2 }
  0x3a   : > { %618 = vmatpush3.bf16.msra.mxu0 %v675_v9 }
  0x3d   : > { %620 = vmatmul.mubr.bf16.vlgmr.msra.gmra.mxu0 %v315_v10 }
  0xfd   : > { %v414_v12 = vpop.f32.mrf.mxu0 }
  0xfe   : > { %v420_v13 = vadd.f32 %v414_v12, %v314_v11 }
  0xff   : > { %v621_v14 = vpop.f32.mrf.mxu0  ;;  %425 = sbr.rel (%p590_p9) target bundleno = 269 (0x10d), region = 40 }
 0x100   : > { %421 = vst [vmem:[%s786_s4] sm:$0xff] %v420_v13 }
 0x101   : > { %v417_v15 = vpop.f32.mrf.mxu0 }
 0x103   : > { %v622_v16 = vpop.f32.mrf.mxu0 }
 0x104   : > { %v591_v18 = vld [vmem:[%s297_s25] ss:$0 sm:$0xff] }
 0x107   : > { %v426_v17 = vld [vmem:[%s786_s4] sm:$0xff] }
 0x108   : > { %v434_v19 = vadd.f32 %v591_v18, %v426_v17 }
 0x10a   : > { %v435_v20 = vmax.f32 %v434_v19, 0.0 }
 0x10c   : > { %436 = vst [vmem:[%s786_s4] sm:$0xff] %v435_v20 }
 0x10d PF: > { %s13_s16 = sadd.s32 1, %s714_s16   ;;  %s828_s12 = smov %s706_s14 }
 0x10e   : > { %p10_p10 = scmp.ge.s32.totalorder %s13_s16, 11   ;;  %s829_s13 = smov %s710_s15 }
 0x10f   : > { %s830_s14 = smov %s833_s17  ;;  %s831_s15 = smov %s837_s18 }
 0x110   :  { %12 = sbr.rel (!%p10_p10) target bundleno = 3 (0x3), region = 76 }

// kernel: _lambda_.101
= control target key start
LH: loop header
LB: loop body
LE: loop exit
PB: predicated region body
PF: predicated region fallthrough
CT: control target
= control target key end

     0   :  { %s739_s12 = smov 0   ;;  %s741_s13 = smov 0   ;;  %s824_s0 = inlined_call_operand.vmem [shape: bf16[3,8,640], index: 0, kind: input, shape index: {}]   ;;  %s825_s1 = inlined_call_operand.vmem [shape: bf16[3,640,128], index: 1, kind: input, shape index: {}]   ;;  %s826_s2 = inlined_call_operand.vmem [shape: f32[3,1,128], index: 2, kind: input, shape index: {}]   ;;  %s827_s3 = inlined_call_operand.vmem [shape: f32[3,8,128], index: 3, kind: output, shape index: {}]  }
   0x1   :  { %s743_s14 = smov 0   ;;  %s745_s15 = smov 0  }
   0x2   :  { %s747_s16 = smov 0  }
   0x3 LB: > { %s28_s17 = sadd.s32 1, %s706_s14  ;;  %s39_s18 = sadd.s32 1, %s710_s15  ;;  %s714_s16 = sphi %s747_s16, %s13_s16   ;;  %s710_s15 = sphi %s745_s15, %s831_s15   ;;  %s706_s14 = sphi %s743_s14, %s830_s14   ;;  %s702_s13 = sphi %s741_s13, %s829_s13   ;;  %s698_s12 = sphi %s739_s12, %s828_s12  }
   0x4   : > { %p29_p0 = scmp.ge.s32.totalorder %s28_s17, 5  ;;  %p576_p1 = scmp.ge.s32.totalorder %s714_s16, 1 }
   0x5   : > { %p213_p2 = scmp.lt.s32.totalorder %s714_s16, 16 }
   0x6   : > { %s833_s17 = smov (%p29_p0, %s28_s17), 0  ;;  %s835_s18 = smov (!%p29_p0, %s39_s18), %s710_s15 }
   0x7   : > { %p214_p3 = pnand %p576_p1, %p213_p2  ;;  %p41_p4 = scmp.ge.s32.totalorder %s835_s18, 3 }
   0x8   : > { %p267_p5 = scmp.lt.s32.totalorder (!%p214_p3), %s702_s13, 2  ;;  %p271_p6 = scmp.lt.s32.totalorder (!%p214_p3), %s698_s12, 4 }
   0x9   : > { %s837_s18 = smov (%p41_p4, %s835_s18), 0  ;;  %217 = sbr.rel (%p214_p3) target bundleno = 269 (0x10d), region = 32 }
   0xa   : > { %s578_s19 = sshll.u32 (!%p214_p3), %s698_s12, 4  ;;  %p581_p8 = scmp.ne.s32.totalorder (!%p214_p3), %s698_s12, 0 }
   0xb   : > { %p282_p7 = scmp.lt.s32.totalorder (!%p214_p3), %s578_s19, 79 }
   0xe   : > { %s839_s13 = smov (!%p267_p5, %s702_s13), 2  ;;  %s841_s19 = smov (!%p282_p7, %s578_s19), 79 }
   0xf   : > { %s272_s20 = scalar_select %p271_p6, %s698_s12, 4 }
  0x10   : > { %s623_s21 = smul.u32 5, %s839_s13  ;;  %s297_s25 = scalar_lea.vmem %s826_s2, %s839_s13 }
  0x11   : > { %s624_s22 = smul.u32 80, %s839_s13  ;;  %s580_s27 = sshll.u32 %s839_s13, 3 }
  0x12   : > { %s276_s26 = sadd.s32 %s623_s21, %s272_s20  ;;  %s786_s4 = scalar_lea.vmem %s827_s3, %s580_s27 }
  0x13   : > { %s577_s28 = sshll.u32 %s276_s26, 2  ;;  %s288_s8 = sadd.s32 %s624_s22, %s841_s19 }
  0x14   : > { %s791_s7 = scalar_lea.vmem %s824_s0, %s577_s28  ;;  %s579_s9 = sshll.u32 %s288_s8, 2 }
  0x15   : > { %s290_s23 = scalar_lea.vmem %s825_s1, %s579_s9  ;;  %312 = sbr.rel (%p581_p8) target bundleno = 28 (0x1c), region = 36 }
  0x1a   : > { %v716_v0 = vmov 0.0  }
  0x1b   : > { %313 = vst [vmem:[%s786_s4] sm:$0xff] %v716_v0 }
  0x1c PF: > { %v668_v1 = vld [vmem:[%s290_s23 + $0x38] sm:$0xff]   ;;  %v717_v2 = vmov 0.0   ;;  %v669_v3 = vld [vmem:[%s290_s23 + $0x30] sm:$0xff]   ;;  %vm718_vm0 = vmmov 0   ;;  %v670_v4 = vld [vmem:[%s290_s23 + $0x28] sm:$0xff]   ;;  %p590_p9 = scmp.ne.s32.totalorder %s698_s12, 4 }
  0x1d   : > { %603 = vmatprep.subr.bf16.mxu0 %v717_v2  ;;  %619 = vmatprep.mubr.msk.bf16.mxu0 %vm718_vm0, %v717_v2  ;;  %v671_v5 = vld [vmem:[%s290_s23 + $0x20] sm:$0xff]   ;;  %v672_v6 = vld [vmem:[%s290_s23 + $0x18] sm:$0xff]   ;;  %v673_v7 = vld [vmem:[%s290_s23 + $0x10] sm:$0xff]  }
  0x1e   : > { %604 = vmatpush3.bf16.msra.mxu0 %v668_v1  ;;  %v674_v8 = vld [vmem:[%s290_s23 + $0x8] sm:$0xff]   ;;  %v675_v9 = vld [vmem:[%s290_s23] sm:$0xff]  }
  0x1f   : > { %605 = vmatprep.subr.bf16.mxu0 %v717_v2  ;;  %v315_v10 = vld [vmem:[%s791_s7] sm:$0xf] }
  0x22   : > { %606 = vmatpush3.bf16.msra.mxu0 %v669_v3  ;;  %v314_v11 = vld [vmem:[%s786_s4] sm:$0xff] }
  0x23   : > { %607 = vmatprep.subr.bf16.mxu0 %v717_v2 }
  0x26   : > { %608 = vmatpush3.bf16.msra.mxu0 %v670_v4 }
  0x27   : > { %609 = vmatprep.subr.bf16.mxu0 %v717_v2 }
  0x2a   : > { %610 = vmatpush3.bf16.msra.mxu0 %v671_v5 }
  0x2b   : > { %611 = vmatprep.subr.bf16.mxu0 %v717_v2 }
  0x2e   : > { %612 = vmatpush3.bf16.msra.mxu0 %v672_v6 }
  0x2f   : > { %613 = vmatprep.subr.bf16.mxu0 %v717_v2 }
  0x32   : > { %614 = vmatpush3.bf16.msra.mxu0 %v673_v7 }
  0x33   : > { %615 = vmatprep.subr.bf16.mxu0 %v717_v2 }
  0x36   : > { %616 = vmatpush3.bf16.msra.mxu0 %v674_v8 }
  0x37   : > { %617 = vmatprep.subr.bf16.mxu0 %v717_v2 }
  0x3a   : > { %618 = vmatpush3.bf16.msra.mxu0 %v675_v9 }
  0x3d   : > { %620 = vmatmul.mubr.bf16.vlgmr.msra.gmra.mxu0 %v315_v10 }
  0xfd   : > { %v414_v12 = vpop.f32.mrf.mxu0 }
  0xfe   : > { %v420_v13 = vadd.f32 %v414_v12, %v314_v11 }
  0xff   : > { %v621_v14 = vpop.f32.mrf.mxu0  ;;  %425 = sbr.rel (%p590_p9) target bundleno = 269 (0x10d), region = 40 }
 0x100   : > { %421 = vst [vmem:[%s786_s4] sm:$0xff] %v420_v13 }
 0x101   : > { %v417_v15 = vpop.f32.mrf.mxu0 }
 0x103   : > { %v622_v16 = vpop.f32.mrf.mxu0 }
 0x104   : > { %v591_v18 = vld [vmem:[%s297_s25] ss:$0 sm:$0xff] }
 0x107   : > { %v426_v17 = vld [vmem:[%s786_s4] sm:$0xff] }
 0x108   : > { %v434_v19 = vadd.f32 %v591_v18, %v426_v17 }
 0x10a   : > { %v435_v20 = vmax.f32 %v434_v19, 0.0 }
 0x10c   : > { %436 = vst [vmem:[%s786_s4] sm:$0xff] %v435_v20 }
 0x10d PF: > { %s13_s16 = sadd.s32 1, %s714_s16   ;;  %s828_s12 = smov %s706_s14 }
 0x10e   : > { %p10_p10 = scmp.ge.s32.totalorder %s13_s16, 17   ;;  %s829_s13 = smov %s710_s15 }
 0x10f   : > { %s830_s14 = smov %s833_s17  ;;  %s831_s15 = smov %s837_s18 }
 0x110   :  { %12 = sbr.rel (!%p10_p10) target bundleno = 3 (0x3), region = 76 }

// kernel: _lambda_.102
= control target key start
LH: loop header
LB: loop body
LE: loop exit
PB: predicated region body
PF: predicated region fallthrough
CT: control target
= control target key end

     0   :  { %s771_s12 = smov 0   ;;  %s773_s13 = smov 0   ;;  %s834_s0 = inlined_call_operand.vmem [shape: bf16[3,8,128], index: 0, kind: input, shape index: {}]   ;;  %s835_s1 = inlined_call_operand.vmem [shape: bf16[3,128,256], index: 1, kind: input, shape index: {}]   ;;  %s836_s2 = inlined_call_operand.vmem [shape: f32[3,1,256], index: 2, kind: input, shape index: {}]   ;;  %s837_s3 = inlined_call_operand.vmem [shape: f32[3,8,256], index: 3, kind: output, shape index: {}]  }
   0x1   :  { %s775_s14 = smov 0  }
   0x2 LB: > { %s39_s15 = sadd.s32 1, %s744_s13  ;;  %p649_p0 = scmp.ge.s32.totalorder %s748_s14, 1  ;;  %s748_s14 = sphi %s775_s14, %s13_s14   ;;  %s744_s13 = sphi %s773_s13, %s839_s13   ;;  %s740_s12 = sphi %s771_s12, %s838_s12  }
   0x3   : > { %p41_p1 = scmp.ge.s32.totalorder %s39_s15, 3  ;;  %p217_p2 = scmp.lt.s32.totalorder %s748_s14, 4 }
   0x5   : > { %s841_s15 = smov (%p41_p1, %s39_s15), 0  ;;  %p218_p3 = pnand %p649_p0, %p217_p2 }
   0x6   : > { %p276_p4 = scmp.lt.s32.totalorder (!%p218_p3), %s740_s12, 2 }
   0x7   : > { %221 = sbr.rel (%p218_p3) target bundleno = 247 (0xf7), region = 32 }
   0xc   : > { %v750_v0 = vmov 0   ;;  %s843_s12 = smov (!%p276_p4, %s740_s12), 2  ;;  %v483_v18 = vlaneseq }
   0xd   : > { %463 = vmatprep.mubr.bf16.mxu0 %v750_v0  ;;  %s674_s16 = sshll.u32 %s843_s12, 7  ;;  %s650_s20 = sshll.u32 %s843_s12, 2 }
   0xe   : > { %s795_s19 = scalar_lea.vmem %s835_s1, %s674_s16  ;;  %s285_s23 = scalar_lea.vmem %s834_s0, %s650_s20  ;;  %v484_v19 = vshrl.u32 %v483_v18, 7 }
   0xf   : > { %v702_v1 = vld [vmem:[%s795_s19 + $0x74] ss:$8 sps:$4 sm:$0xff]   ;;  %v704_v2 = vld [vmem:[%s795_s19 + $0x70] ss:$8 sps:$4 sm:$0xff]   ;;  %v705_v3 = vld [vmem:[%s795_s19 + $0x64] ss:$8 sps:$4 sm:$0xff]  }
  0x10   : > { %431 = vmatprep.subr.bf16.mxu0 %v702_v1  ;;  %v707_v4 = vld [vmem:[%s795_s19 + $0x60] ss:$8 sps:$4 sm:$0xff]   ;;  %v708_v5 = vld [vmem:[%s795_s19 + $0x54] ss:$8 sps:$4 sm:$0xff]   ;;  %v710_v6 = vld [vmem:[%s795_s19 + $0x50] ss:$8 sps:$4 sm:$0xff]  }
  0x11   : > { %432 = vmatpush1.bf16.msra.mxu0 %v704_v2  ;;  %v711_v7 = vld [vmem:[%s795_s19 + $0x44] ss:$8 sps:$4 sm:$0xff]   ;;  %v713_v8 = vld [vmem:[%s795_s19 + $0x40] ss:$8 sps:$4 sm:$0xff]   ;;  %v714_v9 = vld [vmem:[%s795_s19 + $0x34] ss:$8 sps:$4 sm:$0xff]  }
  0x12   : > { %433 = vmatprep.subr.bf16.mxu0 %v705_v3  ;;  %v716_v10 = vld [vmem:[%s795_s19 + $0x30] ss:$8 sps:$4 sm:$0xff]   ;;  %v717_v11 = vld [vmem:[%s795_s19 + $0x24] ss:$8 sps:$4 sm:$0xff]   ;;  %v719_v12 = vld [vmem:[%s795_s19 + $0x20] ss:$8 sps:$4 sm:$0xff]  }
  0x13   : > { %v720_v13 = vld [vmem:[%s795_s19 + $0x14] ss:$8 sps:$4 sm:$0xff]   ;;  %v722_v14 = vld [vmem:[%s795_s19 + $0x10] ss:$8 sps:$4 sm:$0xff]   ;;  %v723_v15 = vld [vmem:[%s795_s19 + $0x4] ss:$8 sps:$4 sm:$0xff]  }
  0x14   : > { %v725_v16 = vld [vmem:[%s795_s19] ss:$8 sps:$4 sm:$0xff]   ;;  %s653_s24 = sshll.u32 %s843_s12, 1  ;;  %v485_v20 = vsub.s32 0, %v484_v19  ;;  %v489_v22 = vsub.s32 1, %v484_v19  ;;  %s675_s28 = sshll.u32 %s843_s12, 4 }
  0x15   : > { %434 = vmatpush1.bf16.msra.mxu0 %v707_v4  ;;  %v334_v17 = vld [vmem:[%s285_s23] sm:$0xf]  ;;  %s309_s27 = scalar_lea.vmem %s836_s2, %s653_s24  ;;  %s323_s4 = scalar_lea.vmem %s837_s3, %s675_s28 }
  0x16   : > { %435 = vmatprep.subr.bf16.mxu0 %v708_v5  ;;  %v481_v21 = vld [vmem:[%s309_s27] sm:$0x3] }
  0x17   : > { %v486_v23 = vrot.slane %v481_v21, %v485_v20  ;;  %v490_v25 = vrot.slane %v481_v21, %v489_v22 }
  0x19   : > { %436 = vmatpush1.bf16.msra.mxu0 %v710_v6 }
  0x1a   : > { %437 = vmatprep.subr.bf16.mxu0 %v711_v7 }
  0x1d   : > { %438 = vmatpush1.bf16.msra.mxu0 %v713_v8 }
  0x1e   : > { %439 = vmatprep.subr.bf16.mxu0 %v714_v9 }
  0x21   : > { %440 = vmatpush1.bf16.msra.mxu0 %v716_v10 }
  0x22   : > { %441 = vmatprep.subr.bf16.mxu0 %v717_v11 }
  0x25   : > { %442 = vmatpush1.bf16.msra.mxu0 %v719_v12 }
  0x26   : > { %443 = vmatprep.subr.bf16.mxu0 %v720_v13 }
  0x29   : > { %444 = vmatpush1.bf16.msra.mxu0 %v722_v14 }
  0x2a   : > { %445 = vmatprep.subr.bf16.mxu0 %v723_v15 }
  0x2d   : > { %446 = vmatpush1.bf16.msra.mxu0 %v725_v16 }
  0x30   : > { %464 = vmatmul.mubr.bf16.vlgmr.msra.gmra.mxu0 %v334_v17 }
  0xf0   : > { %v465_v24 = vpop.f32.mrf.mxu0 }
  0xf1   : > { %v493_v27 = vadd.f32 %v486_v23, %v465_v24 }
  0xf2   : > { %v467_v26 = vpop.f32.mrf.mxu0 }
  0xf3   : > { %495 = vst [vmem:[%s323_s4] sm:$0xff] %v493_v27  ;;  %v494_v29 = vadd.f32 %v490_v25, %v467_v26 }
  0xf4   : > { %v469_v28 = vpop.f32.mrf.mxu0 }
  0xf5   : > { %496 = vst [vmem:[%s323_s4 + $0x8] sm:$0xff] %v494_v29 }
  0xf6   : > { %v470_v30 = vpop.f32.mrf.mxu0 }
  0xf7 PF: > { %s13_s14 = sadd.s32 1, %s748_s14   ;;  %s838_s12 = smov %s744_s13 }
  0xf8   : > { %p10_p5 = scmp.ge.s32.totalorder %s13_s14, 5   ;;  %s839_s13 = smov %s841_s15 }
  0xfa   :  { %12 = sbr.rel (!%p10_p5) target bundleno = 2 (0x2), region = 76 }

// kernel: _lambda_.103
= control target key start
LH: loop header
LB: loop body
LE: loop exit
PB: predicated region body
PF: predicated region fallthrough
CT: control target
= control target key end

     0   :  { %s886_s15 = smov 0   ;;  %s888_s16 = smov 0   ;;  %s952_s0 = inlined_call_operand.vmem [shape: bf16[3,8,128], index: 0, kind: input, shape index: {}]   ;;  %s953_s1 = inlined_call_operand.vmem [shape: bf16[3,128,256], index: 1, kind: input, shape index: {}]   ;;  %s954_s2 = inlined_call_operand.vmem [shape: f32[3,1,256], index: 2, kind: input, shape index: {}]   ;;  %s955_s3 = inlined_call_operand.vmem [shape: f32[3,8,256], index: 3, kind: input, shape index: {}]   ;;  %s956_s4 = inlined_call_operand.vmem [shape: f32[3,8,256], index: 4, kind: output, shape index: {}]  }
   0x1   :  { %s890_s17 = smov 0  }
   0x2 LB: > { %s40_s18 = sadd.s32 1, %s854_s16  ;;  %p756_p0 = scmp.ge.s32.totalorder %s858_s17, 1  ;;  %s858_s17 = sphi %s890_s17, %s14_s17   ;;  %s854_s16 = sphi %s888_s16, %s958_s16   ;;  %s850_s15 = sphi %s886_s15, %s957_s15  }
   0x3   : > { %p42_p1 = scmp.ge.s32.totalorder %s40_s18, 3  ;;  %p265_p2 = scmp.lt.s32.totalorder %s858_s17, 4 }
   0x5   : > { %s960_s18 = smov (%p42_p1, %s40_s18), 0  ;;  %p266_p3 = pnand %p756_p0, %p265_p2 }
   0x6   : > { %p339_p4 = scmp.lt.s32.totalorder (!%p266_p3), %s850_s15, 2 }
   0x7   : > { %269 = sbr.rel (%p266_p3) target bundleno = 250 (0xfa), region = 36 }
   0xc   : > { %v860_v0 = vmov 0   ;;  %s962_s15 = smov (!%p339_p4, %s850_s15), 2  ;;  %v560_v18 = vlaneseq }
   0xd   : > { %540 = vmatprep.mubr.bf16.mxu0 %v860_v0  ;;  %s783_s19 = sshll.u32 %s962_s15, 7  ;;  %s757_s23 = sshll.u32 %s962_s15, 2 }
   0xe   : > { %s910_s22 = scalar_lea.vmem %s953_s1, %s783_s19  ;;  %s348_s26 = scalar_lea.vmem %s952_s0, %s757_s23  ;;  %v561_v19 = vshrl.u32 %v560_v18, 7 }
   0xf   : > { %v812_v1 = vld [vmem:[%s910_s22 + $0x74] ss:$8 sps:$4 sm:$0xff]   ;;  %v814_v2 = vld [vmem:[%s910_s22 + $0x70] ss:$8 sps:$4 sm:$0xff]   ;;  %v815_v3 = vld [vmem:[%s910_s22 + $0x64] ss:$8 sps:$4 sm:$0xff]  }
  0x10   : > { %508 = vmatprep.subr.bf16.mxu0 %v812_v1  ;;  %v817_v4 = vld [vmem:[%s910_s22 + $0x60] ss:$8 sps:$4 sm:$0xff]   ;;  %v818_v5 = vld [vmem:[%s910_s22 + $0x54] ss:$8 sps:$4 sm:$0xff]   ;;  %v820_v6 = vld [vmem:[%s910_s22 + $0x50] ss:$8 sps:$4 sm:$0xff]  }
  0x11   : > { %509 = vmatpush1.bf16.msra.mxu0 %v814_v2  ;;  %v821_v7 = vld [vmem:[%s910_s22 + $0x44] ss:$8 sps:$4 sm:$0xff]   ;;  %v823_v8 = vld [vmem:[%s910_s22 + $0x40] ss:$8 sps:$4 sm:$0xff]   ;;  %v824_v9 = vld [vmem:[%s910_s22 + $0x34] ss:$8 sps:$4 sm:$0xff]  }
  0x12   : > { %510 = vmatprep.subr.bf16.mxu0 %v815_v3  ;;  %v826_v10 = vld [vmem:[%s910_s22 + $0x30] ss:$8 sps:$4 sm:$0xff]   ;;  %v827_v11 = vld [vmem:[%s910_s22 + $0x24] ss:$8 sps:$4 sm:$0xff]   ;;  %v829_v12 = vld [vmem:[%s910_s22 + $0x20] ss:$8 sps:$4 sm:$0xff]  }
  0x13   : > { %v830_v13 = vld [vmem:[%s910_s22 + $0x14] ss:$8 sps:$4 sm:$0xff]   ;;  %v832_v14 = vld [vmem:[%s910_s22 + $0x10] ss:$8 sps:$4 sm:$0xff]   ;;  %v833_v15 = vld [vmem:[%s910_s22 + $0x4] ss:$8 sps:$4 sm:$0xff]  }
  0x14   : > { %v835_v16 = vld [vmem:[%s910_s22] ss:$8 sps:$4 sm:$0xff]   ;;  %s760_s27 = sshll.u32 %s962_s15, 1  ;;  %v562_v20 = vsub.s32 0, %v561_v19  ;;  %s784_s5 = sshll.u32 %s962_s15, 4  ;;  %v566_v22 = vsub.s32 1, %v561_v19 }
  0x15   : > { %511 = vmatpush1.bf16.msra.mxu0 %v817_v4  ;;  %v411_v17 = vld [vmem:[%s348_s26] sm:$0xf]  ;;  %s372_s30 = scalar_lea.vmem %s954_s2, %s760_s27  ;;  %s386_s8 = scalar_lea.vmem %s955_s3, %s784_s5 }
  0x16   : > { %512 = vmatprep.subr.bf16.mxu0 %v818_v5  ;;  %v558_v21 = vld [vmem:[%s372_s30] sm:$0x3]  ;;  %v573_v29 = vld [vmem:[%s386_s8 + $0x8] sm:$0xff]  ;;  %s400_s11 = scalar_lea.vmem %s956_s4, %s784_s5 }
  0x17   : > { %v563_v23 = vrot.slane %v558_v21, %v562_v20  ;;  %v567_v25 = vrot.slane %v558_v21, %v566_v22  ;;  %v572_v26 = vld [vmem:[%s386_s8] sm:$0xff] }
  0x19   : > { %513 = vmatpush1.bf16.msra.mxu0 %v820_v6 }
  0x1a   : > { %514 = vmatprep.subr.bf16.mxu0 %v821_v7 }
  0x1d   : > { %515 = vmatpush1.bf16.msra.mxu0 %v823_v8 }
  0x1e   : > { %516 = vmatprep.subr.bf16.mxu0 %v824_v9 }
  0x21   : > { %517 = vmatpush1.bf16.msra.mxu0 %v826_v10 }
  0x22   : > { %518 = vmatprep.subr.bf16.mxu0 %v827_v11 }
  0x25   : > { %519 = vmatpush1.bf16.msra.mxu0 %v829_v12 }
  0x26   : > { %520 = vmatprep.subr.bf16.mxu0 %v830_v13 }
  0x29   : > { %521 = vmatpush1.bf16.msra.mxu0 %v832_v14 }
  0x2a   : > { %522 = vmatprep.subr.bf16.mxu0 %v833_v15 }
  0x2d   : > { %523 = vmatpush1.bf16.msra.mxu0 %v835_v16 }
  0x30   : > { %541 = vmatmul.mubr.bf16.vlgmr.msra.gmra.mxu0 %v411_v17 }
  0xf0   : > { %v542_v24 = vpop.f32.mrf.mxu0 }
  0xf1   : > { %v570_v28 = vadd.f32 %v563_v23, %v542_v24 }
  0xf2   : > { %v544_v27 = vpop.f32.mrf.mxu0 }
  0xf3   : > { %v574_v31 = vadd.f32 %v572_v26, %v570_v28  ;;  %v571_v32 = vadd.f32 %v567_v25, %v544_v27 }
  0xf4   : > { %v546_v30 = vpop.f32.mrf.mxu0 }
  0xf5   : > { %v576_v34 = vmax.f32 %v574_v31, 0.0  ;;  %v575_v35 = vadd.f32 %v573_v29, %v571_v32 }
  0xf6   : > { %v547_v33 = vpop.f32.mrf.mxu0 }
  0xf7   : > { %578 = vst [vmem:[%s400_s11] sm:$0xff] %v576_v34  ;;  %v577_v36 = vmax.f32 %v575_v35, 0.0 }
  0xf9   : > { %579 = vst [vmem:[%s400_s11 + $0x8] sm:$0xff] %v577_v36 }
  0xfa PF: > { %s14_s17 = sadd.s32 1, %s858_s17   ;;  %s957_s15 = smov %s854_s16 }
  0xfb   : > { %p11_p5 = scmp.ge.s32.totalorder %s14_s17, 5   ;;  %s958_s16 = smov %s960_s18 }
  0xfd   :  { %13 = sbr.rel (!%p11_p5) target bundleno = 2 (0x2), region = 83 }

// kernel: _lambda_.110
= control target key start
LH: loop header
LB: loop body
LE: loop exit
PB: predicated region body
PF: predicated region fallthrough
CT: control target
= control target key end

     0   :  { %v145_v0 = vmov 0.0   ;;  %vm112_vm0 = vcmask 1041409   ;;  %vm114_vm1 = vcmask 1042434   ;;  %vm116_vm2 = vcmask 1043459   ;;  %s232_s1 = inlined_call_operand.vmem [shape: f32[6,256], index: 1, kind: output, shape index: {}]   ;;  %s233_s0 = inlined_call_operand.vmem [shape: f32[6,8,256], index: 0, kind: input, shape index: {}]  }
   0x1   :  { %12 = vst [vmem:[%s232_s1] sm:$0x3f] %v145_v0  ;;  %13 = vst [vmem:[%s232_s1 + $0x8] sm:$0x3f] %v145_v0  ;;  %v16_v1 = vld [vmem:[%s233_s0] sm:$0xff]  ;;  %v18_v2 = vld [vmem:[%s233_s0 + $0x10] sm:$0xff]  ;;  %vm118_vm3 = vcmask 1044484  }
   0x2   :  { %v20_v3 = vld [vmem:[%s233_s0 + $0x20] sm:$0xff]  ;;  %v22_v4 = vld [vmem:[%s233_s0 + $0x30] sm:$0xff]  ;;  %v28_v7 = vrot.slane %v16_v1, 4  ;;  %v40_v8 = vrot.slane %v18_v2, 4  ;;  %v17_v13 = vld [vmem:[%s233_s0 + $0x8] sm:$0xff]  ;;  %vm120_vm4 = vcmask 1045509  }
   0x3   :  { %v24_v5 = vld [vmem:[%s233_s0 + $0x40] sm:$0xff]  ;;  %v26_v6 = vld [vmem:[%s233_s0 + $0x50] sm:$0xff]  ;;  %v52_v9 = vrot.slane %v20_v3, 4  ;;  %v64_v10 = vrot.slane %v22_v4, 4  ;;  %v19_v14 = vld [vmem:[%s233_s0 + $0x18] sm:$0xff]  ;;  %v34_v18 = vrot.slane %v17_v13, 4 }
   0x4   :  { %v76_v11 = vrot.slane %v24_v5, 4  ;;  %v88_v12 = vrot.slane %v26_v6, 4  ;;  %v29_v15 = vadd.f32 %v28_v7, %v16_v1  ;;  %v41_v16 = vadd.f32 %v40_v8, %v18_v2  ;;  %v21_v46 = vld [vmem:[%s233_s0 + $0x28] sm:$0xff]  ;;  %v23_v47 = vld [vmem:[%s233_s0 + $0x38] sm:$0xff] }
   0x5   :  { %v53_v17 = vadd.f32 %v52_v9, %v20_v3  ;;  %v65_v19 = vadd.f32 %v64_v10, %v22_v4  ;;  %v46_v22 = vrot.slane %v19_v14, 4  ;;  %v35_v26 = vadd.f32 %v34_v18, %v17_v13  ;;  %v25_v52 = vld [vmem:[%s233_s0 + $0x48] sm:$0xff]  ;;  %v27_v53 = vld [vmem:[%s233_s0 + $0x58] sm:$0xff] }
   0x6   :  { %v77_v20 = vadd.f32 %v76_v11, %v24_v5  ;;  %v89_v21 = vadd.f32 %v88_v12, %v26_v6  ;;  %v30_v23 = vrot.slane %v29_v15, 2  ;;  %v42_v24 = vrot.slane %v41_v16, 2 }
   0x7   :  { %v54_v25 = vrot.slane %v53_v17, 2  ;;  %v66_v27 = vrot.slane %v65_v19, 2  ;;  %v47_v30 = vadd.f32 %v46_v22, %v19_v14  ;;  %v36_v34 = vrot.slane %v35_v26, 2 }
   0x8   :  { %v78_v28 = vrot.slane %v77_v20, 2  ;;  %v90_v29 = vrot.slane %v89_v21, 2  ;;  %v31_v31 = vadd.f32 %v30_v23, %v29_v15  ;;  %v43_v32 = vadd.f32 %v42_v24, %v41_v16  ;;  %v14_v1 = vld [vmem:[%s232_s1] sm:$0x3f] }
   0x9   :  { %v55_v33 = vadd.f32 %v54_v25, %v53_v17  ;;  %v67_v35 = vadd.f32 %v66_v27, %v65_v19  ;;  %v48_v38 = vrot.slane %v47_v30, 2  ;;  %v37_v42 = vadd.f32 %v36_v34, %v35_v26 }
   0xa   :  { %v79_v36 = vadd.f32 %v78_v28, %v77_v20  ;;  %v91_v37 = vadd.f32 %v90_v29, %v89_v21  ;;  %v32_v39 = vrot.slane %v31_v31, 1  ;;  %v44_v40 = vrot.slane %v43_v32, 1 }
   0xb   :  { %v56_v41 = vrot.slane %v55_v33, 1  ;;  %v68_v43 = vrot.slane %v67_v35, 1  ;;  %v49_v48 = vadd.f32 %v48_v38, %v47_v30  ;;  %v38_v56 = vrot.slane %v37_v42, 1  ;;  %v15_v30 = vld [vmem:[%s232_s1 + $0x8] sm:$0x3f] }
   0xc   :  { %v80_v44 = vrot.slane %v79_v36, 1  ;;  %v92_v45 = vrot.slane %v91_v37, 1  ;;  %v33_v49 = vadd.f32 %v32_v39, %v31_v31  ;;  %v45_v50 = vadd.f32 %v44_v40, %v43_v32 }
   0xd   :  { %v57_v51 = vadd.f32 %v56_v41, %v55_v33  ;;  %v69_v54 = vadd.f32 %v68_v43, %v67_v35  ;;  %v58_v59 = vrot.slane %v21_v46, 4  ;;  %v70_v60 = vrot.slane %v23_v47, 4 }
   0xe   :  { %v81_v55 = vadd.f32 %v80_v44, %v79_v36  ;;  %v93_v57 = vadd.f32 %v92_v45, %v91_v37  ;;  %v113_v58 = vsel %vm112_vm0, %v45_v50, %v33_v49  ;;  %v50_v62 = vrot.slane %v49_v48, 1 }
   0xf   :  { %v115_v61 = vsel %vm114_vm1, %v57_v51, %v113_v58  ;;  %v82_v63 = vrot.slane %v25_v52, 4  ;;  %v94_v0 = vrot.slane %v27_v53, 4  ;;  %v59_v3 = vadd.f32 %v58_v59, %v21_v46 }
  0x10   :  { %v117_v2 = vsel %vm116_vm2, %v69_v54, %v115_v61  ;;  %v71_v4 = vadd.f32 %v70_v60, %v23_v47  ;;  %v39_v9 = vadd.f32 %v38_v56, %v37_v42  ;;  %v51_v13 = vadd.f32 %v50_v62, %v49_v48 }
  0x11   :  { %v119_v5 = vsel %vm118_vm3, %v81_v55, %v117_v2  ;;  %v83_v6 = vadd.f32 %v82_v63, %v25_v52  ;;  %v95_v7 = vadd.f32 %v94_v0, %v27_v53  ;;  %v60_v10 = vrot.slane %v59_v3, 2 }
  0x12   :  { %v121_v8 = vsel %vm120_vm4, %v93_v57, %v119_v5  ;;  %v72_v11 = vrot.slane %v71_v4, 2  ;;  %v122_v24 = vsel %vm112_vm0, %v51_v13, %v39_v9 }
  0x13   :  { %v129_v12 = vadd.f32 %v121_v8, %v14_v1  ;;  %v84_v14 = vrot.slane %v83_v6, 2  ;;  %v96_v15 = vrot.slane %v95_v7, 2  ;;  %v61_v16 = vadd.f32 %v60_v10, %v59_v3 }
  0x14   :  { %v73_v17 = vadd.f32 %v72_v11, %v71_v4 }
  0x15   :  { %131 = vst [vmem:[%s232_s1] sm:$0x3f] %v129_v12  ;;  %v85_v18 = vadd.f32 %v84_v14, %v83_v6  ;;  %v97_v19 = vadd.f32 %v96_v15, %v95_v7  ;;  %v62_v20 = vrot.slane %v61_v16, 1 }
  0x16   :  { %v74_v21 = vrot.slane %v73_v17, 1 }
  0x17   :  { %v86_v22 = vrot.slane %v85_v18, 1  ;;  %v98_v23 = vrot.slane %v97_v19, 1  ;;  %v63_v25 = vadd.f32 %v62_v20, %v61_v16 }
  0x18   :  { %v75_v26 = vadd.f32 %v74_v21, %v73_v17 }
  0x19   :  { %v87_v27 = vadd.f32 %v86_v22, %v85_v18  ;;  %v99_v28 = vadd.f32 %v98_v23, %v97_v19  ;;  %v123_v29 = vsel %vm114_vm1, %v63_v25, %v122_v24 }
  0x1a   :  { %v124_v31 = vsel %vm116_vm2, %v75_v26, %v123_v29 }
  0x1b   :  { %v125_v32 = vsel %vm118_vm3, %v87_v27, %v124_v31 }
  0x1c   :  { %v136_v33 = vld [vmem:[%s232_s1] sm:$0x3f]  ;;  %v126_v34 = vsel %vm120_vm4, %v99_v28, %v125_v32 }
  0x1d   :  { %138 = vst [vmem:[%s232_s1] sm:$0x3f] %v136_v33  ;;  %v130_v35 = vadd.f32 %v126_v34, %v15_v30 }
  0x1f   :  { %132 = vst [vmem:[%s232_s1 + $0x8] sm:$0x3f] %v130_v35 }
  0x26   :  { %v137_v36 = vld [vmem:[%s232_s1 + $0x8] sm:$0x3f] }
  0x27   :  { %139 = vst [vmem:[%s232_s1 + $0x8] sm:$0x3f] %v137_v36 }

// kernel: _lambda_.111
= control target key start
LH: loop header
LB: loop body
LE: loop exit
PB: predicated region body
PF: predicated region fallthrough
CT: control target
= control target key end

     0   :  { %s788_s12 = smov 0   ;;  %s790_s13 = smov 0   ;;  %s863_s0 = inlined_call_operand.vmem [shape: bf16[1,8,768], index: 0, kind: input, shape index: {}]   ;;  %s864_s1 = inlined_call_operand.vmem [shape: bf16[1,768,128], index: 1, kind: input, shape index: {}]   ;;  %s865_s2 = inlined_call_operand.vmem [shape: f32[1,1,128], index: 2, kind: input, shape index: {}]   ;;  %s866_s3 = inlined_call_operand.vmem [shape: f32[1,8,128], index: 3, kind: output, shape index: {}]  }
   0x1   :  { %s792_s14 = smov 0  }
   0x2 LB: > { %s28_s15 = sadd.s32 1, %s761_s13  ;;  %p649_p0 = scmp.ge.s32.totalorder %s765_s14, 1  ;;  %s765_s14 = sphi %s792_s14, %s13_s14   ;;  %s761_s13 = sphi %s790_s13, %s868_s13   ;;  %s757_s12 = sphi %s788_s12, %s867_s12  }
   0x3   : > { %p29_p1 = scmp.ge.s32.totalorder %s28_s15, 3  ;;  %p215_p2 = scmp.lt.s32.totalorder %s765_s14, 4 }
   0x5   : > { %s870_s15 = smov (%p29_p1, %s28_s15), 0  ;;  %p216_p3 = pnand %p649_p0, %p215_p2 }
   0x6   : > { %s650_s16 = sshll.u32 (!%p216_p3), %s757_s12, 1  ;;  %s652_s17 = sshll.u32 (!%p216_p3), %s757_s12, 5 }
   0x7   : > { %219 = sbr.rel (%p216_p3) target bundleno = 265 (0x109), region = 32  ;;  %p275_p4 = scmp.lt.s32.totalorder (!%p216_p3), %s650_s16, 5 }
   0x8   : > { %p287_p5 = scmp.lt.s32.totalorder (!%p216_p3), %s652_s17, 95  ;;  %p654_p6 = scmp.ne.s32.totalorder (!%p216_p3), %s757_s12, 0 }
   0xc   : > { %s872_s16 = smov (!%p275_p4, %s650_s16), 5  ;;  %s874_s17 = smov (!%p287_p5, %s652_s17), 95 }
   0xd   : > { %s651_s18 = sshll.u32 %s872_s16, 2  ;;  %s653_s22 = sshll.u32 %s874_s17, 2 }
   0xe   : > { %s282_s21 = scalar_lea.vmem %s863_s0, %s651_s18  ;;  %s816_s25 = scalar_lea.vmem %s864_s1, %s653_s22 }
   0xf   : > { %317 = sbr.rel (%p654_p6) target bundleno = 22 (0x16), region = 36 }
  0x14   : > { %v767_v0 = vmov 0.0  }
  0x15   : > { %318 = vst [vmem:[%s866_s3] sm:$0xff] %v767_v0 }
  0x16 PF: > { %v725_v1 = vld [vmem:[%s816_s25 + $0x78] sm:$0xff]   ;;  %v727_v3 = vld [vmem:[%s816_s25 + $0x70] sm:$0xff]   ;;  %v729_v5 = vld [vmem:[%s816_s25 + $0x68] sm:$0xff]   ;;  %p673_p7 = scmp.ne.s32.totalorder %s757_s12, 2 }
  0x17   : > { %v726_v2 = vld [vmem:[%s816_s25 + $0x38] sm:$0xff]   ;;  %678 = vmatprep.subr.bf16.mxu0 %v725_v1  ;;  %v728_v4 = vld [vmem:[%s816_s25 + $0x30] sm:$0xff]   ;;  %v730_v6 = vld [vmem:[%s816_s25 + $0x28] sm:$0xff]  }
  0x18   : > { %679 = vmatpush3.bf16.msra.mxu0 %v726_v2  ;;  %v731_v7 = vld [vmem:[%s816_s25 + $0x60] sm:$0xff]   ;;  %v733_v9 = vld [vmem:[%s816_s25 + $0x58] sm:$0xff]   ;;  %v735_v11 = vld [vmem:[%s816_s25 + $0x50] sm:$0xff]  }
  0x19   : > { %680 = vmatprep.subr.bf16.mxu0 %v727_v3  ;;  %v732_v8 = vld [vmem:[%s816_s25 + $0x20] sm:$0xff]   ;;  %v734_v10 = vld [vmem:[%s816_s25 + $0x18] sm:$0xff]   ;;  %v736_v14 = vld [vmem:[%s816_s25 + $0x10] sm:$0xff]  }
  0x1a   : > { %v320_v12 = vld [vmem:[%s282_s21] sm:$0xff]  ;;  %v737_v15 = vld [vmem:[%s816_s25 + $0x48] sm:$0xff]  }
  0x1b   : > { %v656_v13 = vcombine.high %v320_v12, %v320_v12  ;;  %v738_v16 = vld [vmem:[%s816_s25 + $0x8] sm:$0xff]   ;;  %v739_v17 = vld [vmem:[%s816_s25 + $0x40] sm:$0xff]   ;;  %v655_v19 = vcombine.low %v320_v12, %v320_v12 }
  0x1c   : > { %681 = vmatpush3.bf16.msra.mxu0 %v728_v4  ;;  %v740_v18 = vld [vmem:[%s816_s25] sm:$0xff]  }
  0x1d   : > { %682 = vmatprep.subr.bf16.mxu0 %v729_v5  ;;  %488 = vmatprep.mubr.bf16.mxu0 %v656_v13  ;;  %v319_v21 = vld [vmem:[%s866_s3] sm:$0xff] }
  0x20   : > { %683 = vmatpush3.bf16.msra.mxu0 %v730_v6 }
  0x21   : > { %684 = vmatprep.subr.bf16.mxu0 %v731_v7 }
  0x24   : > { %685 = vmatpush3.bf16.msra.mxu0 %v732_v8 }
  0x25   : > { %686 = vmatprep.subr.bf16.mxu0 %v733_v9 }
  0x28   : > { %687 = vmatpush3.bf16.msra.mxu0 %v734_v10 }
  0x29   : > { %688 = vmatprep.subr.bf16.mxu0 %v735_v11 }
  0x2c   : > { %689 = vmatpush3.bf16.msra.mxu0 %v736_v14 }
  0x2d   : > { %690 = vmatprep.subr.bf16.mxu0 %v737_v15 }
  0x30   : > { %691 = vmatpush3.bf16.msra.mxu0 %v738_v16 }
  0x31   : > { %692 = vmatprep.subr.bf16.mxu0 %v739_v17 }
  0x34   : > { %693 = vmatpush3.bf16.msra.mxu0 %v740_v18 }
  0x37   : > { %489 = vmatmul.mubr.bf16.vlgmr.msra.gmra.mxu0 %v655_v19 }
  0xf7   : > { %v694_v20 = vpop.f32.mrf.mxu0 }
  0xf9   : > { %v695_v22 = vpop.f32.mrf.mxu0 }
  0xfa   : > { %v696_v23 = vadd.f32 %v695_v22, %v694_v20  ;;  %501 = sbr.rel (%p673_p7) target bundleno = 265 (0x109), region = 40 }
  0xfb   : > { %v697_v24 = vpop.f32.mrf.mxu0 }
  0xfc   : > { %v496_v25 = vadd.f32 %v696_v23, %v319_v21 }
  0xfd   : > { %v698_v26 = vpop.f32.mrf.mxu0 }
  0xfe   : > { %497 = vst [vmem:[%s866_s3] sm:$0xff] %v496_v25 }
  0xff   : > { %v674_v28 = vld [vmem:[%s865_s2] ss:$0 sm:$0xff] }
 0x105   : > { %v502_v27 = vld [vmem:[%s866_s3] sm:$0xff] }
 0x106   : > { %v510_v29 = vadd.f32 %v674_v28, %v502_v27 }
 0x108   : > { %511 = vst [vmem:[%s866_s3] sm:$0xff] %v510_v29 }
 0x109 PF: > { %s13_s14 = sadd.s32 1, %s765_s14   ;;  %s867_s12 = smov %s761_s13 }
 0x10a   : > { %p10_p8 = scmp.ge.s32.totalorder %s13_s14, 5   ;;  %s868_s13 = smov %s870_s15 }
 0x10c   :  { %12 = sbr.rel (!%p10_p8) target bundleno = 2 (0x2), region = 76 }

</bundles_post_ra>
